<compile_context>
chip_gen: v6e
topology: v6e:2x2x1
jax: 0.10.0
libtpu: 0.0.40
codegen_flags: <defaults>
</compile_context>

<pallas_src>
import functools
import math

import jax
import jax.numpy as jnp
from jax import lax
from jax.experimental import pallas as pl
from jax.experimental.pallas import tpu as pltpu

# real model dims (match the PyTorch module)
NINP = 300                  # d_model
NHEAD = 3
NHID = 200                  # FFN hidden
HEAD_DIM = NINP // NHEAD    # 100
LN_EPS = 1e-5
SCALE = 1.0 / math.sqrt(HEAD_DIM)

# lane-padded dims (multiples of 128 -> aligned slices, dense vregs/stores)
HEAD_PAD = 128
D_PAD = NHEAD * HEAD_PAD    # 384
H_PAD = 256


# ---------------------------------------------------------------- in-kernel helpers
def _softmax_last(x):
    m = jnp.max(x, axis=-1, keepdims=True)
    e = jnp.exp(x - m)
    # divide on the EUP slot instead of the VALU critical path
    return e * pl.reciprocal(jnp.sum(e, axis=-1, keepdims=True), approx=True)


def _layernorm(x, w, b, lane_mask, n_real):
    # Padding lanes of x are exactly zero, so the mean over the real feature
    # count is a plain sum.  Variance uses the two-pass (x - mu)^2 form; the
    # deviation is lane-masked so the (0 - mu) padding lanes don't contribute.
    inv_n = 1.0 / n_real
    mu = jnp.sum(x, axis=-1, keepdims=True) * inv_n
    d = x - mu
    dm = jnp.where(lane_mask, d, 0.0)
    var = jnp.sum(dm * dm, axis=-1, keepdims=True) * inv_n
    # w/b padding lanes are zero -> output padding lanes stay exactly zero.
    return d * lax.rsqrt(var + LN_EPS) * w + b


def _encoder_layer(x, mask, lane_mask, w_qkv, b_qkv, w_o, b_o, ln1w, ln1b,
                   w1, b1, w2, b2, ln2w, ln2b):
    """Post-norm TransformerEncoderLayer (relu FFN, dropout=0), masked attn."""
    # fused Q/K/V projection: one MXU launch, bf16 operands, f32 accumulation
    qkv = jnp.dot(x.astype(jnp.bfloat16), w_qkv,
                  preferred_element_type=jnp.float32) + b_qkv     # (S, 3*D_PAD)

    attn = None
    for h in range(NHEAD):                 # static unrolled, 128-aligned slices
        lo = h * HEAD_PAD
        # 1/sqrt(head_dim) is folded into the Q weights/bias at init time.
        qh = qkv[:, lo:lo + HEAD_PAD].astype(jnp.bfloat16)
        kh = qkv[:, D_PAD + lo:D_PAD + lo + HEAD_PAD].astype(jnp.bfloat16)
        vh = qkv[:, 2 * D_PAD + lo:2 * D_PAD + lo + HEAD_PAD].astype(jnp.bfloat16)
        s = lax.dot_general(qh, kh, (((1,), (1,)), ((), ())),
                            preferred_element_type=jnp.float32)   # (S, S)
        s = jnp.where(mask, s, -1e30)
        p = _softmax_last(s)
        head = jnp.dot(p.astype(jnp.bfloat16), vh,
                       preferred_element_type=jnp.float32)        # (S, HEAD_PAD)
        # fold the head directly into the out-projection (no concat, no
        # intermediate (S, D_PAD) buffer): head_h @ Wo[rows of head h]
        part = jnp.dot(head.astype(jnp.bfloat16), w_o[lo:lo + HEAD_PAD, :],
                       preferred_element_type=jnp.float32)        # (S, D_PAD)
        attn = part if attn is None else attn + part
    attn = attn + b_o

    # post-norm residual blocks (dropout p=0 -> identity)
    x1 = _layernorm(x + attn, ln1w, ln1b, lane_mask, NINP)

    ff = jnp.dot(x1.astype(jnp.bfloat16), w1,
                 preferred_element_type=jnp.float32) + b1
    ff = jnp.maximum(ff, 0.0)                                     # relu
    ff = jnp.dot(ff.astype(jnp.bfloat16), w2,
                 preferred_element_type=jnp.float32) + b2

    return _layernorm(x1 + ff, ln2w, ln2b, lane_mask, NINP)


# ---------------------------------------------------------------- fused forward kernel
def fused_forward_kernel(
        x_ref, pe_ref,
        wqkv_ref, bqkv_ref, wo_ref, bo_ref, ln1w_ref, ln1b_ref,
        w1_ref, b1_ref, w2_ref, b2_ref, ln2w_ref, ln2b_ref,
        fc1u_ref, fc1v_ref, fc1b_ref, fc2w_ref, fc2b_ref,
        o_ref, *, s1, s2):
    s_pad = x_ref.shape[1]

    # positional-encoding add folded into the kernel (PE table is a shared,
    # constant-indexed input; both encoders share it exactly like PyTorch).
    x = x_ref[0] + pe_ref[...]                                    # (S_PAD, D_PAD)

    # block-diagonal causal mask over the stacked [solvent; solute; pad] rows,
    # built once per invocation: allowed iff same segment AND col <= row.
    row = lax.broadcasted_iota(jnp.int32, (s_pad, s_pad), 0)
    col = lax.broadcasted_iota(jnp.int32, (s_pad, s_pad), 1)
    seg_r = jnp.where(row < s1, 0, jnp.where(row < s1 + s2, 1, 2))
    seg_c = jnp.where(col < s1, 0, jnp.where(col < s1 + s2, 1, 2))
    mask = (seg_r == seg_c) & (col <= row)

    # real-feature lane mask (features 0..299 of the 384 padded lanes)
    lane = lax.broadcasted_iota(jnp.int32, (1, x.shape[-1]), 1)
    lane_mask = lane < NINP

    # single stacked encoder pass over both sequences
    y = _encoder_layer(
        x, mask, lane_mask,
        wqkv_ref[...], bqkv_ref[...], wo_ref[...], bo_ref[...],
        ln1w_ref[...], ln1b_ref[...],
        w1_ref[...], b1_ref[...], w2_ref[...], b2_ref[...],
        ln2w_ref[...], ln2b_ref[...])

    H = y[:s1]                                                    # (S1, D_PAD)
    G = y[s1:s1 + s2]                                             # (S2, D_PAD)
    hb = H.astype(jnp.bfloat16)
    gb = G.astype(jnp.bfloat16)

    # cross-attention pooling head: a_score[i, j] = H[i] . G[j]
    scores = lax.dot_general(hb, gb, (((1,), (1,)), ((), ())),
                             preferred_element_type=jnp.float32)  # (S1, S2)
    a = _softmax_last(scores)                                     # softmax over G axis
    ab = a.astype(jnp.bfloat16)
    P = jnp.dot(ab, gb, preferred_element_type=jnp.float32)       # (S1, D_PAD)
    Q = lax.dot_general(ab, hb, (((0,), (0,)), ((), ())),         # a^T @ H
                        preferred_element_type=jnp.float32)       # (S2, D_PAD)
    inpu = jnp.sum(jnp.maximum(H, P), axis=0, keepdims=True)      # (1, D_PAD)
    inpv = jnp.sum(jnp.maximum(G, Q), axis=0, keepdims=True)      # (1, D_PAD)

    # fc1 on cat(inpu, inpv): weight split in two -> no in-kernel concat
    hid = (jnp.dot(inpu.astype(jnp.bfloat16), fc1u_ref[...],
                   preferred_element_type=jnp.float32)
           + jnp.dot(inpv.astype(jnp.bfloat16), fc1v_ref[...],
                     preferred_element_type=jnp.float32)
           + fc1b_ref[...])
    hid = jnp.maximum(hid, 0.0)                                   # relu(fc1)
    # fc2 is a 1-output row: lane-reduce on the XLU instead of an N=1 matmul
    out = jnp.sum(hid * fc2w_ref[...], axis=-1, keepdims=True) + fc2b_ref[...]
    o_ref[...] = out                                              # (1, 1)


# ---------------------------------------------------------------- wrapper
def _const_spec(shape):
    nd = len(shape)
    return pl.BlockSpec(shape, lambda b, _nd=nd: (0,) * _nd)


def positional_encoding(seq_len):
    pos = jnp.arange(seq_len, dtype=jnp.float32)[:, None]
    div = jnp.exp(jnp.arange(0, NINP, 2, dtype=jnp.float32)
                  * (-math.log(10000.0) / NINP))
    pe = jnp.zeros((seq_len, NINP), jnp.float32)
    pe = pe.at[:, 0::2].set(jnp.sin(pos * div))
    pe = pe.at[:, 1::2].set(jnp.cos(pos * div))
    return jnp.pad(pe, ((0, 0), (0, D_PAD - NINP)))


def transformer_forward(solv_src, solu_src, params):
    # inputs are (seq, batch=1, ninp) exactly like the PyTorch module
    s1 = solv_src.shape[0]
    s2 = solu_src.shape[0]
    s_pad = max(8, ((s1 + s2 + 7) // 8) * 8)

    # stack both sequences into one lane/sublane-padded activation tile
    x_st = jnp.zeros((1, s_pad, D_PAD), jnp.float32)
    x_st = x_st.at[0, :s1, :NINP].set(solv_src[:, 0, :])
    x_st = x_st.at[0, s1:s1 + s2, :NINP].set(solu_src[:, 0, :])

    pe_st = jnp.zeros((s_pad, D_PAD), jnp.float32)
    pe_st = pe_st.at[:s1].set(positional_encoding(s1))
    pe_st = pe_st.at[s1:s1 + s2].set(positional_encoding(s2))

    weight_args = (
        params["w_qkv"], params["b_qkv"], params["w_o"], params["b_o"],
        params["ln1_w"], params["ln1_b"],
        params["w1"], params["b1"], params["w2"], params["b2"],
        params["ln2_w"], params["ln2_b"],
        params["fc1_wu"], params["fc1_wv"], params["fc1_b"],
        params["fc2_w"], params["fc2_b"])

    batch = x_st.shape[0]   # 1 pair for this module; structure supports B > 1
    in_specs = ([pl.BlockSpec((1, s_pad, D_PAD), lambda b: (b, 0, 0)),
                 _const_spec(pe_st.shape)]
                + [_const_spec(w.shape) for w in weight_args])

    out = pl.pallas_call(
        functools.partial(fused_forward_kernel, s1=s1, s2=s2),
        out_shape=jax.ShapeDtypeStruct((batch, 1), jnp.float32),
        grid=(batch,),
        in_specs=in_specs,
        out_specs=pl.BlockSpec((1, 1), lambda b: (b, 0)),
        compiler_params=pltpu.CompilerParams(
            dimension_semantics=("parallel",)),
    )(x_st, pe_st, *weight_args)
    return out.reshape((1,))                          # matches PyTorch output (1,)


# ---------------------------------------------------------------- deterministic params
def init_params(key):
    ks = jax.random.split(key, 10)
    u = lambda k, shp, a: jax.random.uniform(k, shp, jnp.float32, minval=-a, maxval=a)
    wa = 1.0 / math.sqrt(NINP)

    # unpadded weights, stored (in_features, out_features)
    wq = u(ks[0], (NINP, NINP), wa)
    wk = u(ks[1], (NINP, NINP), wa)
    wv = u(ks[2], (NINP, NINP), wa)
    wo = u(ks[3], (NINP, NINP), wa)
    bq = bk = bv = jnp.zeros((NINP,), jnp.float32)    # in_proj_bias init = 0
    bo = jnp.zeros((NINP,), jnp.float32)              # out_proj bias init = 0
    w1 = u(ks[4], (NINP, NHID), wa)
    b1 = u(ks[5], (NHID,), wa)
    w2 = u(ks[6], (NHID, NINP), 1.0 / math.sqrt(NHID))
    b2 = u(ks[7], (NINP,), 1.0 / math.sqrt(NHID))
    fc1_w = u(ks[8], (NINP, 2 * NINP), 0.1)           # PyTorch layout (out=300, in=600)
    fc2_w = u(ks[9], (1, NINP), 0.1)                  # PyTorch layout (out=1, in=300)

    def head_cols(w):   # (300,300) -> (384,384): per-head output cols padded to 128
        blocks = [jnp.pad(w[:, h * HEAD_DIM:(h + 1) * HEAD_DIM],
                          ((0, D_PAD - NINP), (0, HEAD_PAD - HEAD_DIM)))
                  for h in range(NHEAD)]
        return jnp.concatenate(blocks, axis=1)

    def head_rows(w):   # (300,300) -> (384,384): per-head input rows padded to 128
        blocks = [jnp.pad(w[h * HEAD_DIM:(h + 1) * HEAD_DIM, :],
                          ((0, HEAD_PAD - HEAD_DIM), (0, D_PAD - NINP)))
                  for h in range(NHEAD)]
        return jnp.concatenate(blocks, axis=0)

    def head_vec(b):    # (300,) -> (1,384): per-head chunks padded to 128
        blocks = [jnp.pad(b[h * HEAD_DIM:(h + 1) * HEAD_DIM],
                          (0, HEAD_PAD - HEAD_DIM))
                  for h in range(NHEAD)]
        return jnp.concatenate(blocks)[None, :]

    def pad_vec(b, n):  # (m,) -> (1,n)
        return jnp.pad(b, (0, n - b.shape[0]))[None, :]

    bf = lambda w: w.astype(jnp.bfloat16)             # weights in bf16, biases f32

    p = {}
    # fused, per-head-padded QKV projection; 1/sqrt(head_dim) folded into Q
    p["w_qkv"] = bf(jnp.concatenate(
        [head_cols(wq * SCALE), head_cols(wk), head_cols(wv)], axis=1))  # (384, 1152)
    p["b_qkv"] = jnp.concatenate(
        [head_vec(bq * SCALE), head_vec(bk), head_vec(bv)], axis=1)      # (1, 1152)
    p["w_o"] = bf(head_rows(wo))                                         # (384, 384)
    p["b_o"] = pad_vec(bo, D_PAD)
    p["ln1_w"] = pad_vec(jnp.ones((NINP,), jnp.float32), D_PAD)
    p["ln1_b"] = pad_vec(jnp.zeros((NINP,), jnp.float32), D_PAD)
    # FFN: linear1 (300->200), linear2 (200->300), padded to (384,256)/(256,384)
    p["w1"] = bf(jnp.pad(w1, ((0, D_PAD - NINP), (0, H_PAD - NHID))))
    p["b1"] = pad_vec(b1, H_PAD)
    p["w2"] = bf(jnp.pad(w2, ((0, H_PAD - NHID), (0, D_PAD - NINP))))
    p["b2"] = pad_vec(b2, D_PAD)
    p["ln2_w"] = pad_vec(jnp.ones((NINP,), jnp.float32), D_PAD)
    p["ln2_b"] = pad_vec(jnp.zeros((NINP,), jnp.float32), D_PAD)
    # fc head (init_weights: uniform(-0.1, 0.1) weight, zero bias)
    p["fc1_wu"] = bf(jnp.pad(fc1_w[:, :NINP].T,
                             ((0, D_PAD - NINP), (0, D_PAD - NINP))))
    p["fc1_wv"] = bf(jnp.pad(fc1_w[:, NINP:].T,
                             ((0, D_PAD - NINP), (0, D_PAD - NINP))))
    p["fc1_b"] = pad_vec(jnp.zeros((NINP,), jnp.float32), D_PAD)
    p["fc2_w"] = jnp.pad(fc2_w, ((0, 0), (0, D_PAD - NINP)))             # (1, 384) f32
    p["fc2_b"] = jnp.zeros((1, 1), jnp.float32)
    return p


if __name__ == "__main__":
    S_SOLV, S_SOLU = 8, 6
    key = jax.random.PRNGKey(0)
    k_solv, k_solu, k_params = jax.random.split(key, 3)
    solv_src = jax.random.normal(k_solv, (S_SOLV, 1, NINP), jnp.float32)
    solu_src = jax.random.normal(k_solu, (S_SOLU, 1, NINP), jnp.float32)
    params = init_params(k_params)

    fwd = jax.jit(transformer_forward)
    out = fwd(solv_src, solu_src, params)
    jax.block_until_ready(out)
    assert out.shape == (1,) and bool(jnp.isfinite(out).all())
    print("KERNEL_OK")
</pallas_src>

<mosaic_0001>
module attributes {stable_mosaic.version = 11 : i64} {
  func.func @fused_forward_kernel(%arg0: i32, %arg1: memref<1x16x384xf32, #tpu.memory_space<vmem>>, %arg2: memref<16x384xf32, #tpu.memory_space<vmem>>, %arg3: memref<384x1152xbf16, #tpu.memory_space<vmem>>, %arg4: memref<1x1152xf32, #tpu.memory_space<vmem>>, %arg5: memref<384x384xbf16, #tpu.memory_space<vmem>>, %arg6: memref<1x384xf32, #tpu.memory_space<vmem>>, %arg7: memref<1x384xf32, #tpu.memory_space<vmem>>, %arg8: memref<1x384xf32, #tpu.memory_space<vmem>>, %arg9: memref<384x256xbf16, #tpu.memory_space<vmem>>, %arg10: memref<1x256xf32, #tpu.memory_space<vmem>>, %arg11: memref<256x384xbf16, #tpu.memory_space<vmem>>, %arg12: memref<1x384xf32, #tpu.memory_space<vmem>>, %arg13: memref<1x384xf32, #tpu.memory_space<vmem>>, %arg14: memref<1x384xf32, #tpu.memory_space<vmem>>, %arg15: memref<384x384xbf16, #tpu.memory_space<vmem>>, %arg16: memref<384x384xbf16, #tpu.memory_space<vmem>>, %arg17: memref<1x384xf32, #tpu.memory_space<vmem>>, %arg18: memref<1x384xf32, #tpu.memory_space<vmem>>, %arg19: memref<1x1xf32, #tpu.memory_space<vmem>>, %arg20: memref<1x1xf32, #tpu.memory_space<vmem>>) attributes {dimension_semantics = [#tpu.dimension_semantics<parallel>], iteration_bounds = array<i64: 1>, scalar_prefetch = 0 : i64, scratch_operands = 0 : i64, tpu.core_type = #tpu.core_type<tc>, window_params = [{transform_indices = @transform_0, window_bounds = array<i64: 1, 16, 384>}, {pipeline_mode = #tpu.pipeline_mode<synchronous>, transform_indices = @transform_1, window_bounds = array<i64: 16, 384>}, {pipeline_mode = #tpu.pipeline_mode<synchronous>, transform_indices = @transform_2, window_bounds = array<i64: 384, 1152>}, {pipeline_mode = #tpu.pipeline_mode<synchronous>, transform_indices = @transform_3, window_bounds = array<i64: 1, 1152>}, {pipeline_mode = #tpu.pipeline_mode<synchronous>, transform_indices = @transform_4, window_bounds = array<i64: 384, 384>}, {pipeline_mode = #tpu.pipeline_mode<synchronous>, transform_indices = @transform_5, window_bounds = array<i64: 1, 384>}, {pipeline_mode = #tpu.pipeline_mode<synchronous>, transform_indices = @transform_6, window_bounds = array<i64: 1, 384>}, {pipeline_mode = #tpu.pipeline_mode<synchronous>, transform_indices = @transform_7, window_bounds = array<i64: 1, 384>}, {pipeline_mode = #tpu.pipeline_mode<synchronous>, transform_indices = @transform_8, window_bounds = array<i64: 384, 256>}, {pipeline_mode = #tpu.pipeline_mode<synchronous>, transform_indices = @transform_9, window_bounds = array<i64: 1, 256>}, {pipeline_mode = #tpu.pipeline_mode<synchronous>, transform_indices = @transform_10, window_bounds = array<i64: 256, 384>}, {pipeline_mode = #tpu.pipeline_mode<synchronous>, transform_indices = @transform_11, window_bounds = array<i64: 1, 384>}, {pipeline_mode = #tpu.pipeline_mode<synchronous>, transform_indices = @transform_12, window_bounds = array<i64: 1, 384>}, {pipeline_mode = #tpu.pipeline_mode<synchronous>, transform_indices = @transform_13, window_bounds = array<i64: 1, 384>}, {pipeline_mode = #tpu.pipeline_mode<synchronous>, transform_indices = @transform_14, window_bounds = array<i64: 384, 384>}, {pipeline_mode = #tpu.pipeline_mode<synchronous>, transform_indices = @transform_15, window_bounds = array<i64: 384, 384>}, {pipeline_mode = #tpu.pipeline_mode<synchronous>, transform_indices = @transform_16, window_bounds = array<i64: 1, 384>}, {pipeline_mode = #tpu.pipeline_mode<synchronous>, transform_indices = @transform_17, window_bounds = array<i64: 1, 384>}, {pipeline_mode = #tpu.pipeline_mode<synchronous>, transform_indices = @transform_18, window_bounds = array<i64: 1, 1>}, {transform_indices = @transform_19, window_bounds = array<i64: 1, 1>}]} {
    %c0 = arith.constant 0 : index
    %c0_0 = arith.constant 0 : index
    %c0_1 = arith.constant 0 : index
    %0 = vector.load %arg1[%c0, %c0_0, %c0_1] : memref<1x16x384xf32, #tpu.memory_space<vmem>>, vector<1x16x384xf32>
    %1 = vector.shape_cast %0 : vector<1x16x384xf32> to vector<16x384xf32>
    %c0_2 = arith.constant 0 : index
    %c0_3 = arith.constant 0 : index
    %2 = vector.load %arg2[%c0_2, %c0_3] : memref<16x384xf32, #tpu.memory_space<vmem>>, vector<16x384xf32>
    %3 = arith.addf %1, %2 : vector<16x384xf32>
    %4 = tpu.iota {dimensions = array<i32: 0>} : vector<16x16xi32>
    %5 = tpu.iota {dimensions = array<i32: 1>} : vector<16x16xi32>
    %c8_i32 = arith.constant 8 : i32
    %6 = vector.broadcast %c8_i32 : i32 to vector<16x16xi32>
    %7 = arith.cmpi slt, %4, %6 : vector<16x16xi32>
    %c14_i32 = arith.constant 14 : i32
    %8 = vector.broadcast %c14_i32 : i32 to vector<16x16xi32>
    %9 = arith.cmpi slt, %4, %8 : vector<16x16xi32>
    %c1_i32 = arith.constant 1 : i32
    %c2_i32 = arith.constant 2 : i32
    %10 = vector.broadcast %c1_i32 : i32 to vector<16x16xi32>
    %11 = vector.broadcast %c2_i32 : i32 to vector<16x16xi32>
    %12 = arith.select %9, %10, %11 : vector<16x16xi1>, vector<16x16xi32>
    %c0_i32 = arith.constant 0 : i32
    %13 = vector.broadcast %c0_i32 : i32 to vector<16x16xi32>
    %14 = arith.select %7, %13, %12 : vector<16x16xi1>, vector<16x16xi32>
    %c8_i32_4 = arith.constant 8 : i32
    %15 = vector.broadcast %c8_i32_4 : i32 to vector<16x16xi32>
    %16 = arith.cmpi slt, %5, %15 : vector<16x16xi32>
    %c14_i32_5 = arith.constant 14 : i32
    %17 = vector.broadcast %c14_i32_5 : i32 to vector<16x16xi32>
    %18 = arith.cmpi slt, %5, %17 : vector<16x16xi32>
    %c1_i32_6 = arith.constant 1 : i32
    %c2_i32_7 = arith.constant 2 : i32
    %19 = vector.broadcast %c1_i32_6 : i32 to vector<16x16xi32>
    %20 = vector.broadcast %c2_i32_7 : i32 to vector<16x16xi32>
    %21 = arith.select %18, %19, %20 : vector<16x16xi1>, vector<16x16xi32>
    %c0_i32_8 = arith.constant 0 : i32
    %22 = vector.broadcast %c0_i32_8 : i32 to vector<16x16xi32>
    %23 = arith.select %16, %22, %21 : vector<16x16xi1>, vector<16x16xi32>
    %24 = arith.cmpi eq, %14, %23 : vector<16x16xi32>
    %25 = arith.cmpi sle, %5, %4 : vector<16x16xi32>
    %26 = arith.andi %24, %25 : vector<16x16xi1>
    %27 = tpu.iota {dimensions = array<i32: 1>} : vector<1x384xi32>
    %c300_i32 = arith.constant 300 : i32
    %28 = vector.broadcast %c300_i32 : i32 to vector<1x384xi32>
    %29 = arith.cmpi slt, %27, %28 : vector<1x384xi32>
    %c0_9 = arith.constant 0 : index
    %c0_10 = arith.constant 0 : index
    %30 = vector.load %arg3[%c0_9, %c0_10] : memref<384x1152xbf16, #tpu.memory_space<vmem>>, vector<384x1152xbf16>
    %c0_11 = arith.constant 0 : index
    %c0_12 = arith.constant 0 : index
    %31 = vector.load %arg4[%c0_11, %c0_12] : memref<1x1152xf32, #tpu.memory_space<vmem>>, vector<1x1152xf32>
    %c0_13 = arith.constant 0 : index
    %c0_14 = arith.constant 0 : index
    %32 = vector.load %arg5[%c0_13, %c0_14] : memref<384x384xbf16, #tpu.memory_space<vmem>>, vector<384x384xbf16>
    %c0_15 = arith.constant 0 : index
    %c0_16 = arith.constant 0 : index
    %33 = vector.load %arg6[%c0_15, %c0_16] : memref<1x384xf32, #tpu.memory_space<vmem>>, vector<1x384xf32>
    %c0_17 = arith.constant 0 : index
    %c0_18 = arith.constant 0 : index
    %34 = vector.load %arg7[%c0_17, %c0_18] : memref<1x384xf32, #tpu.memory_space<vmem>>, vector<1x384xf32>
    %c0_19 = arith.constant 0 : index
    %c0_20 = arith.constant 0 : index
    %35 = vector.load %arg8[%c0_19, %c0_20] : memref<1x384xf32, #tpu.memory_space<vmem>>, vector<1x384xf32>
    %c0_21 = arith.constant 0 : index
    %c0_22 = arith.constant 0 : index
    %36 = vector.load %arg9[%c0_21, %c0_22] : memref<384x256xbf16, #tpu.memory_space<vmem>>, vector<384x256xbf16>
    %c0_23 = arith.constant 0 : index
    %c0_24 = arith.constant 0 : index
    %37 = vector.load %arg10[%c0_23, %c0_24] : memref<1x256xf32, #tpu.memory_space<vmem>>, vector<1x256xf32>
    %c0_25 = arith.constant 0 : index
    %c0_26 = arith.constant 0 : index
    %38 = vector.load %arg11[%c0_25, %c0_26] : memref<256x384xbf16, #tpu.memory_space<vmem>>, vector<256x384xbf16>
    %c0_27 = arith.constant 0 : index
    %c0_28 = arith.constant 0 : index
    %39 = vector.load %arg12[%c0_27, %c0_28] : memref<1x384xf32, #tpu.memory_space<vmem>>, vector<1x384xf32>
    %c0_29 = arith.constant 0 : index
    %c0_30 = arith.constant 0 : index
    %40 = vector.load %arg13[%c0_29, %c0_30] : memref<1x384xf32, #tpu.memory_space<vmem>>, vector<1x384xf32>
    %c0_31 = arith.constant 0 : index
    %c0_32 = arith.constant 0 : index
    %41 = vector.load %arg14[%c0_31, %c0_32] : memref<1x384xf32, #tpu.memory_space<vmem>>, vector<1x384xf32>
    %42 = arith.truncf %3 : vector<16x384xf32> to vector<16x384xbf16>
    %cst = arith.constant dense<0.000000e+00> : vector<16x1152xf32>
    %43 = tpu.matmul %42, %30, %cst {dimension_numbers = #tpu.dot_dimension_numbers<[1], [0], [0], [1], [0, 0, 1, 1], [], []>} : vector<16x384xbf16>, vector<384x1152xbf16>, vector<16x1152xf32> -> vector<16x1152xf32>
    %44 = vector.broadcast %31 : vector<1x1152xf32> to vector<16x1152xf32>
    %45 = arith.addf %43, %44 : vector<16x1152xf32>
    %46 = vector.extract_strided_slice %45 {offsets = [0, 0], sizes = [16, 128], strides = [1, 1]} : vector<16x1152xf32> to vector<16x128xf32>
    %47 = arith.truncf %46 : vector<16x128xf32> to vector<16x128xbf16>
    %48 = vector.extract_strided_slice %45 {offsets = [0, 384], sizes = [16, 128], strides = [1, 1]} : vector<16x1152xf32> to vector<16x128xf32>
    %49 = arith.truncf %48 : vector<16x128xf32> to vector<16x128xbf16>
    %50 = vector.extract_strided_slice %45 {offsets = [0, 768], sizes = [16, 128], strides = [1, 1]} : vector<16x1152xf32> to vector<16x128xf32>
    %51 = arith.truncf %50 : vector<16x128xf32> to vector<16x128xbf16>
    %cst_33 = arith.constant dense<0.000000e+00> : vector<16x16xf32>
    %52 = tpu.matmul %47, %49, %cst_33 {dimension_numbers = #tpu.dot_dimension_numbers<[1], [1], [0], [0], [0, 0, 1, 0], [], []>} : vector<16x128xbf16>, vector<16x128xbf16>, vector<16x16xf32> -> vector<16x16xf32>
    %cst_34 = arith.constant -1.000000e+30 : f32
    %53 = vector.broadcast %cst_34 : f32 to vector<16x16xf32>
    %54 = arith.select %26, %52, %53 : vector<16x16xi1>, vector<16x16xf32>
    %cst_35 = arith.constant dense<0xFF800000> : vector<16xf32>
    %55 = vector.multi_reduction <maximumf>, %54, %cst_35 [1] : vector<16x16xf32> to vector<16xf32>
    %56 = vector.shape_cast %55 : vector<16xf32> to vector<16x1xf32>
    %57 = vector.broadcast %56 : vector<16x1xf32> to vector<16x16xf32>
    %58 = arith.subf %54, %57 : vector<16x16xf32>
    %59 = math.exp %58 : vector<16x16xf32>
    %cst_36 = arith.constant dense<0.000000e+00> : vector<16xf32>
    %60 = vector.multi_reduction <add>, %59, %cst_36 [1] : vector<16x16xf32> to vector<16xf32>
    %61 = vector.shape_cast %60 : vector<16xf32> to vector<16x1xf32>
    %62 = tpu.reciprocal %61 {approx = true} : vector<16x1xf32> -> vector<16x1xf32>
    %63 = vector.broadcast %62 : vector<16x1xf32> to vector<16x16xf32>
    %64 = arith.mulf %59, %63 : vector<16x16xf32>
    %65 = arith.truncf %64 : vector<16x16xf32> to vector<16x16xbf16>
    %cst_37 = arith.constant dense<0.000000e+00> : vector<16x128xf32>
    %66 = tpu.matmul %65, %51, %cst_37 {dimension_numbers = #tpu.dot_dimension_numbers<[1], [0], [0], [1], [0, 0, 1, 1], [], []>} : vector<16x16xbf16>, vector<16x128xbf16>, vector<16x128xf32> -> vector<16x128xf32>
    %67 = arith.truncf %66 : vector<16x128xf32> to vector<16x128xbf16>
    %68 = vector.extract_strided_slice %32 {offsets = [0, 0], sizes = [128, 384], strides = [1, 1]} : vector<384x384xbf16> to vector<128x384xbf16>
    %cst_38 = arith.constant dense<0.000000e+00> : vector<16x384xf32>
    %69 = tpu.matmul %67, %68, %cst_38 {dimension_numbers = #tpu.dot_dimension_numbers<[1], [0], [0], [1], [0, 0, 1, 1], [], []>} : vector<16x128xbf16>, vector<128x384xbf16>, vector<16x384xf32> -> vector<16x384xf32>
    %70 = vector.extract_strided_slice %45 {offsets = [0, 128], sizes = [16, 128], strides = [1, 1]} : vector<16x1152xf32> to vector<16x128xf32>
    %71 = arith.truncf %70 : vector<16x128xf32> to vector<16x128xbf16>
    %72 = vector.extract_strided_slice %45 {offsets = [0, 512], sizes = [16, 128], strides = [1, 1]} : vector<16x1152xf32> to vector<16x128xf32>
    %73 = arith.truncf %72 : vector<16x128xf32> to vector<16x128xbf16>
    %74 = vector.extract_strided_slice %45 {offsets = [0, 896], sizes = [16, 128], strides = [1, 1]} : vector<16x1152xf32> to vector<16x128xf32>
    %75 = arith.truncf %74 : vector<16x128xf32> to vector<16x128xbf16>
    %cst_39 = arith.constant dense<0.000000e+00> : vector<16x16xf32>
    %76 = tpu.matmul %71, %73, %cst_39 {dimension_numbers = #tpu.dot_dimension_numbers<[1], [1], [0], [0], [0, 0, 1, 0], [], []>} : vector<16x128xbf16>, vector<16x128xbf16>, vector<16x16xf32> -> vector<16x16xf32>
    %cst_40 = arith.constant -1.000000e+30 : f32
    %77 = vector.broadcast %cst_40 : f32 to vector<16x16xf32>
    %78 = arith.select %26, %76, %77 : vector<16x16xi1>, vector<16x16xf32>
    %cst_41 = arith.constant dense<0xFF800000> : vector<16xf32>
    %79 = vector.multi_reduction <maximumf>, %78, %cst_41 [1] : vector<16x16xf32> to vector<16xf32>
    %80 = vector.shape_cast %79 : vector<16xf32> to vector<16x1xf32>
    %81 = vector.broadcast %80 : vector<16x1xf32> to vector<16x16xf32>
    %82 = arith.subf %78, %81 : vector<16x16xf32>
    %83 = math.exp %82 : vector<16x16xf32>
    %cst_42 = arith.constant dense<0.000000e+00> : vector<16xf32>
    %84 = vector.multi_reduction <add>, %83, %cst_42 [1] : vector<16x16xf32> to vector<16xf32>
    %85 = vector.shape_cast %84 : vector<16xf32> to vector<16x1xf32>
    %86 = tpu.reciprocal %85 {approx = true} : vector<16x1xf32> -> vector<16x1xf32>
    %87 = vector.broadcast %86 : vector<16x1xf32> to vector<16x16xf32>
    %88 = arith.mulf %83, %87 : vector<16x16xf32>
    %89 = arith.truncf %88 : vector<16x16xf32> to vector<16x16xbf16>
    %cst_43 = arith.constant dense<0.000000e+00> : vector<16x128xf32>
    %90 = tpu.matmul %89, %75, %cst_43 {dimension_numbers = #tpu.dot_dimension_numbers<[1], [0], [0], [1], [0, 0, 1, 1], [], []>} : vector<16x16xbf16>, vector<16x128xbf16>, vector<16x128xf32> -> vector<16x128xf32>
    %91 = arith.truncf %90 : vector<16x128xf32> to vector<16x128xbf16>
    %92 = vector.extract_strided_slice %32 {offsets = [128, 0], sizes = [128, 384], strides = [1, 1]} : vector<384x384xbf16> to vector<128x384xbf16>
    %cst_44 = arith.constant dense<0.000000e+00> : vector<16x384xf32>
    %93 = tpu.matmul %91, %92, %cst_44 {dimension_numbers = #tpu.dot_dimension_numbers<[1], [0], [0], [1], [0, 0, 1, 1], [], []>} : vector<16x128xbf16>, vector<128x384xbf16>, vector<16x384xf32> -> vector<16x384xf32>
    %94 = arith.addf %69, %93 : vector<16x384xf32>
    %95 = vector.extract_strided_slice %45 {offsets = [0, 256], sizes = [16, 128], strides = [1, 1]} : vector<16x1152xf32> to vector<16x128xf32>
    %96 = arith.truncf %95 : vector<16x128xf32> to vector<16x128xbf16>
    %97 = vector.extract_strided_slice %45 {offsets = [0, 640], sizes = [16, 128], strides = [1, 1]} : vector<16x1152xf32> to vector<16x128xf32>
    %98 = arith.truncf %97 : vector<16x128xf32> to vector<16x128xbf16>
    %99 = vector.extract_strided_slice %45 {offsets = [0, 1024], sizes = [16, 128], strides = [1, 1]} : vector<16x1152xf32> to vector<16x128xf32>
    %100 = arith.truncf %99 : vector<16x128xf32> to vector<16x128xbf16>
    %cst_45 = arith.constant dense<0.000000e+00> : vector<16x16xf32>
    %101 = tpu.matmul %96, %98, %cst_45 {dimension_numbers = #tpu.dot_dimension_numbers<[1], [1], [0], [0], [0, 0, 1, 0], [], []>} : vector<16x128xbf16>, vector<16x128xbf16>, vector<16x16xf32> -> vector<16x16xf32>
    %cst_46 = arith.constant -1.000000e+30 : f32
    %102 = vector.broadcast %cst_46 : f32 to vector<16x16xf32>
    %103 = arith.select %26, %101, %102 : vector<16x16xi1>, vector<16x16xf32>
    %cst_47 = arith.constant dense<0xFF800000> : vector<16xf32>
    %104 = vector.multi_reduction <maximumf>, %103, %cst_47 [1] : vector<16x16xf32> to vector<16xf32>
    %105 = vector.shape_cast %104 : vector<16xf32> to vector<16x1xf32>
    %106 = vector.broadcast %105 : vector<16x1xf32> to vector<16x16xf32>
    %107 = arith.subf %103, %106 : vector<16x16xf32>
    %108 = math.exp %107 : vector<16x16xf32>
    %cst_48 = arith.constant dense<0.000000e+00> : vector<16xf32>
    %109 = vector.multi_reduction <add>, %108, %cst_48 [1] : vector<16x16xf32> to vector<16xf32>
    %110 = vector.shape_cast %109 : vector<16xf32> to vector<16x1xf32>
    %111 = tpu.reciprocal %110 {approx = true} : vector<16x1xf32> -> vector<16x1xf32>
    %112 = vector.broadcast %111 : vector<16x1xf32> to vector<16x16xf32>
    %113 = arith.mulf %108, %112 : vector<16x16xf32>
    %114 = arith.truncf %113 : vector<16x16xf32> to vector<16x16xbf16>
    %cst_49 = arith.constant dense<0.000000e+00> : vector<16x128xf32>
    %115 = tpu.matmul %114, %100, %cst_49 {dimension_numbers = #tpu.dot_dimension_numbers<[1], [0], [0], [1], [0, 0, 1, 1], [], []>} : vector<16x16xbf16>, vector<16x128xbf16>, vector<16x128xf32> -> vector<16x128xf32>
    %116 = arith.truncf %115 : vector<16x128xf32> to vector<16x128xbf16>
    %117 = vector.extract_strided_slice %32 {offsets = [256, 0], sizes = [128, 384], strides = [1, 1]} : vector<384x384xbf16> to vector<128x384xbf16>
    %cst_50 = arith.constant dense<0.000000e+00> : vector<16x384xf32>
    %118 = tpu.matmul %116, %117, %cst_50 {dimension_numbers = #tpu.dot_dimension_numbers<[1], [0], [0], [1], [0, 0, 1, 1], [], []>} : vector<16x128xbf16>, vector<128x384xbf16>, vector<16x384xf32> -> vector<16x384xf32>
    %119 = arith.addf %94, %118 : vector<16x384xf32>
    %120 = vector.broadcast %33 : vector<1x384xf32> to vector<16x384xf32>
    %121 = arith.addf %119, %120 : vector<16x384xf32>
    %122 = arith.addf %3, %121 : vector<16x384xf32>
    %cst_51 = arith.constant dense<0.000000e+00> : vector<16xf32>
    %123 = vector.multi_reduction <add>, %122, %cst_51 [1] : vector<16x384xf32> to vector<16xf32>
    %124 = vector.shape_cast %123 : vector<16xf32> to vector<16x1xf32>
    %cst_52 = arith.constant 0.00333333341 : f32
    %125 = vector.broadcast %cst_52 : f32 to vector<16x1xf32>
    %126 = arith.mulf %124, %125 : vector<16x1xf32>
    %127 = vector.broadcast %126 : vector<16x1xf32> to vector<16x384xf32>
    %128 = arith.subf %122, %127 : vector<16x384xf32>
    %cst_53 = arith.constant 0.000000e+00 : f32
    %129 = vector.shape_cast %29 : vector<1x384xi1> to vector<1x384xi1>
    %130 = vector.broadcast %129 : vector<1x384xi1> to vector<16x384xi1>
    %131 = vector.broadcast %cst_53 : f32 to vector<16x384xf32>
    %132 = arith.select %130, %128, %131 : vector<16x384xi1>, vector<16x384xf32>
    %133 = arith.mulf %132, %132 : vector<16x384xf32>
    %cst_54 = arith.constant dense<0.000000e+00> : vector<16xf32>
    %134 = vector.multi_reduction <add>, %133, %cst_54 [1] : vector<16x384xf32> to vector<16xf32>
    %135 = vector.shape_cast %134 : vector<16xf32> to vector<16x1xf32>
    %cst_55 = arith.constant 0.00333333341 : f32
    %136 = vector.broadcast %cst_55 : f32 to vector<16x1xf32>
    %137 = arith.mulf %135, %136 : vector<16x1xf32>
    %cst_56 = arith.constant 9.99999974E-6 : f32
    %138 = vector.broadcast %cst_56 : f32 to vector<16x1xf32>
    %139 = arith.addf %137, %138 : vector<16x1xf32>
    %140 = math.rsqrt %139 : vector<16x1xf32>
    %141 = vector.broadcast %140 : vector<16x1xf32> to vector<16x384xf32>
    %142 = arith.mulf %128, %141 : vector<16x384xf32>
    %143 = vector.broadcast %34 : vector<1x384xf32> to vector<16x384xf32>
    %144 = arith.mulf %142, %143 : vector<16x384xf32>
    %145 = vector.broadcast %35 : vector<1x384xf32> to vector<16x384xf32>
    %146 = arith.addf %144, %145 : vector<16x384xf32>
    %147 = arith.truncf %146 : vector<16x384xf32> to vector<16x384xbf16>
    %cst_57 = arith.constant dense<0.000000e+00> : vector<16x256xf32>
    %148 = tpu.matmul %147, %36, %cst_57 {dimension_numbers = #tpu.dot_dimension_numbers<[1], [0], [0], [1], [0, 0, 1, 1], [], []>} : vector<16x384xbf16>, vector<384x256xbf16>, vector<16x256xf32> -> vector<16x256xf32>
    %149 = vector.broadcast %37 : vector<1x256xf32> to vector<16x256xf32>
    %150 = arith.addf %148, %149 : vector<16x256xf32>
    %cst_58 = arith.constant 0.000000e+00 : f32
    %151 = vector.broadcast %cst_58 : f32 to vector<16x256xf32>
    %152 = arith.maximumf %150, %151 : vector<16x256xf32>
    %153 = arith.truncf %152 : vector<16x256xf32> to vector<16x256xbf16>
    %cst_59 = arith.constant dense<0.000000e+00> : vector<16x384xf32>
    %154 = tpu.matmul %153, %38, %cst_59 {dimension_numbers = #tpu.dot_dimension_numbers<[1], [0], [0], [1], [0, 0, 1, 1], [], []>} : vector<16x256xbf16>, vector<256x384xbf16>, vector<16x384xf32> -> vector<16x384xf32>
    %155 = vector.broadcast %39 : vector<1x384xf32> to vector<16x384xf32>
    %156 = arith.addf %154, %155 : vector<16x384xf32>
    %157 = arith.addf %146, %156 : vector<16x384xf32>
    %cst_60 = arith.constant dense<0.000000e+00> : vector<16xf32>
    %158 = vector.multi_reduction <add>, %157, %cst_60 [1] : vector<16x384xf32> to vector<16xf32>
    %159 = vector.shape_cast %158 : vector<16xf32> to vector<16x1xf32>
    %cst_61 = arith.constant 0.00333333341 : f32
    %160 = vector.broadcast %cst_61 : f32 to vector<16x1xf32>
    %161 = arith.mulf %159, %160 : vector<16x1xf32>
    %162 = vector.broadcast %161 : vector<16x1xf32> to vector<16x384xf32>
    %163 = arith.subf %157, %162 : vector<16x384xf32>
    %cst_62 = arith.constant 0.000000e+00 : f32
    %164 = vector.shape_cast %29 : vector<1x384xi1> to vector<1x384xi1>
    %165 = vector.broadcast %164 : vector<1x384xi1> to vector<16x384xi1>
    %166 = vector.broadcast %cst_62 : f32 to vector<16x384xf32>
    %167 = arith.select %165, %163, %166 : vector<16x384xi1>, vector<16x384xf32>
    %168 = arith.mulf %167, %167 : vector<16x384xf32>
    %cst_63 = arith.constant dense<0.000000e+00> : vector<16xf32>
    %169 = vector.multi_reduction <add>, %168, %cst_63 [1] : vector<16x384xf32> to vector<16xf32>
    %170 = vector.shape_cast %169 : vector<16xf32> to vector<16x1xf32>
    %cst_64 = arith.constant 0.00333333341 : f32
    %171 = vector.broadcast %cst_64 : f32 to vector<16x1xf32>
    %172 = arith.mulf %170, %171 : vector<16x1xf32>
    %cst_65 = arith.constant 9.99999974E-6 : f32
    %173 = vector.broadcast %cst_65 : f32 to vector<16x1xf32>
    %174 = arith.addf %172, %173 : vector<16x1xf32>
    %175 = math.rsqrt %174 : vector<16x1xf32>
    %176 = vector.broadcast %175 : vector<16x1xf32> to vector<16x384xf32>
    %177 = arith.mulf %163, %176 : vector<16x384xf32>
    %178 = vector.broadcast %40 : vector<1x384xf32> to vector<16x384xf32>
    %179 = arith.mulf %177, %178 : vector<16x384xf32>
    %180 = vector.broadcast %41 : vector<1x384xf32> to vector<16x384xf32>
    %181 = arith.addf %179, %180 : vector<16x384xf32>
    %182 = vector.extract_strided_slice %181 {offsets = [0, 0], sizes = [8, 384], strides = [1, 1]} : vector<16x384xf32> to vector<8x384xf32>
    %183 = vector.extract_strided_slice %181 {offsets = [8, 0], sizes = [6, 384], strides = [1, 1]} : vector<16x384xf32> to vector<6x384xf32>
    %184 = arith.truncf %182 : vector<8x384xf32> to vector<8x384xbf16>
    %185 = arith.truncf %183 : vector<6x384xf32> to vector<6x384xbf16>
    %cst_66 = arith.constant dense<0.000000e+00> : vector<8x6xf32>
    %186 = tpu.matmul %184, %185, %cst_66 {dimension_numbers = #tpu.dot_dimension_numbers<[1], [1], [0], [0], [0, 0, 1, 0], [], []>} : vector<8x384xbf16>, vector<6x384xbf16>, vector<8x6xf32> -> vector<8x6xf32>
    %cst_67 = arith.constant dense<0xFF800000> : vector<8xf32>
    %187 = vector.multi_reduction <maximumf>, %186, %cst_67 [1] : vector<8x6xf32> to vector<8xf32>
    %188 = vector.shape_cast %187 : vector<8xf32> to vector<8x1xf32>
    %189 = vector.broadcast %188 : vector<8x1xf32> to vector<8x6xf32>
    %190 = arith.subf %186, %189 : vector<8x6xf32>
    %191 = math.exp %190 : vector<8x6xf32>
    %cst_68 = arith.constant dense<0.000000e+00> : vector<8xf32>
    %192 = vector.multi_reduction <add>, %191, %cst_68 [1] : vector<8x6xf32> to vector<8xf32>
    %193 = vector.shape_cast %192 : vector<8xf32> to vector<8x1xf32>
    %194 = tpu.reciprocal %193 {approx = true} : vector<8x1xf32> -> vector<8x1xf32>
    %195 = vector.broadcast %194 : vector<8x1xf32> to vector<8x6xf32>
    %196 = arith.mulf %191, %195 : vector<8x6xf32>
    %197 = arith.truncf %196 : vector<8x6xf32> to vector<8x6xbf16>
    %cst_69 = arith.constant dense<0.000000e+00> : vector<8x384xf32>
    %198 = tpu.matmul %197, %185, %cst_69 {dimension_numbers = #tpu.dot_dimension_numbers<[1], [0], [0], [1], [0, 0, 1, 1], [], []>} : vector<8x6xbf16>, vector<6x384xbf16>, vector<8x384xf32> -> vector<8x384xf32>
    %cst_70 = arith.constant dense<0.000000e+00> : vector<6x384xf32>
    %199 = tpu.matmul %197, %184, %cst_70 {dimension_numbers = #tpu.dot_dimension_numbers<[0], [0], [1], [1], [0, 1, 1, 1], [], []>} : vector<8x6xbf16>, vector<8x384xbf16>, vector<6x384xf32> -> vector<6x384xf32>
    %200 = arith.maximumf %182, %198 : vector<8x384xf32>
    %cst_71 = arith.constant dense<0.000000e+00> : vector<384xf32>
    %201 = vector.multi_reduction <add>, %200, %cst_71 [0] : vector<8x384xf32> to vector<384xf32>
    %202 = vector.shape_cast %201 : vector<384xf32> to vector<1x384xf32>
    %203 = arith.maximumf %183, %199 : vector<6x384xf32>
    %cst_72 = arith.constant dense<0.000000e+00> : vector<384xf32>
    %204 = vector.multi_reduction <add>, %203, %cst_72 [0] : vector<6x384xf32> to vector<384xf32>
    %205 = vector.shape_cast %204 : vector<384xf32> to vector<1x384xf32>
    %206 = arith.truncf %202 : vector<1x384xf32> to vector<1x384xbf16>
    %c0_73 = arith.constant 0 : index
    %c0_74 = arith.constant 0 : index
    %207 = vector.load %arg15[%c0_73, %c0_74] : memref<384x384xbf16, #tpu.memory_space<vmem>>, vector<384x384xbf16>
    %cst_75 = arith.constant dense<0.000000e+00> : vector<1x384xf32>
    %208 = tpu.matmul %206, %207, %cst_75 {dimension_numbers = #tpu.dot_dimension_numbers<[1], [0], [0], [1], [0, 0, 1, 1], [], []>} : vector<1x384xbf16>, vector<384x384xbf16>, vector<1x384xf32> -> vector<1x384xf32>
    %209 = arith.truncf %205 : vector<1x384xf32> to vector<1x384xbf16>
    %c0_76 = arith.constant 0 : index
    %c0_77 = arith.constant 0 : index
    %210 = vector.load %arg16[%c0_76, %c0_77] : memref<384x384xbf16, #tpu.memory_space<vmem>>, vector<384x384xbf16>
    %cst_78 = arith.constant dense<0.000000e+00> : vector<1x384xf32>
    %211 = tpu.matmul %209, %210, %cst_78 {dimension_numbers = #tpu.dot_dimension_numbers<[1], [0], [0], [1], [0, 0, 1, 1], [], []>} : vector<1x384xbf16>, vector<384x384xbf16>, vector<1x384xf32> -> vector<1x384xf32>
    %212 = arith.addf %208, %211 : vector<1x384xf32>
    %c0_79 = arith.constant 0 : index
    %c0_80 = arith.constant 0 : index
    %213 = vector.load %arg17[%c0_79, %c0_80] : memref<1x384xf32, #tpu.memory_space<vmem>>, vector<1x384xf32>
    %214 = arith.addf %212, %213 : vector<1x384xf32>
    %cst_81 = arith.constant 0.000000e+00 : f32
    %215 = vector.broadcast %cst_81 : f32 to vector<1x384xf32>
    %216 = arith.maximumf %214, %215 : vector<1x384xf32>
    %c0_82 = arith.constant 0 : index
    %c0_83 = arith.constant 0 : index
    %217 = vector.load %arg18[%c0_82, %c0_83] : memref<1x384xf32, #tpu.memory_space<vmem>>, vector<1x384xf32>
    %218 = arith.mulf %216, %217 : vector<1x384xf32>
    %cst_84 = arith.constant dense<0.000000e+00> : vector<1xf32>
    %219 = vector.multi_reduction <add>, %218, %cst_84 [1] : vector<1x384xf32> to vector<1xf32>
    %220 = vector.shape_cast %219 : vector<1xf32> to vector<1x1xf32>
    %c0_85 = arith.constant 0 : index
    %c0_86 = arith.constant 0 : index
    %221 = vector.load %arg19[%c0_85, %c0_86] : memref<1x1xf32, #tpu.memory_space<vmem>>, vector<1x1xf32>
    %222 = arith.addf %220, %221 : vector<1x1xf32>
    %c0_87 = arith.constant 0 : index
    %c0_88 = arith.constant 0 : index
    %223 = vector.load %arg20[%c0_87, %c0_88] : memref<1x1xf32, #tpu.memory_space<vmem>>, vector<1x1xf32>
    tpu.vector_store %arg20[%c0_87, %c0_88], %222 {strides = array<i32>} : memref<1x1xf32, #tpu.memory_space<vmem>>, vector<1x1xf32>,
    return
  }
  func.func @transform_0(%arg0: i32) -> (i32, i32, i32) {
    %c0_i32 = arith.constant 0 : i32
    %c0_i32_0 = arith.constant 0 : i32
    %c0_i32_1 = arith.constant 0 : i32
    return %arg0, %c0_i32, %c0_i32_0 : i32, i32, i32
  }
  func.func @transform_1(%arg0: i32) -> (i32, i32) {
    %c0_i32 = arith.constant 0 : i32
    %c0_i32_0 = arith.constant 0 : i32
    %c0_i32_1 = arith.constant 0 : i32
    return %c0_i32, %c0_i32_0 : i32, i32
  }
  func.func @transform_2(%arg0: i32) -> (i32, i32) {
    %c0_i32 = arith.constant 0 : i32
    %c0_i32_0 = arith.constant 0 : i32
    %c0_i32_1 = arith.constant 0 : i32
    return %c0_i32, %c0_i32_0 : i32, i32
  }
  func.func @transform_3(%arg0: i32) -> (i32, i32) {
    %c0_i32 = arith.constant 0 : i32
    %c0_i32_0 = arith.constant 0 : i32
    %c0_i32_1 = arith.constant 0 : i32
    return %c0_i32, %c0_i32_0 : i32, i32
  }
  func.func @transform_4(%arg0: i32) -> (i32, i32) {
    %c0_i32 = arith.constant 0 : i32
    %c0_i32_0 = arith.constant 0 : i32
    %c0_i32_1 = arith.constant 0 : i32
    return %c0_i32, %c0_i32_0 : i32, i32
  }
  func.func @transform_5(%arg0: i32) -> (i32, i32) {
    %c0_i32 = arith.constant 0 : i32
    %c0_i32_0 = arith.constant 0 : i32
    %c0_i32_1 = arith.constant 0 : i32
    return %c0_i32, %c0_i32_0 : i32, i32
  }
  func.func @transform_6(%arg0: i32) -> (i32, i32) {
    %c0_i32 = arith.constant 0 : i32
    %c0_i32_0 = arith.constant 0 : i32
    %c0_i32_1 = arith.constant 0 : i32
    return %c0_i32, %c0_i32_0 : i32, i32
  }
  func.func @transform_7(%arg0: i32) -> (i32, i32) {
    %c0_i32 = arith.constant 0 : i32
    %c0_i32_0 = arith.constant 0 : i32
    %c0_i32_1 = arith.constant 0 : i32
    return %c0_i32, %c0_i32_0 : i32, i32
  }
  func.func @transform_8(%arg0: i32) -> (i32, i32) {
    %c0_i32 = arith.constant 0 : i32
    %c0_i32_0 = arith.constant 0 : i32
    %c0_i32_1 = arith.constant 0 : i32
    return %c0_i32, %c0_i32_0 : i32, i32
  }
  func.func @transform_9(%arg0: i32) -> (i32, i32) {
    %c0_i32 = arith.constant 0 : i32
    %c0_i32_0 = arith.constant 0 : i32
    %c0_i32_1 = arith.constant 0 : i32
    return %c0_i32, %c0_i32_0 : i32, i32
  }
  func.func @transform_10(%arg0: i32) -> (i32, i32) {
    %c0_i32 = arith.constant 0 : i32
    %c0_i32_0 = arith.constant 0 : i32
    %c0_i32_1 = arith.constant 0 : i32
    return %c0_i32, %c0_i32_0 : i32, i32
  }
  func.func @transform_11(%arg0: i32) -> (i32, i32) {
    %c0_i32 = arith.constant 0 : i32
    %c0_i32_0 = arith.constant 0 : i32
    %c0_i32_1 = arith.constant 0 : i32
    return %c0_i32, %c0_i32_0 : i32, i32
  }
  func.func @transform_12(%arg0: i32) -> (i32, i32) {
    %c0_i32 = arith.constant 0 : i32
    %c0_i32_0 = arith.constant 0 : i32
    %c0_i32_1 = arith.constant 0 : i32
    return %c0_i32, %c0_i32_0 : i32, i32
  }
  func.func @transform_13(%arg0: i32) -> (i32, i32) {
    %c0_i32 = arith.constant 0 : i32
    %c0_i32_0 = arith.constant 0 : i32
    %c0_i32_1 = arith.constant 0 : i32
    return %c0_i32, %c0_i32_0 : i32, i32
  }
  func.func @transform_14(%arg0: i32) -> (i32, i32) {
    %c0_i32 = arith.constant 0 : i32
    %c0_i32_0 = arith.constant 0 : i32
    %c0_i32_1 = arith.constant 0 : i32
    return %c0_i32, %c0_i32_0 : i32, i32
  }
  func.func @transform_15(%arg0: i32) -> (i32, i32) {
    %c0_i32 = arith.constant 0 : i32
    %c0_i32_0 = arith.constant 0 : i32
    %c0_i32_1 = arith.constant 0 : i32
    return %c0_i32, %c0_i32_0 : i32, i32
  }
  func.func @transform_16(%arg0: i32) -> (i32, i32) {
    %c0_i32 = arith.constant 0 : i32
    %c0_i32_0 = arith.constant 0 : i32
    %c0_i32_1 = arith.constant 0 : i32
    return %c0_i32, %c0_i32_0 : i32, i32
  }
  func.func @transform_17(%arg0: i32) -> (i32, i32) {
    %c0_i32 = arith.constant 0 : i32
    %c0_i32_0 = arith.constant 0 : i32
    %c0_i32_1 = arith.constant 0 : i32
    return %c0_i32, %c0_i32_0 : i32, i32
  }
  func.func @transform_18(%arg0: i32) -> (i32, i32) {
    %c0_i32 = arith.constant 0 : i32
    %c0_i32_0 = arith.constant 0 : i32
    %c0_i32_1 = arith.constant 0 : i32
    return %c0_i32, %c0_i32_0 : i32, i32
  }
  func.func @transform_19(%arg0: i32) -> (i32, i32) {
    %c0_i32 = arith.constant 0 : i32
    %c0_i32_0 = arith.constant 0 : i32
    return %arg0, %c0_i32 : i32, i32
  }
}

</mosaic_0001>

<bundles_post_ra>
// kernel: transformer_forward.1
= control target key start
LH: loop header
LB: loop body
LE: loop exit
PB: predicated region body
PF: predicated region fallthrough
CT: control target
= control target key end

     0   :  { %s9021_s0 = inlined_call_operand.vmem [shape: f32[1,16,384], index: 0, kind: input, shape index: {}]   ;;  %s9022_s1 = inlined_call_operand.vmem [shape: f32[16,384], index: 1, kind: input, shape index: {}]   ;;  %s9023_s2 = inlined_call_operand.vmem [shape: bf16[384,1152], index: 2, kind: input, shape index: {}]   ;;  %s9024_s3 = inlined_call_operand.vmem [shape: f32[1,1152], index: 3, kind: input, shape index: {}]   ;;  %s9025_s4 = inlined_call_operand.hbm [shape: bf16[384,384], index: 4, kind: input, shape index: {}]   ;;  %s9026_s5 = inlined_call_operand.vmem [shape: f32[1,384], index: 5, kind: input, shape index: {}]   ;;  %s9027_s6 = inlined_call_operand.vmem [shape: f32[1,384], index: 6, kind: input, shape index: {}]   ;;  %s9028_s7 = inlined_call_operand.vmem [shape: f32[1,384], index: 7, kind: input, shape index: {}]   ;;  %s9029_s8 = inlined_call_operand.vmem [shape: bf16[384,256], index: 8, kind: input, shape index: {}]   ;;  %s9030_s9 = inlined_call_operand.vmem [shape: f32[1,256], index: 9, kind: input, shape index: {}]   ;;  %s9031_s10 = inlined_call_operand.hbm [shape: bf16[256,384], index: 10, kind: input, shape index: {}]   ;;  %s9032_s11 = inlined_call_operand.vmem [shape: f32[1,384], index: 11, kind: input, shape index: {}]   ;;  %s9033_s12 = inlined_call_operand.vmem [shape: f32[1,384], index: 12, kind: input, shape index: {}]   ;;  %s9034_s13 = inlined_call_operand.vmem [shape: f32[1,384], index: 13, kind: input, shape index: {}]   ;;  %s9035_s14 = inlined_call_operand.hbm [shape: bf16[384,384], index: 14, kind: input, shape index: {}]   ;;  %s9036_s15 = inlined_call_operand.hbm [shape: bf16[384,384], index: 15, kind: input, shape index: {}]   ;;  %s9037_s16 = inlined_call_operand.vmem [shape: f32[1,384], index: 16, kind: input, shape index: {}]   ;;  %s9038_s17 = inlined_call_operand.vmem [shape: f32[1,384], index: 17, kind: input, shape index: {}]   ;;  %s9039_s18 = inlined_call_operand.<no memory space> [shape: f32[1,1], index: 18, kind: input, shape index: {}]   ;;  %s9040_s19 = inlined_call_operand.hbm [shape: f32[1,1], index: 19, kind: output, shape index: {}]  }
   0x1   :  { %9045 = sst [smem:[#allocation16_spill]] %s9021_s0  ;;  %v24_v0 = vstv %s9039_s18 }
   0x2   :  { %9046 = sst [smem:[#allocation17_spill]] %s9022_s1  ;;  %25 = vst [vmem:[#allocation2] sm:$0x1] %v24_v0 }
   0x3   :  { %9047 = sst [smem:[#allocation18_spill]] %s9023_s2 }
   0x4   :  { %9048 = sst [smem:[#allocation19_spill]] %s9024_s3 }
   0x5   :  { %26 = vsyncpa [#allocation4], 0 }
   0x6   :  { %27 = vsyncpa [#allocation7], 0 }
   0x7   :  { %28 = vsyncpa [#allocation10], 0 }
   0x8   :  { %29 = vsyncpa [#allocation5], 0  ;;  %s7591_s20 = smov [#allocation6]   ;;  %s7592_s1 = smov [#allocation3]  }
   0x9   :  { %s65_s21 = sshll.u32 %s7591_s20, 4  ;;  %s43_s22 = sshll.u32 %s7592_s1, 4  ;;  %s66_s21 = int_to_ptr.vmem [resolvable:$true] %s65_s21  ;;  %s44_s22 = int_to_ptr.vmem [resolvable:$true] %s43_s22 }
   0xa   :  { %s7491_s2 = scalar_lea.vmem %s66_s21, 6144  ;;  %p7496_p1 = scmp.lt.s32.totalorder %s66_s21, %s66_s21 }
   0xb   :  { %p7492_p0 = scmp.ne.s32.totalorder %s66_s21, %s7491_s2  ;;  %p7497_p2 = scmp.lt.s32.totalorder %s7491_s2, %s7491_s2 }
   0xd   :  { %p7498_p3 = por %p7497_p2, %p7496_p1 }
   0xf   :  { %p7499_p4 = pnand %p7498_p3, %p7492_p0 }
  0x11   :  { %7502 = shalt.err (!%p7499_p4)
}
  0x12   :  { %s7593_s23 = smov 192   ;;  %s7594_s18 = smov 12  }
  0x13   :  { %71 = dma.hbm_to_vmem [thread:$0]  %s9031_s10, 6144, %s66_s21, [#allocation7], %s7593_s23, %s7593_s23, %s7594_s18  }
  0x14   :  { %s7511_s3 = scalar_lea.vmem %s44_s22, 9216  ;;  %p7516_p6 = scmp.lt.s32.totalorder %s44_s22, %s44_s22 }
  0x15   :  { %p7512_p5 = scmp.ne.s32.totalorder %s44_s22, %s7511_s3  ;;  %p7517_p7 = scmp.lt.s32.totalorder %s7511_s3, %s7511_s3 }
  0x17   :  { %p7518_p8 = por %p7517_p7, %p7516_p6 }
  0x19   :  { %p7519_p9 = pnand %p7518_p8, %p7512_p5 }
  0x1b   :  { %7522 = shalt.err (!%p7519_p9)
}
  0x1c   :  { %49 = dma.hbm_to_vmem [thread:$0]  %s9025_s4, 9216, %s44_s22, [#allocation4], %s7593_s23, %s7593_s23, %s7594_s18  }
  0x1d   :  { %s7595_s28 = smov [#allocation8]   ;;  %s7596_s0 = smov [#allocation9]  }
  0x1e   :  { %s83_s29 = sshll.u32 %s7595_s28, 4  ;;  %s95_s30 = sshll.u32 %s7596_s0, 4  ;;  %s84_s29 = int_to_ptr.vmem [resolvable:$true] %s83_s29  ;;  %s96_s30 = int_to_ptr.vmem [resolvable:$true] %s95_s30 }
  0x1f   :  { %s7531_s10 = scalar_lea.vmem %s84_s29, 9216  ;;  %p7536_p11 = scmp.lt.s32.totalorder %s84_s29, %s84_s29 }
  0x20   :  { %p7532_p10 = scmp.ne.s32.totalorder %s84_s29, %s7531_s10  ;;  %p7537_p12 = scmp.lt.s32.totalorder %s7531_s10, %s7531_s10 }
  0x22   :  { %p7538_p13 = por %p7537_p12, %p7536_p11 }
  0x24   :  { %p7539_p0 = pnand %p7538_p13, %p7532_p10 }
  0x26   :  { %7542 = shalt.err (!%p7539_p0)
}
  0x27   :  { %89 = dma.hbm_to_vmem [thread:$0]  %s9035_s14, 9216, %s84_s29, [#allocation7], %s7593_s23, %s7593_s23, %s7594_s18  }
  0x28   :  { %s7551_s4 = scalar_lea.vmem %s96_s30, 9216  ;;  %p7556_p2 = scmp.lt.s32.totalorder %s96_s30, %s96_s30 }
  0x29   :  { %p7552_p1 = scmp.ne.s32.totalorder %s96_s30, %s7551_s4  ;;  %p7557_p3 = scmp.lt.s32.totalorder %s7551_s4, %s7551_s4 }
  0x2b   :  { %p7558_p4 = por %p7557_p3, %p7556_p2 }
  0x2d   :  { %p7559_p5 = pnand %p7558_p4, %p7552_p1 }
  0x2f   :  { %7562 = shalt.err (!%p7559_p5)
}
  0x30   :  { %101 = dma.hbm_to_vmem [thread:$0]  %s9036_s15, 9216, %s96_s30, [#allocation10], %s7593_s23, %s7593_s23, %s7594_s18  }
  0x31   :  { %7583 = dma.done.wait [#allocation4], 9216  }
  0x32   :  { %7584 = vsyncadd [#allocation4], 4294958080 }
  0x33   :  { %7585 = dma.done.wait [#allocation7], 15360  }
  0x34   :  { %7586 = vsyncadd [#allocation7], 4294951936 }
  0x35   :  { %7587 = dma.done.wait [#allocation10], 9216  }
  0x36   :  { %7588 = vsyncadd [#allocation10], 4294958080  ;;  %v7597_v1 = vmov 0   ;;  %s9049_s24 = sld [smem:[#allocation18_spill]]  ;;  %vm7599_vm0 = vmmov 0   ;;  %vm2250_vm7 = vcmask 130048  }
  0x37   :  { %1853 = vmatprep.mubr.bf16.mxu1 %v7597_v1  ;;  %s9050_s15 = sld [smem:[#allocation16_spill]]  ;;  %vm4328_vm12 = vcmask 1043456   ;;  %vm4217_vm13 = vcmask 1042432   ;;  %vm4201_vm14 = vcmask 48128   ;;  %vm4324_vm15 = vcmask 64512  }
  0x38   :  { %s9051_s29 = sld [smem:[#allocation17_spill]] }
  0x39   :  { %s9052_s0 = sld [smem:[#allocation19_spill]] }
  0x3c   :  { %v6711_v2 = vld [vmem:[%s9049_s24 + $0x1fc] ss:$36 sps:$4 sm:$0xff]   ;;  %v6717_v6 = vld [vmem:[%s9049_s24 + $0x1b4] ss:$36 sps:$4 sm:$0xff]   ;;  %v6723_v10 = vld [vmem:[%s9049_s24 + $0x16c] ss:$36 sps:$4 sm:$0xff]  }
  0x3d   :  { %v6713_v3 = vld [vmem:[%s9049_s24 + $0x67c] ss:$36 sps:$4 sm:$0xff]   ;;  %1778 = vmatprep.subr.bf16.mxu0 %v6711_v2  ;;  %v6719_v7 = vld [vmem:[%s9049_s24 + $0x634] ss:$36 sps:$4 sm:$0xff]   ;;  %v6725_v11 = vld [vmem:[%s9049_s24 + $0x5ec] ss:$36 sps:$4 sm:$0xff]  }
  0x3e   :  { %v6715_v4 = vld [vmem:[%s9049_s24 + $0x1f8] ss:$36 sps:$4 sm:$0xff]   ;;  %1821 = vmatprep.subr.bf16.mxu1 %v6713_v3  ;;  %v6721_v8 = vld [vmem:[%s9049_s24 + $0x1b0] ss:$36 sps:$4 sm:$0xff]   ;;  %v6727_v12 = vld [vmem:[%s9049_s24 + $0x168] ss:$36 sps:$4 sm:$0xff]  }
  0x3f   :  { %v6716_v5 = vld [vmem:[%s9049_s24 + $0x678] ss:$36 sps:$4 sm:$0xff]   ;;  %1779 = vmatpush1.bf16.msra.mxu0 %v6715_v4  ;;  %v6722_v9 = vld [vmem:[%s9049_s24 + $0x630] ss:$36 sps:$4 sm:$0xff]   ;;  %v6728_v13 = vld [vmem:[%s9049_s24 + $0x5e8] ss:$36 sps:$4 sm:$0xff]  }
  0x40   :  { %1822 = vmatpush1.bf16.msra.mxu1 %v6716_v5  ;;  %1780 = vmatprep.subr.bf16.mxu0 %v6717_v6  ;;  %v6729_v14 = vld [vmem:[%s9049_s24 + $0x124] ss:$36 sps:$4 sm:$0xff]   ;;  %v6735_v18 = vld [vmem:[%s9049_s24 + $0xdc] ss:$36 sps:$4 sm:$0xff]   ;;  %v6741_v22 = vld [vmem:[%s9049_s24 + $0x94] ss:$36 sps:$4 sm:$0xff]  }
  0x41   :  { %1823 = vmatprep.subr.bf16.mxu1 %v6719_v7  ;;  %v6731_v15 = vld [vmem:[%s9049_s24 + $0x5a4] ss:$36 sps:$4 sm:$0xff]   ;;  %v6737_v19 = vld [vmem:[%s9049_s24 + $0x55c] ss:$36 sps:$4 sm:$0xff]   ;;  %v6743_v23 = vld [vmem:[%s9049_s24 + $0x514] ss:$36 sps:$4 sm:$0xff]  }
  0x42   :  { %v6733_v16 = vld [vmem:[%s9049_s24 + $0x120] ss:$36 sps:$4 sm:$0xff]   ;;  %v6739_v20 = vld [vmem:[%s9049_s24 + $0xd8] ss:$36 sps:$4 sm:$0xff]   ;;  %v6745_v24 = vld [vmem:[%s9049_s24 + $0x90] ss:$36 sps:$4 sm:$0xff]  }
  0x43   :  { %1781 = vmatpush1.bf16.msra.mxu0 %v6721_v8  ;;  %v6734_v17 = vld [vmem:[%s9049_s24 + $0x5a0] ss:$36 sps:$4 sm:$0xff]   ;;  %v6740_v21 = vld [vmem:[%s9049_s24 + $0x558] ss:$36 sps:$4 sm:$0xff]   ;;  %v6746_v25 = vld [vmem:[%s9049_s24 + $0x510] ss:$36 sps:$4 sm:$0xff]  }
  0x44   :  { %1824 = vmatpush1.bf16.msra.mxu1 %v6722_v9  ;;  %1782 = vmatprep.subr.bf16.mxu0 %v6723_v10  ;;  %v6747_v26 = vld [vmem:[%s9049_s24 + $0x4c] ss:$36 sps:$4 sm:$0xff]   ;;  %v6753_v30 = vld [vmem:[%s9049_s24 + $0x4] ss:$36 sps:$4 sm:$0xff]   ;;  %v6759_v40 = vld [vmem:[%s9049_s24 + $0x43c] ss:$36 sps:$4 sm:$0xff]  }
  0x45   :  { %1825 = vmatprep.subr.bf16.mxu1 %v6725_v11  ;;  %v6749_v27 = vld [vmem:[%s9049_s24 + $0x4cc] ss:$36 sps:$4 sm:$0xff]   ;;  %v6755_v31 = vld [vmem:[%s9049_s24 + $0x484] ss:$36 sps:$4 sm:$0xff]   ;;  %v6764_v44 = vld [vmem:[%s9049_s24 + $0x438] ss:$36 sps:$4 sm:$0xff]  }
  0x46   :  { %v6751_v28 = vld [vmem:[%s9049_s24 + $0x48] ss:$36 sps:$4 sm:$0xff]   ;;  %v123_v32 = vld [vmem:[%s9050_s15 + $0x10] sm:$0xff]  ;;  %v6757_v36 = vld [vmem:[%s9049_s24] ss:$36 sps:$4 sm:$0xff]  }
  0x47   :  { %1783 = vmatpush1.bf16.msra.mxu0 %v6727_v12  ;;  %v6752_v29 = vld [vmem:[%s9049_s24 + $0x4c8] ss:$36 sps:$4 sm:$0xff]   ;;  %v129_v34 = vld [vmem:[%s9051_s29 + $0x10] sm:$0xff]  ;;  %v6758_v37 = vld [vmem:[%s9049_s24 + $0x480] ss:$36 sps:$4 sm:$0xff]  }
  0x48   :  { %1826 = vmatpush1.bf16.msra.mxu1 %v6728_v13  ;;  %1784 = vmatprep.subr.bf16.mxu0 %v6729_v14  ;;  %v126_v33 = vld [vmem:[%s9050_s15 + $0x28] sm:$0xff]  ;;  %v7838_v38 = vadd.f32 %v129_v34, %v123_v32  ;;  %v6761_v42 = vld [vmem:[%s9049_s24 + $0x200] ss:$36 sps:$4 sm:$0xff]   ;;  %v6765_v45 = vld [vmem:[%s9049_s24 + $0x3f4] ss:$36 sps:$4 sm:$0xff]  }
  0x49   :  { %1827 = vmatprep.subr.bf16.mxu1 %v6731_v15  ;;  %v132_v35 = vld [vmem:[%s9051_s29 + $0x28] sm:$0xff]  ;;  %v6769_v46 = vld [vmem:[%s9049_s24 + $0x1bc] ss:$36 sps:$4 sm:$0xff]   ;;  %v6770_v48 = vld [vmem:[%s9049_s24 + $0x3f0] ss:$36 sps:$4 sm:$0xff]  }
  0x4a   :  { %v7840_v39 = vadd.f32 %v132_v35, %v126_v33  ;;  %v6763_v41 = vld [vmem:[%s9049_s24 + $0x204] ss:$36 sps:$4 sm:$0xff]   ;;  %v6767_v47 = vld [vmem:[%s9049_s24 + $0x1b8] ss:$36 sps:$4 sm:$0xff]   ;;  %v6771_v49 = vld [vmem:[%s9049_s24 + $0x3ac] ss:$36 sps:$4 sm:$0xff]  }
  0x4b   :  { %1785 = vmatpush1.bf16.msra.mxu0 %v6733_v16  ;;  %v6775_v50 = vld [vmem:[%s9049_s24 + $0x174] ss:$36 sps:$4 sm:$0xff]   ;;  %v6776_v52 = vld [vmem:[%s9049_s24 + $0x3a8] ss:$36 sps:$4 sm:$0xff]   ;;  %v6782_v56 = vld [vmem:[%s9049_s24 + $0x360] ss:$36 sps:$4 sm:$0xff]  }
  0x4c   :  { %1828 = vmatpush1.bf16.msra.mxu1 %v6734_v17  ;;  %1786 = vmatprep.subr.bf16.mxu0 %v6735_v18  ;;  %v7853_v43 = vpack.c.bf16 %v7840_v39, %v7838_v38  ;;  %v6773_v51 = vld [vmem:[%s9049_s24 + $0x170] ss:$36 sps:$4 sm:$0xff]   ;;  %v6777_v53 = vld [vmem:[%s9049_s24 + $0x364] ss:$36 sps:$4 sm:$0xff]   ;;  %v6783_v60 = vld [vmem:[%s9049_s24 + $0x31c] ss:$36 sps:$4 sm:$0xff]  }
  0x4d   :  { %1829 = vmatprep.subr.bf16.mxu1 %v6737_v19  ;;  %v6781_v54 = vld [vmem:[%s9049_s24 + $0x12c] ss:$36 sps:$4 sm:$0xff]   ;;  %v125_v58 = vld [vmem:[%s9050_s15 + $0x20] sm:$0xff]  ;;  %v6788_v3 = vld [vmem:[%s9049_s24 + $0x318] ss:$36 sps:$4 sm:$0xff]  }
  0x4e   :  { %v6779_v55 = vld [vmem:[%s9049_s24 + $0x128] ss:$36 sps:$4 sm:$0xff]   ;;  %v131_v62 = vld [vmem:[%s9051_s29 + $0x20] sm:$0xff]  ;;  %v6789_v4 = vld [vmem:[%s9049_s24 + $0x2d4] ss:$36 sps:$4 sm:$0xff]  }
  0x4f   :  { %1787 = vmatpush1.bf16.msra.mxu0 %v6739_v20  ;;  %v122_v57 = vld [vmem:[%s9050_s15 + $0x8] sm:$0xff]  ;;  %v7915_v0 = vadd.f32 %v131_v62, %v125_v58  ;;  %v6785_v2 = vld [vmem:[%s9049_s24 + $0xe0] ss:$36 sps:$4 sm:$0xff]   ;;  %v6791_v7 = vld [vmem:[%s9049_s24 + $0x98] ss:$36 sps:$4 sm:$0xff]  }
  0x50   :  { %1830 = vmatpush1.bf16.msra.mxu1 %v6740_v21  ;;  %1788 = vmatprep.subr.bf16.mxu0 %v6741_v22  ;;  %v128_v59 = vld [vmem:[%s9051_s29 + $0x8] sm:$0xff]  ;;  %v6793_v6 = vld [vmem:[%s9049_s24 + $0x9c] ss:$36 sps:$4 sm:$0xff]   ;;  %v6794_v8 = vld [vmem:[%s9049_s24 + $0x2d0] ss:$36 sps:$4 sm:$0xff]  }
  0x51   :  { %1831 = vmatprep.subr.bf16.mxu1 %v6743_v23  ;;  %v6787_v61 = vld [vmem:[%s9049_s24 + $0xe4] ss:$36 sps:$4 sm:$0xff]   ;;  %v7913_v63 = vadd.f32 %v128_v59, %v122_v57  ;;  %v6795_v9 = vld [vmem:[%s9049_s24 + $0x28c] ss:$36 sps:$4 sm:$0xff]   ;;  %v6799_v10 = vld [vmem:[%s9049_s24 + $0x54] ss:$36 sps:$4 sm:$0xff]  }
  0x52   :  { %v6797_v11 = vld [vmem:[%s9049_s24 + $0x50] ss:$36 sps:$4 sm:$0xff]   ;;  %v6800_v12 = vld [vmem:[%s9049_s24 + $0x288] ss:$36 sps:$4 sm:$0xff]   ;;  %v121_v13 = vld [vmem:[%s9050_s15] sm:$0xff] }
  0x53   :  { %1789 = vmatpush1.bf16.msra.mxu0 %v6745_v24  ;;  %v7928_v5 = vpack.c.bf16 %v7915_v0, %v7913_v63  ;;  %v6801_v14 = vld [vmem:[%s9049_s24 + $0x244] ss:$36 sps:$4 sm:$0xff]   ;;  %v124_v15 = vld [vmem:[%s9050_s15 + $0x18] sm:$0xff]  ;;  %v6805_v18 = vld [vmem:[%s9049_s24 + $0xc] ss:$36 sps:$4 sm:$0xff]  }
  0x54   :  { %1832 = vmatpush1.bf16.msra.mxu1 %v6746_v25  ;;  %1790 = vmatprep.subr.bf16.mxu0 %v6747_v26  ;;  %v127_v16 = vld [vmem:[%s9051_s29] sm:$0xff]  ;;  %v130_v17 = vld [vmem:[%s9051_s29 + $0x18] sm:$0xff]  ;;  %v6803_v19 = vld [vmem:[%s9049_s24 + $0x8] ss:$36 sps:$4 sm:$0xff]  }
  0x55   :  { %1833 = vmatprep.subr.bf16.mxu1 %v6749_v27  ;;  %1810 = vmatprep.mubr.bf16.mxu0 %v7928_v5  ;;  %v6806_v20 = vld [vmem:[%s9049_s24 + $0x240] ss:$36 sps:$4 sm:$0xff]   ;;  %v7977_v21 = vadd.f32 %v127_v16, %v121_v13  ;;  %v7979_v22 = vadd.f32 %v130_v17, %v124_v15  ;;  %v6821_v32 = vld [vmem:[%s9049_s24 + $0x3b4] ss:$36 sps:$4 sm:$0xff]   ;;  %v6849_v57 = vld [vmem:[%s9049_s24 + $0x248] ss:$36 sps:$4 sm:$0xff]  }
  0x56   :  { %v6809_v23 = vld [vmem:[%s9049_s24 + $0x444] ss:$36 sps:$4 sm:$0xff]   ;;  %v6824_v33 = vld [vmem:[%s9049_s24 + $0x5f4] ss:$36 sps:$4 sm:$0xff]   ;;  %v6857_v59 = vld [vmem:[%s9049_s24 + $0x20c] ss:$36 sps:$4 sm:$0xff]  }
  0x57   :  { %1791 = vmatpush1.bf16.msra.mxu0 %v6751_v28  ;;  %v6812_v24 = vld [vmem:[%s9049_s24 + $0x684] ss:$36 sps:$4 sm:$0xff]   ;;  %v7989_v25 = vpack.c.bf16 %v7979_v22, %v7977_v21  ;;  %v6815_v28 = vld [vmem:[%s9049_s24 + $0x3fc] ss:$36 sps:$4 sm:$0xff]   ;;  %v6819_v34 = vld [vmem:[%s9049_s24 + $0x3b0] ss:$36 sps:$4 sm:$0xff]  }
  0x58   :  { %1834 = vmatpush1.bf16.msra.mxu1 %v6752_v29  ;;  %1792 = vmatprep.subr.bf16.mxu0 %v6753_v30  ;;  %v6807_v26 = vld [vmem:[%s9049_s24 + $0x440] ss:$36 sps:$4 sm:$0xff]   ;;  %v6813_v30 = vld [vmem:[%s9049_s24 + $0x3f8] ss:$36 sps:$4 sm:$0xff]   ;;  %v6822_v35 = vld [vmem:[%s9049_s24 + $0x5f0] ss:$36 sps:$4 sm:$0xff]  }
  0x59   :  { %1835 = vmatprep.subr.bf16.mxu1 %v6755_v31  ;;  %v6810_v27 = vld [vmem:[%s9049_s24 + $0x680] ss:$36 sps:$4 sm:$0xff]   ;;  %v6816_v31 = vld [vmem:[%s9049_s24 + $0x638] ss:$36 sps:$4 sm:$0xff]   ;;  %v6852_v58 = vld [vmem:[%s9049_s24 + $0x488] ss:$36 sps:$4 sm:$0xff]  }
  0x5a   :  { %v6818_v29 = vld [vmem:[%s9049_s24 + $0x63c] ss:$36 sps:$4 sm:$0xff]   ;;  %v6860_v62 = vld [vmem:[%s9049_s24 + $0x1c4] ss:$36 sps:$4 sm:$0xff]   ;;  %v6864_v13 = vld [vmem:[%s9049_s24 + $0x130] ss:$36 sps:$4 sm:$0xff]  }
  0x5b   :  { %1793 = vmatpush1.bf16.msra.mxu0 %v6757_v36  ;;  %v6827_v36 = vld [vmem:[%s9049_s24 + $0x36c] ss:$36 sps:$4 sm:$0xff]  }
  0x5c   :  { %1836 = vmatpush1.bf16.msra.mxu1 %v6758_v37  ;;  %1794 = vmatprep.subr.bf16.mxu0 %v6759_v40  ;;  %v6830_v37 = vld [vmem:[%s9049_s24 + $0x5ac] ss:$36 sps:$4 sm:$0xff]  }
  0x5d   :  { %1864 = vmatprep.subr.bf16.mxu1 %v6763_v41  ;;  %v6825_v40 = vld [vmem:[%s9049_s24 + $0x368] ss:$36 sps:$4 sm:$0xff]  }
  0x5e   :  { %v6828_v41 = vld [vmem:[%s9049_s24 + $0x5a8] ss:$36 sps:$4 sm:$0xff]  }
  0x5f   :  { %1854 = vmatmul.mubr.bf16.vlgmr.msra.gmra.mxu1 %v7853_v43  ;;  %1795 = vmatpush2.bf16.msra.mxu0 %v6764_v44  ;;  %v6836_v44 = vld [vmem:[%s9049_s24 + $0x564] ss:$36 sps:$4 sm:$0xff]   ;;  %v6869_v15 = vld [vmem:[%s9049_s24 + $0xec] ss:$36 sps:$4 sm:$0xff]  }
  0x60   :  { %1865 = vmatpush1.bf16.msra.mxu1 %v6761_v42  ;;  %1796 = vmatprep.subr.bf16.mxu0 %v6765_v45  ;;  %v6833_v42 = vld [vmem:[%s9049_s24 + $0x324] ss:$36 sps:$4 sm:$0xff]   ;;  %v6905_v16 = vld [vmem:[%s9049_s24 + $0x56c] ss:$36 sps:$4 sm:$0xff]  }
  0x61   :  { %1866 = vmatprep.subr.bf16.mxu1 %v6769_v46  ;;  %1896 = vmatprep.mubr.bf16.mxu1 %v7928_v5  ;;  %v6831_v45 = vld [vmem:[%s9049_s24 + $0x320] ss:$36 sps:$4 sm:$0xff]   ;;  %v6867_v17 = vld [vmem:[%s9049_s24 + $0xe8] ss:$36 sps:$4 sm:$0xff]  }
  0x62   :  { %v6834_v46 = vld [vmem:[%s9049_s24 + $0x560] ss:$36 sps:$4 sm:$0xff]  }
  0x63   :  { %1797 = vmatpush2.bf16.msra.mxu0 %v6770_v48  ;;  %v6842_v48 = vld [vmem:[%s9049_s24 + $0x51c] ss:$36 sps:$4 sm:$0xff]  }
  0x64   :  { %1867 = vmatpush1.bf16.msra.mxu1 %v6767_v47  ;;  %1798 = vmatprep.subr.bf16.mxu0 %v6771_v49  ;;  %v6839_v47 = vld [vmem:[%s9049_s24 + $0x2dc] ss:$36 sps:$4 sm:$0xff]  }
  0x65   :  { %1868 = vmatprep.subr.bf16.mxu1 %v6775_v50  ;;  %v6837_v49 = vld [vmem:[%s9049_s24 + $0x2d8] ss:$36 sps:$4 sm:$0xff]  }
  0x66   :  { %v6840_v50 = vld [vmem:[%s9049_s24 + $0x518] ss:$36 sps:$4 sm:$0xff]  }
  0x67   :  { %1799 = vmatpush2.bf16.msra.mxu0 %v6776_v52  ;;  %v6848_v52 = vld [vmem:[%s9049_s24 + $0x4d4] ss:$36 sps:$4 sm:$0xff]  }
  0x68   :  { %1869 = vmatpush1.bf16.msra.mxu1 %v6773_v51  ;;  %1800 = vmatprep.subr.bf16.mxu0 %v6777_v53  ;;  %v6845_v51 = vld [vmem:[%s9049_s24 + $0x294] ss:$36 sps:$4 sm:$0xff]  }
  0x69   :  { %1870 = vmatprep.subr.bf16.mxu1 %v6781_v54  ;;  %v6843_v53 = vld [vmem:[%s9049_s24 + $0x290] ss:$36 sps:$4 sm:$0xff]  }
  0x6a   :  { %v6846_v54 = vld [vmem:[%s9049_s24 + $0x4d0] ss:$36 sps:$4 sm:$0xff]  }
  0x6b   :  { %1801 = vmatpush2.bf16.msra.mxu0 %v6782_v56  ;;  %v6854_v56 = vld [vmem:[%s9049_s24 + $0x48c] ss:$36 sps:$4 sm:$0xff]  }
  0x6c   :  { %1871 = vmatpush1.bf16.msra.mxu1 %v6779_v55  ;;  %1802 = vmatprep.subr.bf16.mxu0 %v6783_v60  ;;  %v6851_v55 = vld [vmem:[%s9049_s24 + $0x24c] ss:$36 sps:$4 sm:$0xff]  }
  0x6d   :  { %1872 = vmatprep.subr.bf16.mxu1 %v6787_v61  ;;  %v6881_v60 = vld [vmem:[%s9049_s24 + $0x68c] ss:$36 sps:$4 sm:$0xff]  }
  0x6e   :  { %v6855_v61 = vld [vmem:[%s9049_s24 + $0x208] ss:$36 sps:$4 sm:$0xff]  }
  0x6f   :  { %1803 = vmatpush2.bf16.msra.mxu0 %v6788_v3  ;;  %v6887_v3 = vld [vmem:[%s9049_s24 + $0x644] ss:$36 sps:$4 sm:$0xff]  }
  0x70   :  { %1873 = vmatpush1.bf16.msra.mxu1 %v6785_v2  ;;  %1804 = vmatprep.subr.bf16.mxu0 %v6789_v4  ;;  %v6879_v2 = vld [vmem:[%s9049_s24 + $0x688] ss:$36 sps:$4 sm:$0xff]   ;;  %v6858_v4 = vld [vmem:[%s9049_s24 + $0x1c0] ss:$36 sps:$4 sm:$0xff]  }
  0x71   :  { %1874 = vmatprep.subr.bf16.mxu1 %v6793_v6  ;;  %v6863_v6 = vld [vmem:[%s9049_s24 + $0x17c] ss:$36 sps:$4 sm:$0xff]  }
  0x73   :  { %1805 = vmatpush2.bf16.msra.mxu0 %v6794_v8  ;;  %v6893_v8 = vld [vmem:[%s9049_s24 + $0x5fc] ss:$36 sps:$4 sm:$0xff]  }
  0x74   :  { %1875 = vmatpush1.bf16.msra.mxu1 %v6791_v7  ;;  %1806 = vmatprep.subr.bf16.mxu0 %v6795_v9  ;;  %v6885_v7 = vld [vmem:[%s9049_s24 + $0x640] ss:$36 sps:$4 sm:$0xff]   ;;  %v6861_v9 = vld [vmem:[%s9049_s24 + $0x178] ss:$36 sps:$4 sm:$0xff]  }
  0x75   :  { %1876 = vmatprep.subr.bf16.mxu1 %v6799_v10  ;;  %v6866_v10 = vld [vmem:[%s9049_s24 + $0x134] ss:$36 sps:$4 sm:$0xff]  }
  0x77   :  { %1807 = vmatpush2.bf16.msra.mxu0 %v6800_v12  ;;  %v6899_v12 = vld [vmem:[%s9049_s24 + $0x5b4] ss:$36 sps:$4 sm:$0xff]  }
  0x78   :  { %1877 = vmatpush1.bf16.msra.mxu1 %v6797_v11  ;;  %1808 = vmatprep.subr.bf16.mxu0 %v6801_v14  ;;  %v6891_v11 = vld [vmem:[%s9049_s24 + $0x5f8] ss:$36 sps:$4 sm:$0xff]   ;;  %v6897_v14 = vld [vmem:[%s9049_s24 + $0x5b0] ss:$36 sps:$4 sm:$0xff]  }
  0x79   :  { %1878 = vmatprep.subr.bf16.mxu1 %v6805_v18  ;;  %v6903_v18 = vld [vmem:[%s9049_s24 + $0x568] ss:$36 sps:$4 sm:$0xff]  }
  0x7b   :  { %1809 = vmatpush2.bf16.msra.mxu0 %v6806_v20  ;;  %v6911_v20 = vld [vmem:[%s9049_s24 + $0x524] ss:$36 sps:$4 sm:$0xff]  }
  0x7c   :  { %1879 = vmatpush1.bf16.msra.mxu1 %v6803_v19  ;;  %1907 = vmatprep.subr.bf16.mxu0 %v6812_v24  ;;  %v6872_v19 = vld [vmem:[%s9049_s24 + $0xa4] ss:$36 sps:$4 sm:$0xff]  }
  0x7d   :  { %1880 = vmatprep.subr.bf16.mxu1 %v6809_v23  ;;  %v6870_v23 = vld [vmem:[%s9049_s24 + $0xa0] ss:$36 sps:$4 sm:$0xff]  }
  0x7e   :  { %1811 = vmatmul.mubr.bf16.vlgmr.msra.gmra.mxu0 %v7989_v25  ;;  %v6909_v24 = vld [vmem:[%s9049_s24 + $0x520] ss:$36 sps:$4 sm:$0xff]  }
  0x7f   :  { %1908 = vmatpush1.bf16.msra.mxu0 %v6810_v27  ;;  %1939 = vmatprep.mubr.bf16.mxu0 %v7597_v1  ;;  %v6917_v27 = vld [vmem:[%s9049_s24 + $0x4dc] ss:$36 sps:$4 sm:$0xff]  }
  0x80   :  { %1881 = vmatpush2.bf16.msra.mxu1 %v6807_v26  ;;  %1909 = vmatprep.subr.bf16.mxu0 %v6818_v29  ;;  %v6875_v26 = vld [vmem:[%s9049_s24 + $0x5c] ss:$36 sps:$4 sm:$0xff]  }
  0x81   :  { %1882 = vmatprep.subr.bf16.mxu1 %v6815_v28  ;;  %v6873_v28 = vld [vmem:[%s9049_s24 + $0x58] ss:$36 sps:$4 sm:$0xff]  }
  0x82   :  { %v6915_v29 = vld [vmem:[%s9049_s24 + $0x4d8] ss:$36 sps:$4 sm:$0xff]  }
  0x83   :  { %1910 = vmatpush1.bf16.msra.mxu0 %v6816_v31  ;;  %v6923_v31 = vld [vmem:[%s9049_s24 + $0x494] ss:$36 sps:$4 sm:$0xff]  }
  0x84   :  { %1883 = vmatpush2.bf16.msra.mxu1 %v6813_v30  ;;  %1911 = vmatprep.subr.bf16.mxu0 %v6824_v33  ;;  %v6878_v30 = vld [vmem:[%s9049_s24 + $0x14] ss:$36 sps:$4 sm:$0xff]  }
  0x85   :  { %1884 = vmatprep.subr.bf16.mxu1 %v6821_v32  ;;  %v6876_v32 = vld [vmem:[%s9049_s24 + $0x10] ss:$36 sps:$4 sm:$0xff]  }
  0x86   :  { %v6921_v33 = vld [vmem:[%s9049_s24 + $0x490] ss:$36 sps:$4 sm:$0xff]  }
  0x87   :  { %1912 = vmatpush1.bf16.msra.mxu0 %v6822_v35  ;;  %v6941_v35 = vld [vmem:[%s9049_s24 + $0x214] ss:$36 sps:$4 sm:$0xff]  }
  0x88   :  { %1885 = vmatpush2.bf16.msra.mxu1 %v6819_v34  ;;  %1913 = vmatprep.subr.bf16.mxu0 %v6830_v37  ;;  %v6884_v34 = vld [vmem:[%s9049_s24 + $0x44c] ss:$36 sps:$4 sm:$0xff]  }
  0x89   :  { %1886 = vmatprep.subr.bf16.mxu1 %v6827_v36  ;;  %v6882_v36 = vld [vmem:[%s9049_s24 + $0x448] ss:$36 sps:$4 sm:$0xff]   ;;  %v6939_v37 = vld [vmem:[%s9049_s24 + $0x210] ss:$36 sps:$4 sm:$0xff]  }
  0x8b   :  { %1914 = vmatpush1.bf16.msra.mxu0 %v6828_v41  ;;  %v6947_v41 = vld [vmem:[%s9049_s24 + $0x1cc] ss:$36 sps:$4 sm:$0xff]  }
  0x8c   :  { %1887 = vmatpush2.bf16.msra.mxu1 %v6825_v40  ;;  %1915 = vmatprep.subr.bf16.mxu0 %v6836_v44  ;;  %v6890_v40 = vld [vmem:[%s9049_s24 + $0x404] ss:$36 sps:$4 sm:$0xff]  }
  0x8d   :  { %1888 = vmatprep.subr.bf16.mxu1 %v6833_v42  ;;  %v6888_v42 = vld [vmem:[%s9049_s24 + $0x400] ss:$36 sps:$4 sm:$0xff]   ;;  %v6945_v44 = vld [vmem:[%s9049_s24 + $0x1c8] ss:$36 sps:$4 sm:$0xff]  }
  0x8f   :  { %1916 = vmatpush1.bf16.msra.mxu0 %v6834_v46  ;;  %v6953_v46 = vld [vmem:[%s9049_s24 + $0x184] ss:$36 sps:$4 sm:$0xff]  }
  0x90   :  { %1889 = vmatpush2.bf16.msra.mxu1 %v6831_v45  ;;  %1917 = vmatprep.subr.bf16.mxu0 %v6842_v48  ;;  %v6896_v45 = vld [vmem:[%s9049_s24 + $0x3bc] ss:$36 sps:$4 sm:$0xff]  }
  0x91   :  { %1890 = vmatprep.subr.bf16.mxu1 %v6839_v47  ;;  %v6894_v47 = vld [vmem:[%s9049_s24 + $0x3b8] ss:$36 sps:$4 sm:$0xff]   ;;  %v6951_v48 = vld [vmem:[%s9049_s24 + $0x180] ss:$36 sps:$4 sm:$0xff]  }
  0x93   :  { %1918 = vmatpush1.bf16.msra.mxu0 %v6840_v50  ;;  %v6959_v50 = vld [vmem:[%s9049_s24 + $0x13c] ss:$36 sps:$4 sm:$0xff]  }
  0x94   :  { %1891 = vmatpush2.bf16.msra.mxu1 %v6837_v49  ;;  %1919 = vmatprep.subr.bf16.mxu0 %v6848_v52  ;;  %v6902_v49 = vld [vmem:[%s9049_s24 + $0x374] ss:$36 sps:$4 sm:$0xff]  }
  0x95   :  { %1892 = vmatprep.subr.bf16.mxu1 %v6845_v51  ;;  %v6900_v51 = vld [vmem:[%s9049_s24 + $0x370] ss:$36 sps:$4 sm:$0xff]   ;;  %v6957_v52 = vld [vmem:[%s9049_s24 + $0x138] ss:$36 sps:$4 sm:$0xff]  }
  0x97   :  { %1920 = vmatpush1.bf16.msra.mxu0 %v6846_v54  ;;  %v6965_v54 = vld [vmem:[%s9049_s24 + $0xf4] ss:$36 sps:$4 sm:$0xff]  }
  0x98   :  { %1893 = vmatpush2.bf16.msra.mxu1 %v6843_v53  ;;  %1921 = vmatprep.subr.bf16.mxu0 %v6854_v56  ;;  %v6908_v53 = vld [vmem:[%s9049_s24 + $0x32c] ss:$36 sps:$4 sm:$0xff]  }
  0x99   :  { %1894 = vmatprep.subr.bf16.mxu1 %v6851_v55  ;;  %v6906_v55 = vld [vmem:[%s9049_s24 + $0x328] ss:$36 sps:$4 sm:$0xff]   ;;  %v6963_v56 = vld [vmem:[%s9049_s24 + $0xf0] ss:$36 sps:$4 sm:$0xff]  }
  0x9b   :  { %1922 = vmatpush1.bf16.msra.mxu0 %v6852_v58  ;;  %v6970_v58 = vld [vmem:[%s9049_s24 + $0xac] ss:$36 sps:$4 sm:$0xff]  }
  0x9c   :  { %1895 = vmatpush2.bf16.msra.mxu1 %v6849_v57  ;;  %1950 = vmatprep.subr.bf16.mxu0 %v6857_v59  ;;  %v6914_v57 = vld [vmem:[%s9049_s24 + $0x2e4] ss:$36 sps:$4 sm:$0xff]  }
  0x9d   :  { %1993 = vmatprep.subr.bf16.mxu1 %v6881_v60  ;;  %v6912_v59 = vld [vmem:[%s9049_s24 + $0x2e0] ss:$36 sps:$4 sm:$0xff]  }
  0x9e   :  { %1940 = vmatmul.mubr.bf16.vlgmr.msra.gmra.mxu0 %v7853_v43  ;;  %v6920_v60 = vld [vmem:[%s9049_s24 + $0x29c] ss:$36 sps:$4 sm:$0xff]  }
  0x9f   :  { %1897 = vmatmul.mubr.bf16.vlgmr.msra.gmra.mxu1 %v7989_v25  ;;  %1951 = vmatpush1.bf16.msra.mxu0 %v6855_v61  ;;  %v6968_v61 = vld [vmem:[%s9049_s24 + $0xa8] ss:$36 sps:$4 sm:$0xff]  }
  0xa0   :  { %1994 = vmatpush1.bf16.msra.mxu1 %v6879_v2  ;;  %1952 = vmatprep.subr.bf16.mxu0 %v6860_v62  ;;  %v6975_v62 = vld [vmem:[%s9049_s24 + $0x64] ss:$36 sps:$4 sm:$0xff]   ;;  %v6918_v2 = vld [vmem:[%s9049_s24 + $0x298] ss:$36 sps:$4 sm:$0xff]  }
  0xa1   :  { %1995 = vmatprep.subr.bf16.mxu1 %v6887_v3  ;;  %2025 = vmatprep.mubr.bf16.mxu1 %v7597_v1  ;;  %v6973_v3 = vld [vmem:[%s9049_s24 + $0x60] ss:$36 sps:$4 sm:$0xff]  }
  0xa2   :  { %1982 = vmatprep.mubr.bf16.mxu0 %v7928_v5 }
  0xa3   :  { %1953 = vmatpush1.bf16.msra.mxu0 %v6858_v4  ;;  %v6926_v4 = vld [vmem:[%s9049_s24 + $0x254] ss:$36 sps:$4 sm:$0xff]  }
  0xa4   :  { %1996 = vmatpush1.bf16.msra.mxu1 %v6885_v7  ;;  %1954 = vmatprep.subr.bf16.mxu0 %v6863_v6  ;;  %v6980_v6 = vld [vmem:[%s9049_s24 + $0x1c] ss:$36 sps:$4 sm:$0xff]   ;;  %v6924_v7 = vld [vmem:[%s9049_s24 + $0x250] ss:$36 sps:$4 sm:$0xff]  }
  0xa5   :  { %1997 = vmatprep.subr.bf16.mxu1 %v6893_v8  ;;  %v6978_v8 = vld [vmem:[%s9049_s24 + $0x18] ss:$36 sps:$4 sm:$0xff]  }
  0xa7   :  { %1955 = vmatpush1.bf16.msra.mxu0 %v6861_v9  ;;  %v6929_v9 = vld [vmem:[%s9049_s24 + $0x694] ss:$36 sps:$4 sm:$0xff]  }
  0xa8   :  { %1998 = vmatpush1.bf16.msra.mxu1 %v6891_v11  ;;  %1956 = vmatprep.subr.bf16.mxu0 %v6866_v10  ;;  %v6985_v10 = vld [vmem:[%s9049_s24 + $0x454] ss:$36 sps:$4 sm:$0xff]  }
  0xa9   :  { %1999 = vmatprep.subr.bf16.mxu1 %v6899_v12  ;;  %v6927_v11 = vld [vmem:[%s9049_s24 + $0x690] ss:$36 sps:$4 sm:$0xff]  }
  0xaa   :  { %v6932_v12 = vld [vmem:[%s9049_s24 + $0x64c] ss:$36 sps:$4 sm:$0xff]  }
  0xab   :  { %1957 = vmatpush1.bf16.msra.mxu0 %v6864_v13  ;;  %v6983_v13 = vld [vmem:[%s9049_s24 + $0x450] ss:$36 sps:$4 sm:$0xff]  }
  0xac   :  { %2000 = vmatpush1.bf16.msra.mxu1 %v6897_v14  ;;  %1958 = vmatprep.subr.bf16.mxu0 %v6869_v15  ;;  %v6990_v14 = vld [vmem:[%s9049_s24 + $0x40c] ss:$36 sps:$4 sm:$0xff]  }
  0xad   :  { %2001 = vmatprep.subr.bf16.mxu1 %v6905_v16  ;;  %v6930_v15 = vld [vmem:[%s9049_s24 + $0x648] ss:$36 sps:$4 sm:$0xff]  }
  0xae   :  { %v6935_v16 = vld [vmem:[%s9049_s24 + $0x604] ss:$36 sps:$4 sm:$0xff]  }
  0xaf   :  { %1959 = vmatpush1.bf16.msra.mxu0 %v6867_v17  ;;  %v6988_v17 = vld [vmem:[%s9049_s24 + $0x408] ss:$36 sps:$4 sm:$0xff]  }
  0xb0   :  { %2002 = vmatpush1.bf16.msra.mxu1 %v6903_v18  ;;  %1960 = vmatprep.subr.bf16.mxu0 %v6872_v19  ;;  %v6995_v18 = vld [vmem:[%s9049_s24 + $0x3c4] ss:$36 sps:$4 sm:$0xff]  }
  0xb1   :  { %2003 = vmatprep.subr.bf16.mxu1 %v6911_v20  ;;  %v6933_v19 = vld [vmem:[%s9049_s24 + $0x600] ss:$36 sps:$4 sm:$0xff]  }
  0xb2   :  { %v6938_v20 = vld [vmem:[%s9049_s24 + $0x5bc] ss:$36 sps:$4 sm:$0xff]  }
  0xb3   :  { %1961 = vmatpush1.bf16.msra.mxu0 %v6870_v23  ;;  %v6993_v23 = vld [vmem:[%s9049_s24 + $0x3c0] ss:$36 sps:$4 sm:$0xff]  }
  0xb4   :  { %2004 = vmatpush1.bf16.msra.mxu1 %v6909_v24  ;;  %1962 = vmatprep.subr.bf16.mxu0 %v6875_v26  ;;  %v6936_v24 = vld [vmem:[%s9049_s24 + $0x5b8] ss:$36 sps:$4 sm:$0xff]  }
  0xb5   :  { %2005 = vmatprep.subr.bf16.mxu1 %v6917_v27  ;;  %v7000_v26 = vld [vmem:[%s9049_s24 + $0x37c] ss:$36 sps:$4 sm:$0xff]   ;;  %v6944_v27 = vld [vmem:[%s9049_s24 + $0x574] ss:$36 sps:$4 sm:$0xff]  }
  0xb7   :  { %1963 = vmatpush1.bf16.msra.mxu0 %v6873_v28  ;;  %v6998_v28 = vld [vmem:[%s9049_s24 + $0x378] ss:$36 sps:$4 sm:$0xff]  }
  0xb8   :  { %2006 = vmatpush1.bf16.msra.mxu1 %v6915_v29  ;;  %1964 = vmatprep.subr.bf16.mxu0 %v6878_v30  ;;  %v7005_v29 = vld [vmem:[%s9049_s24 + $0x334] ss:$36 sps:$4 sm:$0xff]  }
  0xb9   :  { %2007 = vmatprep.subr.bf16.mxu1 %v6923_v31  ;;  %v6942_v30 = vld [vmem:[%s9049_s24 + $0x570] ss:$36 sps:$4 sm:$0xff]  }
  0xba   :  { %v6950_v31 = vld [vmem:[%s9049_s24 + $0x52c] ss:$36 sps:$4 sm:$0xff]  }
  0xbb   :  { %1965 = vmatpush1.bf16.msra.mxu0 %v6876_v32  ;;  %v7003_v32 = vld [vmem:[%s9049_s24 + $0x330] ss:$36 sps:$4 sm:$0xff]  }
  0xbc   :  { %2008 = vmatpush1.bf16.msra.mxu1 %v6921_v33  ;;  %1966 = vmatprep.subr.bf16.mxu0 %v6884_v34  ;;  %v7008_v33 = vld [vmem:[%s9049_s24 + $0x2ec] ss:$36 sps:$4 sm:$0xff]  }
  0xbd   :  { %2036 = vmatprep.subr.bf16.mxu1 %v6941_v35  ;;  %v6948_v34 = vld [vmem:[%s9049_s24 + $0x528] ss:$36 sps:$4 sm:$0xff]  }
  0xbe   :  { %v6956_v35 = vld [vmem:[%s9049_s24 + $0x4e4] ss:$36 sps:$4 sm:$0xff]  }
  0xbf   :  { %2026 = vmatmul.mubr.bf16.vlgmr.msra.gmra.mxu1 %v7853_v43  ;;  %1967 = vmatpush2.bf16.msra.mxu0 %v6882_v36  ;;  %v7006_v36 = vld [vmem:[%s9049_s24 + $0x2e8] ss:$36 sps:$4 sm:$0xff]  }
  0xc0   :  { %2037 = vmatpush1.bf16.msra.mxu1 %v6939_v37  ;;  %1968 = vmatprep.subr.bf16.mxu0 %v6890_v40  ;;  %v7011_v37 = vld [vmem:[%s9049_s24 + $0x2a4] ss:$36 sps:$4 sm:$0xff]  }
  0xc1   :  { %2038 = vmatprep.subr.bf16.mxu1 %v6947_v41  ;;  %2068 = vmatprep.mubr.bf16.mxu1 %v7928_v5  ;;  %v6954_v40 = vld [vmem:[%s9049_s24 + $0x4e0] ss:$36 sps:$4 sm:$0xff]  }
  0xc2   :  { %v6962_v41 = vld [vmem:[%s9049_s24 + $0x49c] ss:$36 sps:$4 sm:$0xff]  }
  0xc3   :  { %1969 = vmatpush2.bf16.msra.mxu0 %v6888_v42  ;;  %v7009_v42 = vld [vmem:[%s9049_s24 + $0x2a0] ss:$36 sps:$4 sm:$0xff]  }
  0xc4   :  { %2039 = vmatpush1.bf16.msra.mxu1 %v6945_v44  ;;  %1970 = vmatprep.subr.bf16.mxu0 %v6896_v45  ;;  %v7014_v44 = vld [vmem:[%s9049_s24 + $0x25c] ss:$36 sps:$4 sm:$0xff]  }
  0xc5   :  { %2040 = vmatprep.subr.bf16.mxu1 %v6953_v46  ;;  %v6960_v45 = vld [vmem:[%s9049_s24 + $0x498] ss:$36 sps:$4 sm:$0xff]  }
  0xc6   :  { %v6966_v46 = vld [vmem:[%s9049_s24 + $0x458] ss:$36 sps:$4 sm:$0xff]  }
  0xc7   :  { %1971 = vmatpush2.bf16.msra.mxu0 %v6894_v47  ;;  %v7012_v47 = vld [vmem:[%s9049_s24 + $0x258] ss:$36 sps:$4 sm:$0xff]  }
  0xc8   :  { %2041 = vmatpush1.bf16.msra.mxu1 %v6951_v48  ;;  %1972 = vmatprep.subr.bf16.mxu0 %v6902_v49  ;;  %v6967_v48 = vld [vmem:[%s9049_s24 + $0x218] ss:$36 sps:$4 sm:$0xff]   ;;  %v6971_v49 = vld [vmem:[%s9049_s24 + $0x410] ss:$36 sps:$4 sm:$0xff]  }
  0xc9   :  { %2042 = vmatprep.subr.bf16.mxu1 %v6959_v50  ;;  %v7015_v50 = vld [vmem:[%s9049_s24 + $0x698] ss:$36 sps:$4 sm:$0xff]  }
  0xcb   :  { %1973 = vmatpush2.bf16.msra.mxu0 %v6900_v51  ;;  %v6972_v51 = vld [vmem:[%s9049_s24 + $0x1d0] ss:$36 sps:$4 sm:$0xff]  }
  0xcc   :  { %2043 = vmatpush1.bf16.msra.mxu1 %v6957_v52  ;;  %1974 = vmatprep.subr.bf16.mxu0 %v6908_v53  ;;  %v7598_v52 = vmov 0.0   ;;  %v6976_v53 = vld [vmem:[%s9049_s24 + $0x3c8] ss:$36 sps:$4 sm:$0xff]  }
  0xcd   :  { %2044 = vmatprep.subr.bf16.mxu1 %v6965_v54  ;;  %v7016_v54 = vld [vmem:[%s9049_s24 + $0x650] ss:$36 sps:$4 sm:$0xff]  }
  0xcf   :  { %1975 = vmatpush2.bf16.msra.mxu0 %v6906_v55  ;;  %v6977_v55 = vld [vmem:[%s9049_s24 + $0x188] ss:$36 sps:$4 sm:$0xff]  }
  0xd0   :  { %2045 = vmatpush1.bf16.msra.mxu1 %v6963_v56  ;;  %1976 = vmatprep.subr.bf16.mxu0 %v6914_v57  ;;  %v7017_v56 = vld [vmem:[%s9049_s24 + $0x608] ss:$36 sps:$4 sm:$0xff]   ;;  %v6982_v57 = vld [vmem:[%s9049_s24 + $0x140] ss:$36 sps:$4 sm:$0xff]  }
  0xd1   :  { %2046 = vmatprep.subr.bf16.mxu1 %v6970_v58  ;;  %v6986_v58 = vld [vmem:[%s9049_s24 + $0x338] ss:$36 sps:$4 sm:$0xff]  }
  0xd3   :  { %1977 = vmatpush2.bf16.msra.mxu0 %v6912_v59  ;;  %v7018_v59 = vld [vmem:[%s9049_s24 + $0x5c0] ss:$36 sps:$4 sm:$0xff]  }
  0xd4   :  { %2047 = vmatpush1.bf16.msra.mxu1 %v6968_v61  ;;  %1978 = vmatprep.subr.bf16.mxu0 %v6920_v60  ;;  %v6987_v60 = vld [vmem:[%s9049_s24 + $0xf8] ss:$36 sps:$4 sm:$0xff]   ;;  %v6991_v61 = vld [vmem:[%s9049_s24 + $0x2f0] ss:$36 sps:$4 sm:$0xff]  }
  0xd5   :  { %2048 = vmatprep.subr.bf16.mxu1 %v6975_v62  ;;  %v7019_v62 = vld [vmem:[%s9049_s24 + $0x578] ss:$36 sps:$4 sm:$0xff]  }
  0xd7   :  { %1979 = vmatpush2.bf16.msra.mxu0 %v6918_v2  ;;  %v6992_v2 = vld [vmem:[%s9049_s24 + $0xb0] ss:$36 sps:$4 sm:$0xff]  }
  0xd8   :  { %2049 = vmatpush1.bf16.msra.mxu1 %v6973_v3  ;;  %1980 = vmatprep.subr.bf16.mxu0 %v6926_v4  ;;  %v6996_v3 = vld [vmem:[%s9049_s24 + $0x2a8] ss:$36 sps:$4 sm:$0xff]   ;;  %v7020_v4 = vld [vmem:[%s9049_s24 + $0x530] ss:$36 sps:$4 sm:$0xff]  }
  0xd9   :  { %2050 = vmatprep.subr.bf16.mxu1 %v6980_v6  ;;  %v6997_v6 = vld [vmem:[%s9049_s24 + $0x68] ss:$36 sps:$4 sm:$0xff]  }
  0xdb   :  { %1981 = vmatpush2.bf16.msra.mxu0 %v6924_v7  ;;  %v7001_v7 = vld [vmem:[%s9049_s24 + $0x260] ss:$36 sps:$4 sm:$0xff]  }
  0xdc   :  { %2051 = vmatpush1.bf16.msra.mxu1 %v6978_v8  ;;  %2079 = vmatprep.subr.bf16.mxu0 %v6929_v9  ;;  %v7021_v8 = vld [vmem:[%s9049_s24 + $0x4e8] ss:$36 sps:$4 sm:$0xff]   ;;  %v7002_v9 = vld [vmem:[%s9049_s24 + $0x20] ss:$36 sps:$4 sm:$0xff]  }
  0xdd   :  { %2052 = vmatprep.subr.bf16.mxu1 %v6985_v10  ;;  %v7022_v10 = vld [vmem:[%s9049_s24 + $0x4a0] ss:$36 sps:$4 sm:$0xff]  }
  0xde   :  { %1983 = vmatmul.mubr.bf16.vlgmr.msra.gmra.mxu0 %v7989_v25 }
  0xdf   :  { %2080 = vmatpush1.bf16.msra.mxu0 %v6927_v11  ;;  %2111 = vmatprep.mubr.bf16.mxu0 %v7597_v1  ;;  %v139_v11 = vlaneseq }
  0xe0   :  { %2081 = vmatprep.subr.bf16.mxu0 %v6932_v12  ;;  %2053 = vmatpush2.bf16.msra.mxu1 %v6983_v13 }
  0xe1   :  { %2054 = vmatprep.subr.bf16.mxu1 %v6990_v14  ;;  %v8473_v12 = vshrl.u32 %v139_v11, 7 }
  0xe3   :  { %2082 = vmatpush1.bf16.msra.mxu0 %v6930_v15  ;;  %v8476_v13 = vsub.s32 1, %v8473_v12 }
  0xe4   :  { %2083 = vmatprep.subr.bf16.mxu0 %v6935_v16  ;;  %2055 = vmatpush2.bf16.msra.mxu1 %v6988_v17 }
  0xe5   :  { %2056 = vmatprep.subr.bf16.mxu1 %v6995_v18 }
  0xe7   :  { %2084 = vmatpush1.bf16.msra.mxu0 %v6933_v19 }
  0xe8   :  { %2085 = vmatprep.subr.bf16.mxu0 %v6938_v20  ;;  %2057 = vmatpush2.bf16.msra.mxu1 %v6993_v23 }
  0xe9   :  { %2058 = vmatprep.subr.bf16.mxu1 %v7000_v26 }
  0xeb   :  { %2086 = vmatpush1.bf16.msra.mxu0 %v6936_v24 }
  0xec   :  { %2087 = vmatprep.subr.bf16.mxu0 %v6944_v27  ;;  %2059 = vmatpush2.bf16.msra.mxu1 %v6998_v28 }
  0xed   :  { %2060 = vmatprep.subr.bf16.mxu1 %v7005_v29 }
  0xef   :  { %2088 = vmatpush1.bf16.msra.mxu0 %v6942_v30  ;;  %v8486_v30 = vsub.s32 2, %v8473_v12 }
  0xf0   :  { %2089 = vmatprep.subr.bf16.mxu0 %v6950_v31  ;;  %2061 = vmatpush2.bf16.msra.mxu1 %v7003_v32  ;;  %v643_v31 = vsub.s32 3, %v8473_v12 }
  0xf1   :  { %2062 = vmatprep.subr.bf16.mxu1 %v7008_v33 }
  0xf3   :  { %2090 = vmatpush1.bf16.msra.mxu0 %v6948_v34 }
  0xf4   :  { %2091 = vmatprep.subr.bf16.mxu0 %v6956_v35  ;;  %2063 = vmatpush2.bf16.msra.mxu1 %v7006_v36 }
  0xf5   :  { %2064 = vmatprep.subr.bf16.mxu1 %v7011_v37 }
  0xf7   :  { %2092 = vmatpush1.bf16.msra.mxu0 %v6954_v40 }
  0xf8   :  { %2093 = vmatprep.subr.bf16.mxu0 %v6962_v41  ;;  %2065 = vmatpush2.bf16.msra.mxu1 %v7009_v42  ;;  %v8495_v42 = vsub.s32 0, %v8473_v12 }
  0xf9   :  { %2066 = vmatprep.subr.bf16.mxu1 %v7014_v44 }
  0xfb   :  { %2094 = vmatpush1.bf16.msra.mxu0 %v6960_v45 }
  0xfc   :  { %6366 = vmatprep.subr.bf16.mxu0 %v6966_v46  ;;  %2067 = vmatpush2.bf16.msra.mxu1 %v7012_v47 }
  0xfd   :  { %6526 = vmatprep.subr.bf16.mxu1 %v7598_v52 }
  0xfe   :  { %2112 = vmatmul.mubr.bf16.vlgmr.msra.gmra.mxu0 %v7853_v43 }
  0xff   :  { %6367 = vmatpush3.bf16.msra.mxu0 %v6967_v48  ;;  %2154 = vmatprep.mubr.bf16.mxu0 %v7928_v5  ;;  %v6981_v5 = vld [vmem:[%s9049_s24 + $0x380] ss:$36 sps:$4 sm:$0xff]  }
 0x100   :  { %6368 = vmatprep.subr.bf16.mxu0 %v6971_v49  ;;  %2069 = vmatmul.mubr.bf16.vlgmr.msra.gmra.mxu1 %v7989_v25 }
 0x101   :  { %6527 = vmatpush3.bf16.msra.mxu1 %v7015_v50  ;;  %6542 = vmatprep.mubr.msk.bf16.mxu1 %vm7599_vm0, %v7598_v52 }
 0x102   :  { %6528 = vmatprep.subr.bf16.mxu1 %v7598_v52 }
 0x103   :  { %6369 = vmatpush3.bf16.msra.mxu0 %v6972_v51 }
 0x104   :  { %6370 = vmatprep.subr.bf16.mxu0 %v6976_v53 }
 0x105   :  { %6529 = vmatpush3.bf16.msra.mxu1 %v7016_v54 }
 0x106   :  { %6530 = vmatprep.subr.bf16.mxu1 %v7598_v52 }
 0x107   :  { %6371 = vmatpush3.bf16.msra.mxu0 %v6977_v55 }
 0x108   :  { %6372 = vmatprep.subr.bf16.mxu0 %v6981_v5 }
 0x109   :  { %6531 = vmatpush3.bf16.msra.mxu1 %v7017_v56 }
 0x10a   :  { %6532 = vmatprep.subr.bf16.mxu1 %v7598_v52 }
 0x10b   :  { %6373 = vmatpush3.bf16.msra.mxu0 %v6982_v57 }
 0x10c   :  { %6374 = vmatprep.subr.bf16.mxu0 %v6986_v58 }
 0x10d   :  { %6533 = vmatpush3.bf16.msra.mxu1 %v7018_v59 }
 0x10e   :  { %6534 = vmatprep.subr.bf16.mxu1 %v7598_v52 }
 0x10f   :  { %6375 = vmatpush3.bf16.msra.mxu0 %v6987_v60 }
 0x110   :  { %6376 = vmatprep.subr.bf16.mxu0 %v6991_v61 }
 0x111   :  { %6535 = vmatpush3.bf16.msra.mxu1 %v7019_v62  ;;  %v647_v62 = vsub.s32 4, %v8473_v12 }
 0x112   :  { %6536 = vmatprep.subr.bf16.mxu1 %v7598_v52 }
 0x113   :  { %6377 = vmatpush3.bf16.msra.mxu0 %v6992_v2  ;;  %v651_v2 = vsub.s32 5, %v8473_v12 }
 0x114   :  { %6378 = vmatprep.subr.bf16.mxu0 %v6996_v3 }
 0x115   :  { %6537 = vmatpush3.bf16.msra.mxu1 %v7020_v4 }
 0x116   :  { %6538 = vmatprep.subr.bf16.mxu1 %v7598_v52 }
 0x117   :  { %6379 = vmatpush3.bf16.msra.mxu0 %v6997_v6 }
 0x118   :  { %6380 = vmatprep.subr.bf16.mxu0 %v7001_v7 }
 0x119   :  { %6539 = vmatpush3.bf16.msra.mxu1 %v7021_v8 }
 0x11a   :  { %6540 = vmatprep.subr.bf16.mxu1 %v7598_v52 }
 0x11b   :  { %6381 = vmatpush3.bf16.msra.mxu0 %v7002_v9 }
 0x11c   :  { %6546 = vmatprep.subr.bf16.mxu0 %v7598_v52 }
 0x11d   :  { %6541 = vmatpush3.bf16.msra.mxu1 %v7022_v10 }
 0x11e   :  { %2155 = vmatmul.mubr.bf16.vlgmr.msra.gmra.mxu0 %v7989_v25  ;;  %6552 = vmatprep.subr.bf16.mxu1 %v7598_v52  ;;  %v8481_v25 = vld [vmem:[%s9052_s0] sm:$0xff] }
 0x11f   :  { %6548 = vmatprep.mubr.msk.bf16.mxu0 %vm7599_vm0, %v7598_v52  ;;  %v1855_v14 = vpop.f32.mrf.mxu1  ;;  %v636_v15 = vrot.slane %v8481_v25, %v8476_v13  ;;  %v640_v32 = vrot.slane %v8481_v25, %v8486_v30  ;;  %v644_v36 = vrot.slane %v8481_v25, %v643_v31  ;;  %v632_v51 = vrot.slane %v8481_v25, %v8495_v42 }
 0x120   :  { %6543 = vmatmul.mubr.bf16.vlgmr.msra.gmra.mxu1 %v7853_v43  ;;  %v648_v4 = vrot.slane %v8481_v25, %v647_v62  ;;  %v652_v6 = vrot.slane %v8481_v25, %v651_v2  ;;  %v655_v31 = vsub.s32 6, %v8473_v12 }
 0x121   :  { %6554 = vmatprep.mubr.msk.bf16.mxu1 %vm7599_vm0, %v7598_v52  ;;  %v1857_v43 = vpop.f32.mrf.mxu1 }
 0x123   :  { %v1859_v19 = vpop.f32.mrf.mxu1 }
 0x125   :  { %v1861_v27 = vpop.f32.mrf.mxu1 }
 0x13e   :  { %v1812_v16 = vpop.f32.mrf.mxu0 }
 0x13f   :  { %v1813_v58 = vadd.f32 %v1812_v16, %v632_v51 }
 0x140   :  { %v1814_v17 = vpop.f32.mrf.mxu0 }
 0x141   :  { %v1815_v18 = vadd.f32 %v1814_v17, %v636_v15  ;;  %v1856_v60 = vadd.f32 %v1855_v14, %v1813_v58 }
 0x142   :  { %v1816_v20 = vpop.f32.mrf.mxu0 }
 0x143   :  { %v1858_v23 = vadd.f32 %v1857_v43, %v1815_v18  ;;  %v1817_v56 = vadd.f32 %v1816_v20, %v632_v51 }
 0x144   :  { %v1818_v24 = vpop.f32.mrf.mxu0 }
 0x145   :  { %v1819_v26 = vadd.f32 %v1818_v24, %v636_v15  ;;  %v1860_v59 = vadd.f32 %v1859_v19, %v1817_v56 }
 0x147   :  { %v1862_v28 = vadd.f32 %v1861_v27, %v1819_v26  ;;  %v2204_v61 = vpack.c.bf16 %v1860_v59, %v1856_v60  ;;  %v5828_v60 = vld [vmem:[%s9052_s0 + $0x8] ss:$0 sm:$0xff] }
 0x149   :  { %v2319_v29 = vpack.c.bf16 %v1862_v28, %v1858_v23 }
 0x15e   :  { %v1941_v34 = vpop.f32.mrf.mxu0 }
 0x15f   :  { %v1898_v33 = vpop.f32.mrf.mxu1 }
 0x160   :  { %v1899_v35 = vadd.f32 %v1898_v33, %v640_v32  ;;  %v1943_v40 = vpop.f32.mrf.mxu0  ;;  %v656_v33 = vrot.slane %v8481_v25, %v655_v31 }
 0x161   :  { %v1900_v37 = vpop.f32.mrf.mxu1 }
 0x162   :  { %v8492_v41 = vadd.f32 %v1941_v34, %v1899_v35  ;;  %v1945_v45 = vpop.f32.mrf.mxu0  ;;  %v1901_v46 = vadd.f32 %v1900_v37, %v644_v36 }
 0x163   :  { %v1902_v44 = vpop.f32.mrf.mxu1 }
 0x164   :  { %v1903_v47 = vadd.f32 %v1902_v44, %v640_v32  ;;  %v1947_v53 = vpop.f32.mrf.mxu0  ;;  %v1944_v54 = vadd.f32 %v1943_v40, %v1901_v46  ;;  %v659_v32 = vsub.s32 7, %v8473_v12 }
 0x165   :  { %v1904_v48 = vpop.f32.mrf.mxu1 }
 0x166   :  { %v8497_v49 = vadd.f32 %v1945_v45, %v1903_v47  ;;  %v1905_v50 = vadd.f32 %v1904_v48, %v644_v36  ;;  %v660_v35 = vrot.slane %v8481_v25, %v659_v32 }
 0x168   :  { %v2857_v55 = vpack.c.bf16 %v8497_v49, %v8492_v41  ;;  %v1948_v5 = vadd.f32 %v1947_v53, %v1905_v50 }
 0x16a   :  { %v2205_v57 = vpack.c.bf16 %v1948_v5, %v1944_v54 }
 0x16c   :  { %6547 = vmatpush3.bf16.xpose.msra.mxu0 %v2205_v57 }
 0x16d   :  { %6558 = vmatprep.subr.bf16.mxu0 %v7598_v52 }
 0x173   :  { %6549 = vmatmul.mubr.bf16.vlgmr.msra.gmra.mxu0 %v2204_v61 }
 0x174   :  { %6560 = vmatprep.mubr.msk.bf16.mxu0 %vm7599_vm0, %v7598_v52 }
 0x17f   :  { %v2027_v3 = vpop.f32.mrf.mxu1 }
 0x181   :  { %v2029_v7 = vpop.f32.mrf.mxu1 }
 0x183   :  { %v2031_v14 = vpop.f32.mrf.mxu1 }
 0x185   :  { %v2033_v24 = vpop.f32.mrf.mxu1 }
 0x19e   :  { %v1984_v8 = vpop.f32.mrf.mxu0 }
 0x19f   :  { %v1985_v10 = vadd.f32 %v1984_v8, %v648_v4 }
 0x1a0   :  { %v1986_v9 = vpop.f32.mrf.mxu0 }
 0x1a1   :  { %v1987_v15 = vadd.f32 %v1986_v9, %v652_v6  ;;  %v2028_v19 = vadd.f32 %v2027_v3, %v1985_v10 }
 0x1a2   :  { %v1988_v43 = vpop.f32.mrf.mxu0 }
 0x1a3   :  { %v8510_v16 = vadd.f32 %v2029_v7, %v1987_v15  ;;  %v1989_v17 = vadd.f32 %v1988_v43, %v648_v4 }
 0x1a4   :  { %v1990_v18 = vpop.f32.mrf.mxu0 }
 0x1a5   :  { %v2032_v20 = vadd.f32 %v2031_v14, %v1989_v17  ;;  %v1991_v23 = vadd.f32 %v1990_v18, %v652_v6  ;;  %v8538_v17 = vand.u32 127, %v139_v11  ;;  %v7600_v18 = vmov 2  }
 0x1a7   :  { %v2320_v26 = vpack.c.bf16 %v2032_v20, %v2028_v19  ;;  %v8512_v27 = vadd.f32 %v2033_v24, %v1991_v23  ;;  %vm153_vm1 = vcmp.lt.s32.totalorder %v8538_v17, 14  ;;  %vm152_vm2 = vcmp.lt.s32.totalorder %v8538_v17, 8 }
 0x1a8   :  { %v154_v19 = vsel %vm153_vm1, 1, %v7600_v18  ;;  %v141_v20 = vadd.s32 8, %v8473_v12  ;;  %vm158_vm5 = vcmp.le.s32.totalorder %v8538_v17, %v8473_v12  ;;  %vm4443_vm1 = vcmask 1045504  }
 0x1a9   :  { %v2858_v28 = vpack.c.bf16 %v8512_v27, %v8510_v16  ;;  %6559 = vmatpush3.bf16.xpose.msra.mxu0 %v2320_v26  ;;  %v155_v23 = vsel %vm152_vm2, 0, %v154_v19  ;;  %vm5808_vm2 = vcmask 0  }
 0x1aa   :  { %vm147_vm3 = vcmp.lt.s32.totalorder %v141_v20, 14  ;;  %vm5827_vm4 = vcmp.eq.s32.totalorder %v155_v23, 0  ;;  %vm159_vm9 = vcmp.le.s32.totalorder %v8538_v17, %v141_v20 }
 0x1ab   :  { %v149_v24 = vsel %vm147_vm3, 1, %v7600_v18  ;;  %vm8545_vm6 = vmand %vm5827_vm4, %vm158_vm5 }
 0x1ac   :  { %vm157_vm8 = vcmp.eq.s32.totalorder %v149_v24, %v155_v23 }
 0x1ad   :  { %vm8553_vm10 = vmand %vm157_vm8, %vm159_vm9 }
 0x1b0   :  { %6561 = vmatmul.mubr.bf16.vlgmr.msra.gmra.mxu0 %v2319_v29 }
 0x1b1   :  { %2593 = vmatprep.mubr.bf16.mxu0 %v7597_v1 }
 0x1be   :  { %v2113_v34 = vpop.f32.mrf.mxu0 }
 0x1c0   :  { %v2115_v36 = vpop.f32.mrf.mxu0  ;;  %v2070_v37 = vpop.f32.mrf.mxu1 }
 0x1c1   :  { %v2071_v40 = vadd.f32 %v2070_v37, %v656_v33 }
 0x1c2   :  { %v2072_v44 = vpop.f32.mrf.mxu1  ;;  %v2117_v46 = vpop.f32.mrf.mxu0 }
 0x1c3   :  { %v2073_v45 = vadd.f32 %v2072_v44, %v660_v35  ;;  %v2114_v48 = vadd.f32 %v2113_v34, %v2071_v40 }
 0x1c4   :  { %v2074_v47 = vpop.f32.mrf.mxu1  ;;  %v2119_v5 = vpop.f32.mrf.mxu0 }
 0x1c5   :  { %v8521_v29 = vadd.f32 %v2115_v36, %v2073_v45  ;;  %v2075_v50 = vadd.f32 %v2074_v47, %v656_v33 }
 0x1c6   :  { %v2076_v51 = vpop.f32.mrf.mxu1 }
 0x1c7   :  { %v2118_v53 = vadd.f32 %v2117_v46, %v2075_v50  ;;  %v2077_v54 = vadd.f32 %v2076_v51, %v660_v35 }
 0x1c9   :  { %v2206_v56 = vpack.c.bf16 %v2118_v53, %v2114_v48  ;;  %v8523_v57 = vadd.f32 %v2119_v5, %v2077_v54 }
 0x1cb   :  { %v2321_v25 = vpack.c.bf16 %v8523_v57, %v8521_v29  ;;  %6553 = vmatpush3.bf16.msra.mxu1 %v2206_v56  ;;  %v7023_v29 = vld [vmem:[#allocation3 + $0x168] ss:$12 sps:$4 sm:$0xff]   ;;  %v7025_v57 = vld [vmem:[#allocation3 + $0x16c] ss:$12 sps:$4 sm:$0xff]  }
 0x1cc   :  { %6564 = vmatprep.subr.bf16.mxu1 %v7598_v52  ;;  %2561 = vmatprep.subr.bf16.mxu0 %v7025_v57  ;;  %v7066_v57 = vld [vmem:[#allocation3 + $0x80] ss:$12 sps:$4 sm:$0xff]  }
 0x1cd   :  { %2562 = vmatpush1.bf16.msra.mxu0 %v7023_v29  ;;  %v7063_v29 = vld [vmem:[#allocation3 + $0x78] ss:$12 sps:$4 sm:$0xff]  }
 0x1de   :  { %v6382_v58 = vpop.f32.mrf.mxu0 }
 0x1e0   :  { %v6383_v59 = vpop.f32.mrf.mxu0  ;;  %v2197_v61 = vpop.f32.mrf.mxu1 }
 0x1e1   :  { %v6384_v62 = vadd.f32 %v6383_v59, %v6382_v58 }
 0x1e2   :  { %v6385_v2 = vpop.f32.mrf.mxu0  ;;  %v6544_v3 = vpop.f32.mrf.mxu1 }
 0x1e3   :  { %v2157_v4 = vadd.f32 %v6384_v62, %v5828_v60 }
 0x1e4   :  { %v6386_v6 = vpop.f32.mrf.mxu0  ;;  %v2200_v7 = vpop.f32.mrf.mxu1 }
 0x1e5   :  { %v6387_v8 = vadd.f32 %v6386_v6, %v6385_v2  ;;  %v8531_v9 = vadd.f32 %v2197_v61, %v2157_v4 }
 0x1e6   :  { %v6545_v10 = vpop.f32.mrf.mxu1 }
 0x1e7   :  { %v2160_v15 = vadd.f32 %v6387_v8, %v5828_v60 }
 0x1e9   :  { %v8533_v14 = vadd.f32 %v2200_v7, %v2160_v15 }
 0x1eb   :  { %v2859_v43 = vpack.c.bf16 %v8533_v14, %v8531_v9 }
 0x233   :  { %v2241_v11 = vpop.f32.mrf.mxu0 }
 0x234   :  { %v2248_v31 = vsel %vm8545_vm6, %v2241_v11, -1e+30 }
 0x235   :  { %v6550_v32 = vpop.f32.mrf.mxu0  ;;  %v2251_v33 = vsel %vm2250_vm7, %v2248_v31, -inf }
 0x236   :  { %2252 = vmax.xlane.f32.xlu0 %v2251_v33 }
 0x237   :  { %v2244_v12 = vpop.f32.mrf.mxu0 }
 0x238   :  { %v2249_v35 = vsel %vm8553_vm10, %v2244_v12, -1e+30 }
 0x239   :  { %v6551_v36 = vpop.f32.mrf.mxu0  ;;  %v2254_v37 = vsel %vm2250_vm7, %v2249_v35, -inf }
 0x23a   :  { %2255 = vmax.xlane.f32.xlu0 %v2254_v37 }
 0x270   :  { %v2356_v40 = vpop.f32.mrf.mxu0 }
 0x271   :  { %v2363_v44 = vsel %vm8545_vm6, %v2356_v40, -1e+30 }
 0x272   :  { %v6562_v45 = vpop.f32.mrf.mxu0  ;;  %v2365_v46 = vsel %vm2250_vm7, %v2363_v44, -inf }
 0x273   :  { %2366 = vmax.xlane.f32.xlu1 %v2365_v46 }
 0x274   :  { %v2359_v47 = vpop.f32.mrf.mxu0 }
 0x275   :  { %v2364_v48 = vsel %vm8553_vm10, %v2359_v47, -1e+30  ;;  %v7029_v47 = vld [vmem:[#allocation3 + $0x154] ss:$12 sps:$4 sm:$0xff]  }
 0x276   :  { %v6563_v50 = vpop.f32.mrf.mxu0  ;;  %v2368_v51 = vsel %vm2250_vm7, %v2364_v48, -inf  ;;  %2563 = vmatprep.subr.bf16.mxu0 %v7029_v47  ;;  %v7067_v47 = vld [vmem:[#allocation3 + $0x60] ss:$12 sps:$4 sm:$0xff]  }
 0x277   :  { %2369 = vmax.xlane.f32.xlu1 %v2368_v51  ;;  %v7027_v50 = vld [vmem:[#allocation3 + $0x150] ss:$12 sps:$4 sm:$0xff]  }
 0x278   :  { %v7033_v51 = vld [vmem:[#allocation3 + $0x13c] ss:$12 sps:$4 sm:$0xff]   ;;  %2564 = vmatpush1.bf16.msra.mxu0 %v7027_v50  ;;  %v7073_v50 = vld [vmem:[#allocation3 + $0x4c] ss:$12 sps:$4 sm:$0xff]  }
 0x279   :  { %2565 = vmatprep.subr.bf16.mxu0 %v7033_v51  ;;  %v7071_v51 = vld [vmem:[#allocation3 + $0x48] ss:$12 sps:$4 sm:$0xff]  }
 0x2bf   :  { %v2253_v53 = vpop.xlane.xlu0 %2252 }
 0x2c0   :  { %v2257_v54 = vsub.f32 %v2248_v31, %v2253_v53  ;;  %v7034_v53 = vld [vmem:[#allocation3 + $0x140] ss:$12 sps:$4 sm:$0xff]  }
 0x2c2   :  { %v2259_v5 = vmul.f32 1.442695, %v2257_v54  ;;  %v7031_v54 = vld [vmem:[#allocation3 + $0x138] ss:$12 sps:$4 sm:$0xff]  }
 0x2c3   :  { %v2256_v56 = vpop.xlane.xlu0 %2255  ;;  %2566 = vmatpush1.bf16.msra.mxu0 %v7031_v54  ;;  %v7077_v54 = vld [vmem:[#allocation3 + $0x34] ss:$12 sps:$4 sm:$0xff]  }
 0x2c4   :  { %7447 = vpow2.f32 %v2259_v5  ;;  %v2258_v58 = vsub.f32 %v2249_v35, %v2256_v56  ;;  %v7037_v5 = vld [vmem:[#allocation3 + $0x124] ss:$12 sps:$4 sm:$0xff]   ;;  %v7038_v56 = vld [vmem:[#allocation3 + $0x128] ss:$12 sps:$4 sm:$0xff]  }
 0x2c5   :  { %2567 = vmatprep.subr.bf16.mxu0 %v7037_v5  ;;  %v7075_v5 = vld [vmem:[#allocation3 + $0x30] ss:$12 sps:$4 sm:$0xff]  }
 0x2c6   :  { %v2261_v59 = vmul.f32 1.442695, %v2258_v58  ;;  %v7035_v58 = vld [vmem:[#allocation3 + $0x120] ss:$12 sps:$4 sm:$0xff]  }
 0x2c7   :  { %2568 = vmatpush1.bf16.msra.mxu0 %v7035_v58  ;;  %v7081_v58 = vld [vmem:[#allocation3 + $0x1c] ss:$12 sps:$4 sm:$0xff]  }
 0x2c8   :  { %7449 = vpow2.f32 %v2261_v59  ;;  %v7041_v59 = vld [vmem:[#allocation3 + $0x10c] ss:$12 sps:$4 sm:$0xff]  }
 0x2c9   :  { %2569 = vmatprep.subr.bf16.mxu0 %v7041_v59  ;;  %v7079_v59 = vld [vmem:[#allocation3 + $0x18] ss:$12 sps:$4 sm:$0xff]  }
 0x2d1   :  { %v7448_v60 = vpop.eup %7447 }
 0x2d2   :  { %v2263_v61 = vsel %vm2250_vm7, %v7448_v60, 0.0 }
 0x2d3   :  { %2264 = vadd.xlane.f32.xlu0 %v2263_v61  ;;  %v7039_v61 = vld [vmem:[#allocation3 + $0x108] ss:$12 sps:$4 sm:$0xff]  }
 0x2d4   :  { %2570 = vmatpush1.bf16.msra.mxu0 %v7039_v61  ;;  %v7085_v61 = vld [vmem:[#allocation3 + $0x4] ss:$12 sps:$4 sm:$0xff]  }
 0x2d5   :  { %v7450_v62 = vpop.eup %7449 }
 0x2d6   :  { %v2266_v2 = vsel %vm2250_vm7, %v7450_v62, 0.0 }
 0x2d7   :  { %2267 = vadd.xlane.f32.xlu1 %v2266_v2  ;;  %v7046_v2 = vld [vmem:[#allocation3 + $0xf8] ss:$12 sps:$4 sm:$0xff]  }
 0x2fc   :  { %v2367_v3 = vpop.xlane.xlu1 %2366 }
 0x2fd   :  { %v2371_v4 = vsub.f32 %v2363_v44, %v2367_v3  ;;  %v7043_v3 = vld [vmem:[#allocation3 + $0xf0] ss:$12 sps:$4 sm:$0xff]  }
 0x2ff   :  { %v2373_v6 = vmul.f32 1.442695, %v2371_v4  ;;  %v7049_v4 = vld [vmem:[#allocation3 + $0xdc] ss:$12 sps:$4 sm:$0xff]  }
 0x300   :  { %v2370_v7 = vpop.xlane.xlu1 %2369 }
 0x301   :  { %7451 = vpow2.f32 %v2373_v6  ;;  %v2372_v8 = vsub.f32 %v2364_v48, %v2370_v7  ;;  %v7030_v48 = vld [vmem:[#allocation3 + $0x158] ss:$12 sps:$4 sm:$0xff]   ;;  %v7050_v6 = vld [vmem:[#allocation3 + $0xe0] ss:$12 sps:$4 sm:$0xff]  }
 0x302   :  { %v7047_v7 = vld [vmem:[#allocation3 + $0xd8] ss:$12 sps:$4 sm:$0xff]  }
 0x303   :  { %v2375_v10 = vmul.f32 1.442695, %v2372_v8  ;;  %v7053_v8 = vld [vmem:[#allocation3 + $0xc4] ss:$12 sps:$4 sm:$0xff]  }
 0x305   :  { %7453 = vpow2.f32 %v2375_v10  ;;  %v7051_v10 = vld [vmem:[#allocation3 + $0xc0] ss:$12 sps:$4 sm:$0xff]  }
 0x30e   :  { %v7452_v15 = vpop.eup %7451 }
 0x30f   :  { %v2377_v18 = vsel %vm2250_vm7, %v7452_v15, 0.0 }
 0x310   :  { %2378 = vadd.xlane.f32.xlu0 %v2377_v18  ;;  %v7057_v18 = vld [vmem:[#allocation3 + $0xac] ss:$12 sps:$4 sm:$0xff]  }
 0x312   :  { %v7454_v19 = vpop.eup %7453 }
 0x313   :  { %v2380_v20 = vsel %vm2250_vm7, %v7454_v19, 0.0 }
 0x314   :  { %2381 = vadd.xlane.f32.xlu1 %v2380_v20 }
 0x35c   :  { %v2265_v23 = vpop.xlane.xlu0 %2264 }
 0x35d   :  { %7455 = vrcp.f32 %v2265_v23 }
 0x360   :  { %v2268_v24 = vpop.xlane.xlu1 %2267 }
 0x361   :  { %7457 = vrcp.f32 %v2268_v24 }
 0x36a   :  { %v7456_v11 = vpop.eup %7455 }
 0x36b   :  { %v2271_v32 = vmul.f32 %v7456_v11, %v7448_v60  ;;  %v7042_v60 = vld [vmem:[#allocation3 + $0x110] ss:$12 sps:$4 sm:$0xff]  }
 0x36e   :  { %v7458_v31 = vpop.eup %7457 }
 0x36f   :  { %v2272_v33 = vmul.f32 %v7458_v31, %v7450_v62  ;;  %v7045_v62 = vld [vmem:[#allocation3 + $0xf4] ss:$12 sps:$4 sm:$0xff]  }
 0x370   :  { %2571 = vmatprep.subr.bf16.mxu0 %v7045_v62  ;;  %v7083_v62 = vld [vmem:[#allocation3] ss:$12 sps:$4 sm:$0xff]  }
 0x371   :  { %v2273_v12 = vpack.c.bf16 %v2272_v33, %v2271_v32  ;;  %2572 = vmatpush1.bf16.msra.mxu0 %v7043_v3 }
 0x372   :  { %2573 = vmatprep.subr.bf16.mxu0 %v7049_v4 }
 0x373   :  { %6555 = vmatmul.mubr.msk.bf16.vlgmr.msra.gmra.mxu1 %vm2250_vm7, %v2273_v12  ;;  %v7055_v12 = vld [vmem:[#allocation3 + $0xa8] ss:$12 sps:$4 sm:$0xff]  }
 0x374   :  { %6565 = vmatpush3.bf16.msra.mxu1 %v2321_v25  ;;  %6566 = vmatprep.mubr.msk.bf16.mxu1 %vm7599_vm0, %v7598_v52  ;;  %v7026_v25 = vld [vmem:[#allocation3 + $0x170] ss:$12 sps:$4 sm:$0xff]  }
 0x375   :  { %6570 = vmatprep.subr.bf16.mxu1 %v7598_v52  ;;  %2574 = vmatpush1.bf16.msra.mxu0 %v7047_v7 }
 0x376   :  { %2575 = vmatprep.subr.bf16.mxu0 %v7053_v8 }
 0x379   :  { %2576 = vmatpush1.bf16.msra.mxu0 %v7051_v10 }
 0x37a   :  { %2773 = vmatprep.subr.bf16.mxu0 %v7057_v18 }
 0x399   :  { %v2379_v35 = vpop.xlane.xlu0 %2378 }
 0x39a   :  { %7459 = vrcp.f32 %v2379_v35  ;;  %v7058_v35 = vld [vmem:[#allocation3 + $0xb0] ss:$12 sps:$4 sm:$0xff]  }
 0x39d   :  { %v2382_v36 = vpop.xlane.xlu1 %2381 }
 0x39e   :  { %7461 = vrcp.f32 %v2382_v36 }
 0x3a7   :  { %v7460_v37 = vpop.eup %7459 }
 0x3a8   :  { %v2385_v44 = vmul.f32 %v7460_v37, %v7452_v15  ;;  %v7054_v15 = vld [vmem:[#allocation3 + $0xc8] ss:$12 sps:$4 sm:$0xff]  }
 0x3a9   :  { %v7061_v37 = vld [vmem:[#allocation3 + $0x94] ss:$12 sps:$4 sm:$0xff]  }
 0x3ab   :  { %v7462_v40 = vpop.eup %7461 }
 0x3ac   :  { %v2386_v45 = vmul.f32 %v7462_v40, %v7454_v19 }
 0x3ae   :  { %v2387_v46 = vpack.c.bf16 %v2386_v45, %v2385_v44  ;;  %v7059_v44 = vld [vmem:[#allocation3 + $0x90] ss:$12 sps:$4 sm:$0xff]   ;;  %v7062_v45 = vld [vmem:[#allocation3 + $0x98] ss:$12 sps:$4 sm:$0xff]  }
 0x3b0   :  { %6567 = vmatmul.mubr.msk.bf16.vlgmr.msra.gmra.mxu1 %vm2250_vm7, %v2387_v46  ;;  %v7065_v46 = vld [vmem:[#allocation3 + $0x7c] ss:$12 sps:$4 sm:$0xff]  }
 0x3b1   :  { %6586 = vmatprep.mubr.msk.bf16.mxu1 %vm7599_vm0, %v7598_v52  ;;  %6571 = vmatpush3.bf16.msra.mxu1 %v7026_v25  ;;  %v7069_v25 = vld [vmem:[#allocation3 + $0x64] ss:$12 sps:$4 sm:$0xff]  }
 0x3b2   :  { %6572 = vmatprep.subr.bf16.mxu1 %v7598_v52 }
 0x3b5   :  { %6573 = vmatpush3.bf16.msra.mxu1 %v7030_v48  ;;  %v7070_v48 = vld [vmem:[#allocation3 + $0x68] ss:$12 sps:$4 sm:$0xff]  }
 0x3b6   :  { %6574 = vmatprep.subr.bf16.mxu1 %v7598_v52 }
 0x3b9   :  { %6575 = vmatpush3.bf16.msra.mxu1 %v7034_v53  ;;  %v7074_v53 = vld [vmem:[#allocation3 + $0x50] ss:$12 sps:$4 sm:$0xff]  }
 0x3ba   :  { %6576 = vmatprep.subr.bf16.mxu1 %v7598_v52 }
 0x3bd   :  { %6577 = vmatpush3.bf16.msra.mxu1 %v7038_v56  ;;  %v7078_v56 = vld [vmem:[#allocation3 + $0x38] ss:$12 sps:$4 sm:$0xff]  }
 0x3be   :  { %6578 = vmatprep.subr.bf16.mxu1 %v7598_v52 }
 0x3c1   :  { %6579 = vmatpush3.bf16.msra.mxu1 %v7042_v60  ;;  %v7082_v60 = vld [vmem:[#allocation3 + $0x20] ss:$12 sps:$4 sm:$0xff]  }
 0x3c2   :  { %6580 = vmatprep.subr.bf16.mxu1 %v7598_v52 }
 0x3c5   :  { %6581 = vmatpush3.bf16.msra.mxu1 %v7046_v2  ;;  %v7086_v2 = vld [vmem:[#allocation3 + $0x8] ss:$12 sps:$4 sm:$0xff]  }
 0x3c6   :  { %6582 = vmatprep.subr.bf16.mxu1 %v7598_v52 }
 0x3c9   :  { %6583 = vmatpush3.bf16.msra.mxu1 %v7050_v6 }
 0x3ca   :  { %6584 = vmatprep.subr.bf16.mxu1 %v7598_v52 }
 0x3cd   :  { %6585 = vmatpush3.bf16.msra.mxu1 %v7054_v15 }
 0x3ce   :  { %6590 = vmatprep.subr.bf16.mxu1 %v7598_v52 }
 0x433   :  { %v2311_v19 = vpop.f32.mrf.mxu1 }
 0x435   :  { %v6556_v20 = vpop.f32.mrf.mxu1 }
 0x437   :  { %v2314_v23 = vpop.f32.mrf.mxu1 }
 0x438   :  { %v8588_v24 = vpack.c.bf16 %v2314_v23, %v2311_v19 }
 0x439   :  { %v6557_v11 = vpop.f32.mrf.mxu1 }
 0x470   :  { %v2425_v31 = vpop.f32.mrf.mxu1 }
 0x472   :  { %v6568_v32 = vpop.f32.mrf.mxu1 }
 0x474   :  { %v2428_v33 = vpop.f32.mrf.mxu1 }
 0x475   :  { %v2432_v36 = vpack.c.bf16 %v2428_v33, %v2425_v31 }
 0x476   :  { %v6569_v40 = vpop.f32.mrf.mxu1 }
 0x477   :  { %2594 = vmatmul.mubr.bf16.vlgmr.msra.gmra.mxu0 %v2432_v36  ;;  %6587 = vmatmul.mubr.bf16.vlgmr.msra.gmra.mxu1 %v2432_v36 }
 0x478   :  { %2774 = vmatpush1.bf16.msra.mxu0 %v7055_v12  ;;  %6591 = vmatpush3.bf16.msra.mxu1 %v7058_v35 }
 0x479   :  { %2775 = vmatprep.subr.bf16.mxu0 %v7061_v37  ;;  %6592 = vmatprep.subr.bf16.mxu1 %v7598_v52 }
 0x47a   :  { %2805 = vmatprep.mubr.bf16.mxu0 %v7597_v1  ;;  %6606 = vmatprep.mubr.msk.bf16.mxu1 %vm7599_vm0, %v7598_v52 }
 0x47c   :  { %2776 = vmatpush1.bf16.msra.mxu0 %v7059_v44  ;;  %6593 = vmatpush3.bf16.msra.mxu1 %v7062_v45 }
 0x47d   :  { %2777 = vmatprep.subr.bf16.mxu0 %v7065_v46  ;;  %6594 = vmatprep.subr.bf16.mxu1 %v7598_v52 }
 0x480   :  { %2778 = vmatpush1.bf16.msra.mxu0 %v7063_v29  ;;  %6595 = vmatpush3.bf16.msra.mxu1 %v7066_v57 }
 0x481   :  { %2779 = vmatprep.subr.bf16.mxu0 %v7069_v25  ;;  %6596 = vmatprep.subr.bf16.mxu1 %v7598_v52 }
 0x484   :  { %2780 = vmatpush1.bf16.msra.mxu0 %v7067_v47  ;;  %6597 = vmatpush3.bf16.msra.mxu1 %v7070_v48 }
 0x485   :  { %2781 = vmatprep.subr.bf16.mxu0 %v7073_v50  ;;  %6598 = vmatprep.subr.bf16.mxu1 %v7598_v52  ;;  %v7087_v50 = vld [vmem:[#allocation3 + $0x228] ss:$12 sps:$4 sm:$0xff]  }
 0x488   :  { %2782 = vmatpush1.bf16.msra.mxu0 %v7071_v51  ;;  %6599 = vmatpush3.bf16.msra.mxu1 %v7074_v53  ;;  %v7089_v51 = vld [vmem:[#allocation3 + $0x22c] ss:$12 sps:$4 sm:$0xff]   ;;  %v7093_v53 = vld [vmem:[#allocation3 + $0x214] ss:$12 sps:$4 sm:$0xff]  }
 0x489   :  { %2783 = vmatprep.subr.bf16.mxu0 %v7077_v54  ;;  %6600 = vmatprep.subr.bf16.mxu1 %v7598_v52  ;;  %v7091_v54 = vld [vmem:[#allocation3 + $0x210] ss:$12 sps:$4 sm:$0xff]  }
 0x48c   :  { %2784 = vmatpush1.bf16.msra.mxu0 %v7075_v5  ;;  %6601 = vmatpush3.bf16.msra.mxu1 %v7078_v56  ;;  %v7097_v5 = vld [vmem:[#allocation3 + $0x1fc] ss:$12 sps:$4 sm:$0xff]   ;;  %v7095_v56 = vld [vmem:[#allocation3 + $0x1f8] ss:$12 sps:$4 sm:$0xff]  }
 0x48d   :  { %2785 = vmatprep.subr.bf16.mxu0 %v7081_v58  ;;  %6602 = vmatprep.subr.bf16.mxu1 %v7598_v52  ;;  %v7101_v58 = vld [vmem:[#allocation3 + $0x1e4] ss:$12 sps:$4 sm:$0xff]  }
 0x490   :  { %2786 = vmatpush1.bf16.msra.mxu0 %v7079_v59  ;;  %6603 = vmatpush3.bf16.msra.mxu1 %v7082_v60  ;;  %v7099_v59 = vld [vmem:[#allocation3 + $0x1e0] ss:$12 sps:$4 sm:$0xff]  }
 0x491   :  { %2787 = vmatprep.subr.bf16.mxu0 %v7085_v61  ;;  %6604 = vmatprep.subr.bf16.mxu1 %v7598_v52  ;;  %v7105_v60 = vld [vmem:[#allocation3 + $0x1cc] ss:$12 sps:$4 sm:$0xff]   ;;  %v7103_v61 = vld [vmem:[#allocation3 + $0x1c8] ss:$12 sps:$4 sm:$0xff]  }
 0x494   :  { %2788 = vmatpush1.bf16.msra.mxu0 %v7083_v62  ;;  %6605 = vmatpush3.bf16.msra.mxu1 %v7086_v2  ;;  %v7109_v62 = vld [vmem:[#allocation3 + $0x1b4] ss:$12 sps:$4 sm:$0xff]   ;;  %v7107_v2 = vld [vmem:[#allocation3 + $0x1b0] ss:$12 sps:$4 sm:$0xff]  }
 0x495   :  { %6610 = vmatprep.subr.bf16.mxu0 %v7598_v52  ;;  %6616 = vmatprep.subr.bf16.mxu1 %v7598_v52 }
 0x497   :  { %2806 = vmatmul.mubr.bf16.vlgmr.msra.gmra.mxu0 %v8588_v24  ;;  %6607 = vmatmul.mubr.bf16.vlgmr.msra.gmra.mxu1 %v8588_v24 }
 0x498   :  { %6611 = vmatpush3.bf16.xpose.msra.mxu0 %v2858_v28  ;;  %6617 = vmatpush3.bf16.msra.mxu1 %v2859_v43 }
 0x499   :  { %6612 = vmatprep.mubr.msk.bf16.mxu0 %vm7599_vm0, %v7598_v52  ;;  %6618 = vmatprep.mubr.msk.bf16.mxu1 %vm7599_vm0, %v7598_v52 }
 0x49a   :  { %6622 = vmatprep.subr.bf16.mxu1 %v7598_v52  ;;  %3099 = vmatprep.subr.bf16.mxu0 %v7089_v51 }
 0x49f   :  { %6613 = vmatmul.mubr.bf16.vlgmr.msra.gmra.mxu0 %v2857_v55 }
 0x4a0   :  { %3131 = vmatprep.mubr.bf16.mxu0 %v7597_v1  ;;  %3100 = vmatpush1.bf16.msra.mxu0 %v7087_v50 }
 0x4a1   :  { %3101 = vmatprep.subr.bf16.mxu0 %v7093_v53 }
 0x4a4   :  { %3102 = vmatpush1.bf16.msra.mxu0 %v7091_v54 }
 0x4a5   :  { %3103 = vmatprep.subr.bf16.mxu0 %v7097_v5 }
 0x4a8   :  { %3104 = vmatpush1.bf16.msra.mxu0 %v7095_v56 }
 0x4a9   :  { %3105 = vmatprep.subr.bf16.mxu0 %v7101_v58 }
 0x4ac   :  { %3106 = vmatpush1.bf16.msra.mxu0 %v7099_v59 }
 0x4ad   :  { %3107 = vmatprep.subr.bf16.mxu0 %v7105_v60 }
 0x4b0   :  { %3108 = vmatpush1.bf16.msra.mxu0 %v7103_v61 }
 0x4b1   :  { %3109 = vmatprep.subr.bf16.mxu0 %v7109_v62 }
 0x4b4   :  { %3110 = vmatpush1.bf16.msra.mxu0 %v7107_v2 }
 0x537   :  { %v2638_v16 = vpop.f32.mrf.mxu1  ;;  %v2595_v9 = vpop.f32.mrf.mxu0 }
 0x539   :  { %v6588_v27 = vpop.f32.mrf.mxu1  ;;  %v2597_v14 = vpop.f32.mrf.mxu0 }
 0x53a   :  { %v7111_v27 = vld [vmem:[#allocation3 + $0x198] ss:$12 sps:$4 sm:$0xff]  }
 0x53b   :  { %v2641_v28 = vpop.f32.mrf.mxu1  ;;  %v2599_v43 = vpop.f32.mrf.mxu0 }
 0x53d   :  { %v6589_v3 = vpop.f32.mrf.mxu1  ;;  %v2601_v4 = vpop.f32.mrf.mxu0 }
 0x557   :  { %v2807_v6 = vpop.f32.mrf.mxu0  ;;  %v2850_v7 = vpop.f32.mrf.mxu1 }
 0x558   :  { %v8619_v8 = vadd.f32 %v2807_v6, %v2595_v9  ;;  %v8621_v10 = vadd.f32 %v2850_v7, %v2638_v16  ;;  %v7113_v16 = vld [vmem:[#allocation3 + $0x19c] ss:$12 sps:$4 sm:$0xff]  }
 0x559   :  { %v2809_v15 = vpop.f32.mrf.mxu0  ;;  %v6608_v18 = vpop.f32.mrf.mxu1  ;;  %3111 = vmatprep.subr.bf16.mxu0 %v7113_v16  ;;  %v7090_v6 = vld [vmem:[#allocation3 + $0x230] ss:$12 sps:$4 sm:$0xff]  }
 0x55a   :  { %v8623_v41 = vadd.f32 %v2809_v15, %v2597_v14  ;;  %3112 = vmatpush1.bf16.msra.mxu0 %v7111_v27  ;;  %v7094_v15 = vld [vmem:[#allocation3 + $0x218] ss:$12 sps:$4 sm:$0xff]   ;;  %v7098_v18 = vld [vmem:[#allocation3 + $0x200] ss:$12 sps:$4 sm:$0xff]  }
 0x55b   :  { %v2811_v49 = vpop.f32.mrf.mxu0  ;;  %v2853_v55 = vpop.f32.mrf.mxu1 }
 0x55c   :  { %v8625_v19 = vadd.f32 %v2811_v49, %v2599_v43  ;;  %v8627_v20 = vadd.f32 %v2853_v55, %v2641_v28  ;;  %v7102_v49 = vld [vmem:[#allocation3 + $0x1e8] ss:$12 sps:$4 sm:$0xff]   ;;  %v7106_v55 = vld [vmem:[#allocation3 + $0x1d0] ss:$12 sps:$4 sm:$0xff]  }
 0x55d   :  { %v2813_v23 = vpop.f32.mrf.mxu0  ;;  %v6609_v24 = vpop.f32.mrf.mxu1 }
 0x55e   :  { %v8629_v11 = vadd.f32 %v2813_v23, %v2601_v4  ;;  %v7110_v23 = vld [vmem:[#allocation3 + $0x1b8] ss:$12 sps:$4 sm:$0xff]   ;;  %v7114_v24 = vld [vmem:[#allocation3 + $0x1a0] ss:$12 sps:$4 sm:$0xff]  }
 0x55f   :  { %v2894_v31 = vpop.f32.mrf.mxu0 }
 0x560   :  { %v2901_v32 = vsel %vm8545_vm6, %v2894_v31, -1e+30  ;;  %v7117_v31 = vld [vmem:[#allocation3 + $0x184] ss:$12 sps:$4 sm:$0xff]  }
 0x561   :  { %v6614_v33 = vpop.f32.mrf.mxu0  ;;  %v2903_v12 = vsel %vm2250_vm7, %v2901_v32, -inf  ;;  %3113 = vmatprep.subr.bf16.mxu0 %v7117_v31  ;;  %v7142_v31 = vld [vmem:[%s9029_s8 + $0x4] ss:$8 sps:$4 sm:$0xff]  }
 0x562   :  { %2904 = vmax.xlane.f32.xlu0 %v2903_v12  ;;  %v7118_v33 = vld [vmem:[#allocation3 + $0x188] ss:$12 sps:$4 sm:$0xff]  }
 0x563   :  { %v2897_v35 = vpop.f32.mrf.mxu0 }
 0x564   :  { %v2902_v36 = vsel %vm8553_vm10, %v2897_v35, -1e+30 }
 0x565   :  { %v6615_v37 = vpop.f32.mrf.mxu0  ;;  %v2906_v40 = vsel %vm2250_vm7, %v2902_v36, -inf }
 0x566   :  { %2907 = vmax.xlane.f32.xlu1 %v2906_v40 }
 0x5eb   :  { %v2905_v44 = vpop.xlane.xlu0 %2904 }
 0x5ec   :  { %v2909_v45 = vsub.f32 %v2901_v32, %v2905_v44  ;;  %v7115_v32 = vld [vmem:[#allocation3 + $0x180] ss:$12 sps:$4 sm:$0xff]  }
 0x5ed   :  { %3114 = vmatpush1.bf16.msra.mxu0 %v7115_v32  ;;  %v505_v44 = vld [vmem:[%s9026_s5] sm:$0x7] }
 0x5ee   :  { %v2911_v46 = vmul.f32 1.442695, %v2909_v45  ;;  %v3193_v45 = vrot.slane %v505_v44, %v8495_v42  ;;  %v7140_v32 = vld [vmem:[%s9029_s8] ss:$8 sps:$4 sm:$0xff]  }
 0x5ef   :  { %v2908_v29 = vpop.xlane.xlu1 %2907 }
 0x5f0   :  { %7463 = vpow2.f32 %v2911_v46  ;;  %v2910_v57 = vsub.f32 %v2902_v36, %v2908_v29 }
 0x5f2   :  { %v2913_v26 = vmul.f32 1.442695, %v2910_v57 }
 0x5f4   :  { %7465 = vpow2.f32 %v2913_v26 }
 0x5fd   :  { %v7464_v25 = vpop.eup %7463 }
 0x5fe   :  { %v2915_v47 = vsel %vm2250_vm7, %v7464_v25, 0.0 }
 0x5ff   :  { %2916 = vadd.xlane.f32.xlu0 %v2915_v47  ;;  %v3197_v47 = vrot.slane %v505_v44, %v8476_v13 }
 0x601   :  { %v7466_v48 = vpop.eup %7465 }
 0x602   :  { %v2918_v34 = vsel %vm2250_vm7, %v7466_v48, 0.0 }
 0x603   :  { %2919 = vadd.xlane.f32.xlu1 %v2918_v34 }
 0x688   :  { %v2917_v28 = vpop.xlane.xlu0 %2916 }
 0x689   :  { %7467 = vrcp.f32 %v2917_v28 }
 0x68c   :  { %v2920_v3 = vpop.xlane.xlu1 %2919 }
 0x68d   :  { %7469 = vrcp.f32 %v2920_v3 }
 0x696   :  { %v7468_v9 = vpop.eup %7467 }
 0x697   :  { %v2923_v43 = vmul.f32 %v7468_v9, %v7464_v25  ;;  %v3201_v25 = vrot.slane %v505_v44, %v8486_v30 }
 0x69a   :  { %v7470_v14 = vpop.eup %7469 }
 0x69b   :  { %v2924_v4 = vmul.f32 %v7470_v14, %v7466_v48 }
 0x69d   :  { %v2925_v7 = vpack.c.bf16 %v2924_v4, %v2923_v43  ;;  %v7145_v43 = vld [vmem:[%s9029_s8 + $0x174] ss:$8 sps:$4 sm:$0xff]   ;;  %v7125_v4 = vld [vmem:[%s9029_s8 + $0x50] ss:$8 sps:$4 sm:$0xff]  }
 0x69f   :  { %6619 = vmatmul.mubr.msk.bf16.vlgmr.msra.gmra.mxu1 %vm2250_vm7, %v2925_v7  ;;  %v7128_v7 = vld [vmem:[%s9029_s8 + $0x40] ss:$8 sps:$4 sm:$0xff]  }
 0x6a0   :  { %6623 = vmatpush3.bf16.msra.mxu1 %v7090_v6  ;;  %6638 = vmatprep.mubr.msk.bf16.mxu1 %vm7599_vm0, %v7598_v52  ;;  %v7130_v6 = vld [vmem:[%s9029_s8 + $0x44] ss:$8 sps:$4 sm:$0xff]  }
 0x6a1   :  { %6624 = vmatprep.subr.bf16.mxu1 %v7598_v52 }
 0x6a4   :  { %6625 = vmatpush3.bf16.msra.mxu1 %v7094_v15  ;;  %v7133_v15 = vld [vmem:[%s9029_s8 + $0x34] ss:$8 sps:$4 sm:$0xff]  }
 0x6a5   :  { %6626 = vmatprep.subr.bf16.mxu1 %v7598_v52 }
 0x6a8   :  { %6627 = vmatpush3.bf16.msra.mxu1 %v7098_v18  ;;  %v7131_v18 = vld [vmem:[%s9029_s8 + $0x30] ss:$8 sps:$4 sm:$0xff]  }
 0x6a9   :  { %6628 = vmatprep.subr.bf16.mxu1 %v7598_v52 }
 0x6ac   :  { %6629 = vmatpush3.bf16.msra.mxu1 %v7102_v49  ;;  %v7136_v49 = vld [vmem:[%s9029_s8 + $0x24] ss:$8 sps:$4 sm:$0xff]  }
 0x6ad   :  { %6630 = vmatprep.subr.bf16.mxu1 %v7598_v52 }
 0x6b0   :  { %6631 = vmatpush3.bf16.msra.mxu1 %v7106_v55  ;;  %v7134_v55 = vld [vmem:[%s9029_s8 + $0x20] ss:$8 sps:$4 sm:$0xff]  }
 0x6b1   :  { %6632 = vmatprep.subr.bf16.mxu1 %v7598_v52 }
 0x6b4   :  { %6633 = vmatpush3.bf16.msra.mxu1 %v7110_v23  ;;  %v7139_v23 = vld [vmem:[%s9029_s8 + $0x14] ss:$8 sps:$4 sm:$0xff]  }
 0x6b5   :  { %6634 = vmatprep.subr.bf16.mxu1 %v7598_v52 }
 0x6b8   :  { %6635 = vmatpush3.bf16.msra.mxu1 %v7114_v24  ;;  %v7137_v24 = vld [vmem:[%s9029_s8 + $0x10] ss:$8 sps:$4 sm:$0xff]  }
 0x6b9   :  { %6636 = vmatprep.subr.bf16.mxu1 %v7598_v52 }
 0x6bc   :  { %6637 = vmatpush3.bf16.msra.mxu1 %v7118_v33  ;;  %v7148_v33 = vld [vmem:[%s9029_s8 + $0xf4] ss:$8 sps:$4 sm:$0xff]  }
 0x6bd   :  { %3612 = vmatprep.subr.bf16.mxu1 %v7145_v43  ;;  %v7179_v43 = vld [vmem:[%s9029_s8 + $0x110] ss:$8 sps:$4 sm:$0xff]  }
 0x75f   :  { %v2963_v12 = vpop.f32.mrf.mxu1 }
 0x761   :  { %v6620_v35 = vpop.f32.mrf.mxu1 }
 0x762   :  { %v8729_v35 = vadd.s32 256, %v8538_v17 }
 0x763   :  { %v2966_v36 = vpop.f32.mrf.mxu1 }
 0x764   :  { %v2970_v37 = vpack.c.bf16 %v2966_v36, %v2963_v12  ;;  %v7146_v12 = vld [vmem:[%s9029_s8 + $0xf0] ss:$8 sps:$4 sm:$0xff]   ;;  %vm166_vm11 = vcmp.lt.s32.totalorder %v8729_v35, 300  ;;  %v622_v35 = vld [vmem:[%s9033_s12] sm:$0x7] }
 0x765   :  { %v6621_v40 = vpop.f32.mrf.mxu1 }
 0x766   :  { %3132 = vmatmul.mubr.bf16.vlgmr.msra.gmra.mxu0 %v2970_v37  ;;  %6639 = vmatmul.mubr.bf16.vlgmr.msra.gmra.mxu1 %v2970_v37 }
 0x767   :  { %3644 = vmatprep.mubr.bf16.mxu1 %v7597_v1 }
 0x826   :  { %v3133_v46 = vpop.f32.mrf.mxu0  ;;  %v3176_v29 = vpop.f32.mrf.mxu1 }
 0x827   :  { %v3183_v57 = vadd.f32 %v3133_v46, %v8619_v8  ;;  %v3185_v26 = vadd.f32 %v3176_v29, %v8621_v10 }
 0x828   :  { %v3135_v48 = vpop.f32.mrf.mxu0  ;;  %v6640_v34 = vpop.f32.mrf.mxu1 }
 0x829   :  { %v3205_v50 = vadd.f32 %v3193_v45, %v3183_v57  ;;  %v3184_v51 = vadd.f32 %v3135_v48, %v8623_v41  ;;  %v3207_v5 = vadd.f32 %v3201_v25, %v3185_v26 }
 0x82a   :  { %v3137_v53 = vpop.f32.mrf.mxu0  ;;  %v3179_v54 = vpop.f32.mrf.mxu1 }
 0x82b   :  { %v3206_v56 = vadd.f32 %v3197_v47, %v3184_v51  ;;  %v3186_v58 = vadd.f32 %v3137_v53, %v8625_v19  ;;  %v3188_v59 = vadd.f32 %v3179_v54, %v8627_v20  ;;  %v3211_v10 = vadd.f32 %v3205_v50, %v7977_v21 }
 0x82c   :  { %v3139_v8 = vpop.f32.mrf.mxu0  ;;  %v6641_v60 = vpop.f32.mrf.mxu1  ;;  %v3213_v41 = vadd.f32 %v3207_v5, %v7838_v38  ;;  %v7121_v38 = vld [vmem:[%s9029_s8 + $0x74] ss:$8 sps:$4 sm:$0xff]  }
 0x82d   :  { %v3212_v61 = vadd.f32 %v3206_v56, %v7913_v63  ;;  %v3208_v62 = vadd.f32 %v3193_v45, %v3186_v58  ;;  %v3187_v2 = vadd.f32 %v3139_v8, %v8629_v11  ;;  %v3210_v16 = vadd.f32 %v3201_v25, %v3188_v59  ;;  %v7119_v63 = vld [vmem:[%s9029_s8 + $0x70] ss:$8 sps:$4 sm:$0xff]   ;;  %3569 = vmatprep.subr.bf16.mxu0 %v7121_v38  ;;  %v7151_v8 = vld [vmem:[%s9029_s8 + $0x164] ss:$8 sps:$4 sm:$0xff]   ;;  %v7149_v60 = vld [vmem:[%s9029_s8 + $0x160] ss:$8 sps:$4 sm:$0xff]  }
 0x82e   :  { %3570 = vmatpush1.bf16.msra.mxu0 %v7119_v63  ;;  %v7143_v11 = vld [vmem:[%s9029_s8 + $0x170] ss:$8 sps:$4 sm:$0xff]   ;;  %v7175_v63 = vld [vmem:[%s9029_s8 + $0x124] ss:$8 sps:$4 sm:$0xff]  }
 0x82f   :  { %v3209_v27 = vadd.f32 %v3197_v47, %v3187_v2  ;;  %v3217_v28 = vadd.f32 %v3212_v61, %v3211_v10  ;;  %v3214_v3 = vadd.f32 %v3208_v62, %v7979_v22  ;;  %v3216_v20 = vadd.f32 %v3210_v16, %v7840_v39  ;;  %v7124_v22 = vld [vmem:[%s9029_s8 + $0x64] ss:$8 sps:$4 sm:$0xff]   ;;  %v7122_v39 = vld [vmem:[%s9029_s8 + $0x60] ss:$8 sps:$4 sm:$0xff]   ;;  %3613 = vmatpush1.bf16.msra.mxu1 %v7143_v11  ;;  %v7157_v62 = vld [vmem:[%s9029_s8 + $0x154] ss:$8 sps:$4 sm:$0xff]  }
 0x830   :  { %3571 = vmatprep.subr.bf16.mxu0 %v7124_v22  ;;  %3614 = vmatprep.subr.bf16.mxu1 %v7151_v8  ;;  %v7155_v2 = vld [vmem:[%s9029_s8 + $0x150] ss:$8 sps:$4 sm:$0xff]   ;;  %v7160_v16 = vld [vmem:[%s9029_s8 + $0xd4] ss:$8 sps:$4 sm:$0xff]   ;;  %v7178_v38 = vld [vmem:[%s9029_s8 + $0xa4] ss:$8 sps:$4 sm:$0xff]  }
 0x831   :  { %v3215_v19 = vadd.f32 %v3209_v27, %v7915_v0  ;;  %v3218_v9 = vadd.f32 %v3217_v28, %v3213_v41  ;;  %v7127_v0 = vld [vmem:[%s9029_s8 + $0x54] ss:$8 sps:$4 sm:$0xff]   ;;  %v7158_v27 = vld [vmem:[%s9029_s8 + $0xd0] ss:$8 sps:$4 sm:$0xff]   ;;  %v7163_v28 = vld [vmem:[%s9029_s8 + $0x144] ss:$8 sps:$4 sm:$0xff]  }
 0x832   :  { %3572 = vmatpush1.bf16.msra.mxu0 %v7122_v39  ;;  %v7173_v22 = vld [vmem:[%s9029_s8 + $0x120] ss:$8 sps:$4 sm:$0xff]   ;;  %v7184_v11 = vld [vmem:[%s9029_s8 + $0x94] ss:$8 sps:$4 sm:$0xff]  }
 0x833   :  { %3219 = vadd.xlane.f32.xlu0 %v3218_v9  ;;  %v3221_v14 = vadd.f32 %v3215_v19, %v3214_v3  ;;  %3573 = vmatprep.subr.bf16.mxu0 %v7127_v0  ;;  %v7169_v9 = vld [vmem:[%s9029_s8 + $0x134] ss:$8 sps:$4 sm:$0xff]   ;;  %v7176_v39 = vld [vmem:[%s9029_s8 + $0xa0] ss:$8 sps:$4 sm:$0xff]  }
 0x834   :  { %3615 = vmatpush1.bf16.msra.mxu1 %v7149_v60  ;;  %v7181_v0 = vld [vmem:[%s9029_s8 + $0x114] ss:$8 sps:$4 sm:$0xff]  }
 0x835   :  { %v3222_v21 = vadd.f32 %v3221_v14, %v3216_v20  ;;  %3616 = vmatprep.subr.bf16.mxu1 %v7157_v62  ;;  %v7167_v14 = vld [vmem:[%s9029_s8 + $0x130] ss:$8 sps:$4 sm:$0xff]  }
 0x836   :  { %3574 = vmatpush1.bf16.msra.mxu0 %v7125_v4  ;;  %v7182_v4 = vld [vmem:[%s9029_s8 + $0x90] ss:$8 sps:$4 sm:$0xff]  }
 0x837   :  { %3223 = vadd.xlane.f32.xlu1 %v3222_v21  ;;  %3575 = vmatprep.subr.bf16.mxu0 %v7130_v6  ;;  %v7170_v21 = vld [vmem:[%s9029_s8 + $0xb0] ss:$8 sps:$4 sm:$0xff]   ;;  %v7187_v6 = vld [vmem:[%s9029_s8 + $0x104] ss:$8 sps:$4 sm:$0xff]  }
 0x838   :  { %3617 = vmatpush1.bf16.msra.mxu1 %v7155_v2 }
 0x839   :  { %3618 = vmatprep.subr.bf16.mxu1 %v7163_v28  ;;  %v7196_v28 = vld [vmem:[#allocation6 + $0x94] ss:$12 sps:$4 sm:$0xff]  }
 0x83a   :  { %3576 = vmatpush1.bf16.msra.mxu0 %v7128_v7  ;;  %v7190_v7 = vld [vmem:[%s9029_s8 + $0x84] ss:$8 sps:$4 sm:$0xff]  }
 0x83b   :  { %3577 = vmatprep.subr.bf16.mxu0 %v7133_v15  ;;  %v7185_v15 = vld [vmem:[%s9029_s8 + $0x100] ss:$8 sps:$4 sm:$0xff]  }
 0x83e   :  { %3578 = vmatpush1.bf16.msra.mxu0 %v7131_v18  ;;  %v7188_v18 = vld [vmem:[%s9029_s8 + $0x80] ss:$8 sps:$4 sm:$0xff]  }
 0x83f   :  { %3579 = vmatprep.subr.bf16.mxu0 %v7136_v49  ;;  %v7193_v49 = vld [vmem:[#allocation6 + $0xac] ss:$12 sps:$4 sm:$0xff]  }
 0x842   :  { %3580 = vmatpush1.bf16.msra.mxu0 %v7134_v55  ;;  %v7218_v55 = vld [vmem:[#allocation6 + $0x170] ss:$12 sps:$4 sm:$0xff]  }
 0x843   :  { %3581 = vmatprep.subr.bf16.mxu0 %v7139_v23 }
 0x846   :  { %3582 = vmatpush1.bf16.msra.mxu0 %v7137_v24 }
 0x847   :  { %3583 = vmatprep.subr.bf16.mxu0 %v7142_v31 }
 0x84a   :  { %3584 = vmatpush1.bf16.msra.mxu0 %v7140_v32 }
 0x84b   :  { %3585 = vmatprep.subr.bf16.mxu0 %v7148_v33 }
 0x84e   :  { %3586 = vmatpush2.bf16.msra.mxu0 %v7146_v12 }
 0x8bc   :  { %v3220_v36 = vpop.xlane.xlu0 %3219 }
 0x8bd   :  { %v3225_v37 = vmul.f32 0.0033333334, %v3220_v36  ;;  %v506_v36 = vld [vmem:[%s9027_s6] sm:$0x7] }
 0x8bf   :  { %v8732_v40 = vsub.f32 %v3211_v10, %v3225_v37  ;;  %v8734_v44 = vsub.f32 %v3212_v61, %v3225_v37  ;;  %v8736_v45 = vsub.f32 %v3213_v41, %v3225_v37  ;;  %v7154_v10 = vld [vmem:[%s9029_s8 + $0xe4] ss:$8 sps:$4 sm:$0xff]   ;;  %v7152_v61 = vld [vmem:[%s9029_s8 + $0xe0] ss:$8 sps:$4 sm:$0xff]  }
 0x8c0   :  { %v3224_v46 = vpop.xlane.xlu1 %3223  ;;  %3587 = vmatprep.subr.bf16.mxu0 %v7154_v10  ;;  %v7161_v41 = vld [vmem:[%s9029_s8 + $0x140] ss:$8 sps:$4 sm:$0xff]  }
 0x8c1   :  { %v3226_v29 = vmul.f32 0.0033333334, %v3224_v46  ;;  %v3241_v57 = vsel %vm166_vm11, %v8736_v45, 0.0  ;;  %v3245_v17 = vmul.f32 %v8732_v40, %v8732_v40  ;;  %v3246_v26 = vmul.f32 %v8734_v44, %v8734_v44  ;;  %3588 = vmatpush2.bf16.msra.mxu0 %v7152_v61  ;;  %3619 = vmatpush1.bf16.msra.mxu1 %v7161_v41  ;;  %v507_v46 = vld [vmem:[%s9028_s7] sm:$0x7] }
 0x8c2   :  { %v3247_v25 = vmul.f32 %v3241_v57, %v3241_v57  ;;  %3589 = vmatprep.subr.bf16.mxu0 %v7160_v16  ;;  %3620 = vmatprep.subr.bf16.mxu1 %v7169_v9  ;;  %v3279_v57 = vrot.slane %v506_v36, %v8476_v13  ;;  %v3297_v8 = vrot.slane %v507_v46, %v8495_v42  ;;  %v7223_v9 = vld [vmem:[#allocation6 + $0x158] ss:$12 sps:$4 sm:$0xff]  }
 0x8c3   :  { %v8745_v47 = vsub.f32 %v3214_v3, %v3226_v29  ;;  %v8747_v48 = vsub.f32 %v3215_v19, %v3226_v29  ;;  %v8749_v34 = vsub.f32 %v3216_v20, %v3226_v29  ;;  %v3251_v50 = vadd.f32 %v3246_v26, %v3245_v17  ;;  %v7164_v3 = vld [vmem:[%s9029_s8 + $0xc0] ss:$8 sps:$4 sm:$0xff]   ;;  %v7166_v19 = vld [vmem:[%s9029_s8 + $0xc4] ss:$8 sps:$4 sm:$0xff]   ;;  %v7172_v20 = vld [vmem:[%s9029_s8 + $0xb4] ss:$8 sps:$4 sm:$0xff]  }
 0x8c4   :  { %v3283_v26 = vrot.slane %v506_v36, %v8486_v30 }
 0x8c5   :  { %v3252_v51 = vadd.f32 %v3251_v50, %v3247_v25  ;;  %v3244_v53 = vsel %vm166_vm11, %v8749_v34, 0.0  ;;  %v3248_v54 = vmul.f32 %v8745_v47, %v8745_v47  ;;  %v3249_v5 = vmul.f32 %v8747_v48, %v8747_v48  ;;  %3590 = vmatpush2.bf16.msra.mxu0 %v7158_v27  ;;  %3621 = vmatpush1.bf16.msra.mxu1 %v7167_v14  ;;  %v7191_v27 = vld [vmem:[#allocation6 + $0xa8] ss:$12 sps:$4 sm:$0xff]  }
 0x8c6   :  { %v3250_v56 = vmul.f32 %v3244_v53, %v3244_v53  ;;  %3591 = vmatprep.subr.bf16.mxu0 %v7166_v19  ;;  %3622 = vmatprep.subr.bf16.mxu1 %v7175_v63  ;;  %v3275_v50 = vrot.slane %v506_v36, %v8495_v42  ;;  %v3301_v53 = vrot.slane %v507_v46, %v8476_v13  ;;  %v7199_v14 = vld [vmem:[#allocation6 + $0x7c] ss:$12 sps:$4 sm:$0xff]   ;;  %v7228_v63 = vld [vmem:[#allocation6 + $0x140] ss:$12 sps:$4 sm:$0xff]   ;;  %v7225_v36 = vld [vmem:[#allocation6 + $0x138] ss:$12 sps:$4 sm:$0xff]  }
 0x8c7   :  { %3253 = vadd.xlane.f32.xlu0 %v3252_v51  ;;  %v3255_v58 = vadd.f32 %v3249_v5, %v3248_v54  ;;  %v3305_v54 = vrot.slane %v507_v46, %v8486_v30  ;;  %v7230_v46 = vld [vmem:[#allocation6 + $0x120] ss:$12 sps:$4 sm:$0xff]  }
 0x8c9   :  { %v3256_v59 = vadd.f32 %v3255_v58, %v3250_v56  ;;  %3592 = vmatpush2.bf16.msra.mxu0 %v7164_v3  ;;  %3623 = vmatpush1.bf16.msra.mxu1 %v7173_v22  ;;  %v7219_v3 = vld [vmem:[#allocation6 + $0xb0] ss:$12 sps:$4 sm:$0xff]  }
 0x8ca   :  { %3593 = vmatprep.subr.bf16.mxu0 %v7172_v20  ;;  %3624 = vmatprep.subr.bf16.mxu1 %v7181_v0  ;;  %v7194_v20 = vld [vmem:[#allocation6 + $0x90] ss:$12 sps:$4 sm:$0xff]   ;;  %v7233_v0 = vld [vmem:[#allocation6 + $0x128] ss:$12 sps:$4 sm:$0xff]  }
 0x8cb   :  { %3257 = vadd.xlane.f32.xlu1 %v3256_v59  ;;  %v7202_v22 = vld [vmem:[#allocation6 + $0x64] ss:$12 sps:$4 sm:$0xff]  }
 0x8cd   :  { %3594 = vmatpush2.bf16.msra.mxu0 %v7170_v21  ;;  %3625 = vmatpush1.bf16.msra.mxu1 %v7179_v43  ;;  %v7224_v21 = vld [vmem:[#allocation6 + $0x98] ss:$12 sps:$4 sm:$0xff]  }
 0x8ce   :  { %3595 = vmatprep.subr.bf16.mxu0 %v7178_v38  ;;  %3626 = vmatprep.subr.bf16.mxu1 %v7187_v6  ;;  %v7197_v38 = vld [vmem:[#allocation6 + $0x78] ss:$12 sps:$4 sm:$0xff]   ;;  %v7203_v6 = vld [vmem:[#allocation6 + $0x48] ss:$12 sps:$4 sm:$0xff]  }
 0x8cf   :  { %v7205_v43 = vld [vmem:[#allocation6 + $0x4c] ss:$12 sps:$4 sm:$0xff]  }
 0x8d1   :  { %3596 = vmatpush2.bf16.msra.mxu0 %v7176_v39  ;;  %3627 = vmatpush1.bf16.msra.mxu1 %v7185_v15  ;;  %v7229_v39 = vld [vmem:[#allocation6 + $0x80] ss:$12 sps:$4 sm:$0xff]   ;;  %v7206_v15 = vld [vmem:[#allocation6 + $0x30] ss:$12 sps:$4 sm:$0xff]  }
 0x8d2   :  { %3597 = vmatprep.subr.bf16.mxu0 %v7184_v11  ;;  %3933 = vmatprep.subr.bf16.mxu1 %v7193_v49  ;;  %v7200_v11 = vld [vmem:[#allocation6 + $0x60] ss:$12 sps:$4 sm:$0xff]   ;;  %v7209_v49 = vld [vmem:[#allocation6 + $0x18] ss:$12 sps:$4 sm:$0xff]  }
 0x8d5   :  { %3598 = vmatpush2.bf16.msra.mxu0 %v7182_v4  ;;  %v7234_v4 = vld [vmem:[#allocation6 + $0x68] ss:$12 sps:$4 sm:$0xff]  }
 0x8d6   :  { %3599 = vmatprep.subr.bf16.mxu0 %v7190_v7  ;;  %v7208_v7 = vld [vmem:[#allocation6 + $0x34] ss:$12 sps:$4 sm:$0xff]  }
 0x8d9   :  { %3600 = vmatpush2.bf16.msra.mxu0 %v7188_v18  ;;  %v7211_v18 = vld [vmem:[#allocation6 + $0x1c] ss:$12 sps:$4 sm:$0xff]  }
 0x8da   :  { %6436 = vmatprep.subr.bf16.mxu0 %v7218_v55  ;;  %v7214_v55 = vld [vmem:[#allocation6 + $0x4] ss:$12 sps:$4 sm:$0xff]  }
 0x950   :  { %v3254_v23 = vpop.xlane.xlu0 %3253 }
 0x951   :  { %v3259_v24 = vmul.f32 0.0033333334, %v3254_v23  ;;  %v7212_v23 = vld [vmem:[#allocation6] ss:$12 sps:$4 sm:$0xff]  }
 0x953   :  { %v3261_v31 = vadd.f32 1e-05, %v3259_v24  ;;  %v7217_v24 = vld [vmem:[#allocation6 + $0x16c] ss:$12 sps:$4 sm:$0xff]  }
 0x954   :  { %v3258_v32 = vpop.xlane.xlu1 %3257 }
 0x955   :  { %7471 = vrsqrt.f32 %v3261_v31  ;;  %v3260_v33 = vmul.f32 0.0033333334, %v3258_v32  ;;  %v7215_v31 = vld [vmem:[#allocation6 + $0x168] ss:$12 sps:$4 sm:$0xff]  }
 0x956   :  { %v7222_v32 = vld [vmem:[#allocation6 + $0x154] ss:$12 sps:$4 sm:$0xff]  }
 0x957   :  { %v3262_v12 = vadd.f32 1e-05, %v3260_v33  ;;  %v7220_v33 = vld [vmem:[#allocation6 + $0x150] ss:$12 sps:$4 sm:$0xff]  }
 0x959   :  { %7473 = vrsqrt.f32 %v3262_v12  ;;  %v7227_v12 = vld [vmem:[#allocation6 + $0x13c] ss:$12 sps:$4 sm:$0xff]  }
 0x962   :  { %v7472_v37 = vpop.eup %7471 }
 0x963   :  { %v3266_v29 = vmul.f32 %v7472_v37, %v8734_v44  ;;  %v3267_v17 = vmul.f32 %v7472_v37, %v8736_v45  ;;  %v3265_v25 = vmul.f32 %v7472_v37, %v8732_v40  ;;  %v7232_v37 = vld [vmem:[#allocation6 + $0x124] ss:$12 sps:$4 sm:$0xff]  }
 0x965   :  { %v3288_v56 = vmul.f32 %v3279_v57, %v3266_v29  ;;  %v3289_v58 = vmul.f32 %v3283_v26, %v3267_v17  ;;  %v3287_v45 = vmul.f32 %v3275_v50, %v3265_v25  ;;  %v7237_v29 = vld [vmem:[#allocation6 + $0x10c] ss:$12 sps:$4 sm:$0xff]   ;;  %v7235_v17 = vld [vmem:[#allocation6 + $0x108] ss:$12 sps:$4 sm:$0xff]  }
 0x966   :  { %v7474_v51 = vpop.eup %7473  ;;  %v7242_v25 = vld [vmem:[#allocation6 + $0xf4] ss:$12 sps:$4 sm:$0xff]  }
 0x967   :  { %v3269_v5 = vmul.f32 %v7474_v51, %v8747_v48  ;;  %v3270_v44 = vmul.f32 %v7474_v51, %v8749_v34  ;;  %v3268_v59 = vmul.f32 %v7474_v51, %v8745_v47  ;;  %v8860_v61 = vadd.f32 %v3301_v53, %v3288_v56  ;;  %v7240_v51 = vld [vmem:[#allocation6 + $0xf0] ss:$12 sps:$4 sm:$0xff]   ;;  %v7245_v56 = vld [vmem:[#allocation6 + $0xd8] ss:$12 sps:$4 sm:$0xff]  }
 0x968   :  { %v8864_v2 = vadd.f32 %v3305_v54, %v3289_v58  ;;  %v8868_v48 = vadd.f32 %v3297_v8, %v3287_v45  ;;  %v7250_v58 = vld [vmem:[#allocation6 + $0xc0] ss:$12 sps:$4 sm:$0xff]   ;;  %v7253_v45 = vld [vmem:[#allocation6 + $0xc8] ss:$12 sps:$4 sm:$0xff]  }
 0x969   :  { %v3291_v60 = vmul.f32 %v3279_v57, %v3269_v5  ;;  %v3292_v40 = vmul.f32 %v3283_v26, %v3270_v44  ;;  %v3290_v10 = vmul.f32 %v3275_v50, %v3268_v59  ;;  %v7238_v57 = vld [vmem:[#allocation6 + $0x110] ss:$12 sps:$4 sm:$0xff]   ;;  %v7243_v50 = vld [vmem:[#allocation6 + $0xf8] ss:$12 sps:$4 sm:$0xff]   ;;  %v7248_v5 = vld [vmem:[#allocation6 + $0xe0] ss:$12 sps:$4 sm:$0xff]  }
 0x96a   :  { %v7239_v26 = vld [vmem:[#allocation6 + $0x50] ss:$12 sps:$4 sm:$0xff]   ;;  %v7249_v44 = vld [vmem:[#allocation6 + $0x20] ss:$12 sps:$4 sm:$0xff]  }
 0x96b   :  { %v8862_v62 = vadd.f32 %v3301_v53, %v3291_v60  ;;  %v8866_v16 = vadd.f32 %v3305_v54, %v3292_v40  ;;  %v8870_v34 = vadd.f32 %v3297_v8, %v3290_v10  ;;  %v7244_v53 = vld [vmem:[#allocation6 + $0x38] ss:$12 sps:$4 sm:$0xff]   ;;  %v7247_v54 = vld [vmem:[#allocation6 + $0xdc] ss:$12 sps:$4 sm:$0xff]  }
 0x96c   :  { %v7252_v59 = vld [vmem:[#allocation6 + $0xc4] ss:$12 sps:$4 sm:$0xff]   ;;  %v7254_v8 = vld [vmem:[#allocation6 + $0x8] ss:$12 sps:$4 sm:$0xff]   ;;  %v556_v60 = vld [vmem:[%s9030_s9] sm:$0x3] }
 0x96d   :  { %v3316_v47 = vpack.c.bf16 %v8862_v62, %v8860_v61  ;;  %v3317_v41 = vpack.c.bf16 %v8866_v16, %v8864_v2  ;;  %v3315_v19 = vpack.c.bf16 %v8870_v34, %v8868_v48  ;;  %v3326_v10 = vrot.slane %v556_v60, %v8476_v13 }
 0x96f   :  { %3601 = vmatprep.mubr.bf16.mxu0 %v3316_v47  ;;  %3645 = vmatmul.mubr.bf16.vlgmr.msra.gmra.mxu1 %v3317_v41 }
 0x970   :  { %3602 = vmatmul.mubr.bf16.vlgmr.msra.gmra.mxu0 %v3315_v19  ;;  %3934 = vmatpush1.bf16.msra.mxu1 %v7191_v27  ;;  %v3322_v27 = vrot.slane %v556_v60, %v8495_v42 }
 0x971   :  { %3935 = vmatprep.subr.bf16.mxu1 %v7196_v28  ;;  %6437 = vmatpush3.bf16.msra.mxu0 %v7219_v3 }
 0x972   :  { %6438 = vmatprep.subr.bf16.mxu0 %v7223_v9 }
 0x974   :  { %3936 = vmatpush1.bf16.msra.mxu1 %v7194_v20 }
 0x975   :  { %3937 = vmatprep.subr.bf16.mxu1 %v7199_v14  ;;  %6439 = vmatpush3.bf16.msra.mxu0 %v7224_v21 }
 0x976   :  { %6440 = vmatprep.subr.bf16.mxu0 %v7228_v63 }
 0x978   :  { %3938 = vmatpush1.bf16.msra.mxu1 %v7197_v38 }
 0x979   :  { %3939 = vmatprep.subr.bf16.mxu1 %v7202_v22  ;;  %6441 = vmatpush3.bf16.msra.mxu0 %v7229_v39 }
 0x97a   :  { %6442 = vmatprep.subr.bf16.mxu0 %v7233_v0 }
 0x97c   :  { %3940 = vmatpush1.bf16.msra.mxu1 %v7200_v11 }
 0x97d   :  { %3941 = vmatprep.subr.bf16.mxu1 %v7205_v43  ;;  %6443 = vmatpush3.bf16.msra.mxu0 %v7234_v4 }
 0x97e   :  { %6444 = vmatprep.subr.bf16.mxu0 %v7238_v57 }
 0x980   :  { %3942 = vmatpush1.bf16.msra.mxu1 %v7203_v6 }
 0x981   :  { %3943 = vmatprep.subr.bf16.mxu1 %v7208_v7  ;;  %6445 = vmatpush3.bf16.msra.mxu0 %v7239_v26 }
 0x982   :  { %6446 = vmatprep.subr.bf16.mxu0 %v7243_v50 }
 0x984   :  { %3944 = vmatpush1.bf16.msra.mxu1 %v7206_v15 }
 0x985   :  { %3945 = vmatprep.subr.bf16.mxu1 %v7211_v18  ;;  %6447 = vmatpush3.bf16.msra.mxu0 %v7244_v53 }
 0x986   :  { %6448 = vmatprep.subr.bf16.mxu0 %v7248_v5 }
 0x988   :  { %3946 = vmatpush1.bf16.msra.mxu1 %v7209_v49  ;;  %v621_v49 = vld [vmem:[%s9032_s11] sm:$0x7] }
 0x989   :  { %3947 = vmatprep.subr.bf16.mxu1 %v7214_v55  ;;  %6449 = vmatpush3.bf16.msra.mxu0 %v7249_v44  ;;  %v3665_v55 = vrot.slane %v621_v49, %v8495_v42 }
 0x98a   :  { %6450 = vmatprep.subr.bf16.mxu0 %v7253_v45 }
 0x98c   :  { %3948 = vmatpush1.bf16.msra.mxu1 %v7212_v23  ;;  %v3669_v23 = vrot.slane %v621_v49, %v8476_v13 }
 0x98d   :  { %3949 = vmatprep.subr.bf16.mxu1 %v7217_v24  ;;  %6451 = vmatpush3.bf16.msra.mxu0 %v7254_v8 }
 0x990   :  { %3950 = vmatpush2.bf16.msra.mxu1 %v7215_v31 }
 0x991   :  { %3951 = vmatprep.subr.bf16.mxu1 %v7222_v32  ;;  %v3673_v32 = vrot.slane %v621_v49, %v8486_v30  ;;  %v623_v49 = vld [vmem:[%s9034_s13] sm:$0x7] }
 0x994   :  { %3952 = vmatpush2.bf16.msra.mxu1 %v7220_v33 }
 0x995   :  { %3953 = vmatprep.subr.bf16.mxu1 %v7227_v12 }
 0x998   :  { %3954 = vmatpush2.bf16.msra.mxu1 %v7225_v36 }
 0x999   :  { %3955 = vmatprep.subr.bf16.mxu1 %v7232_v37 }
 0x99c   :  { %3956 = vmatpush2.bf16.msra.mxu1 %v7230_v46 }
 0x99d   :  { %3957 = vmatprep.subr.bf16.mxu1 %v7237_v29 }
 0x9a0   :  { %3958 = vmatpush2.bf16.msra.mxu1 %v7235_v17 }
 0x9a1   :  { %3959 = vmatprep.subr.bf16.mxu1 %v7242_v25 }
 0x9a4   :  { %3960 = vmatpush2.bf16.msra.mxu1 %v7240_v51 }
 0x9a5   :  { %3961 = vmatprep.subr.bf16.mxu1 %v7247_v54 }
 0x9a8   :  { %3962 = vmatpush2.bf16.msra.mxu1 %v7245_v56 }
 0x9a9   :  { %3963 = vmatprep.subr.bf16.mxu1 %v7252_v59 }
 0x9ac   :  { %3964 = vmatpush2.bf16.msra.mxu1 %v7250_v58 }
 0x9ad   :  { %6642 = vmatprep.subr.bf16.mxu1 %v7598_v52 }
 0xa2f   :  { %v3646_v40 = vpop.f32.mrf.mxu1 }
 0xa30   :  { %v3603_v47 = vpop.f32.mrf.mxu0 }
 0xa31   :  { %v3648_v41 = vpop.f32.mrf.mxu1  ;;  %v3604_v19 = vadd.f32 %v3603_v47, %v3322_v27 }
 0xa32   :  { %v3605_v28 = vpop.f32.mrf.mxu0 }
 0xa33   :  { %v3606_v3 = vadd.f32 %v3605_v28, %v3326_v10  ;;  %v3650_v9 = vpop.f32.mrf.mxu1  ;;  %v3647_v39 = vadd.f32 %v3646_v40, %v3604_v19 }
 0xa34   :  { %v3607_v20 = vpop.f32.mrf.mxu0 }
 0xa35   :  { %v3608_v14 = vadd.f32 %v3607_v20, %v3322_v27  ;;  %v3649_v63 = vadd.f32 %v3648_v41, %v3606_v3  ;;  %v3652_v0 = vpop.f32.mrf.mxu1  ;;  %v3655_v7 = vmax.f32 %v3647_v39, 0.0 }
 0xa36   :  { %v3609_v21 = vpop.f32.mrf.mxu0 }
 0xa37   :  { %v3651_v38 = vadd.f32 %v3650_v9, %v3608_v14  ;;  %v3610_v22 = vadd.f32 %v3609_v21, %v3326_v10  ;;  %v3656_v4 = vmax.f32 %v3649_v63, 0.0 }
 0xa39   :  { %v3653_v11 = vadd.f32 %v3652_v0, %v3610_v22  ;;  %v3657_v43 = vmax.f32 %v3651_v38, 0.0 }
 0xa3b   :  { %v3658_v6 = vmax.f32 %v3653_v11, 0.0  ;;  %v3659_v18 = vpack.c.bf16 %v3657_v43, %v3655_v7 }
 0xa3d   :  { %v3660_v15 = vpack.c.bf16 %v3658_v6, %v3656_v4 }
 0xa3f   :  { %3965 = vmatprep.mubr.bf16.mxu1 %v3660_v15  ;;  %4008 = vmatprep.mubr.bf16.mxu0 %v3660_v15 }
 0xa40   :  { %3966 = vmatmul.mubr.bf16.vlgmr.msra.gmra.mxu1 %v3659_v18  ;;  %4009 = vmatmul.mubr.bf16.vlgmr.msra.gmra.mxu0 %v3659_v18 }
 0xa41   :  { %6644 = vmatprep.mubr.msk.bf16.mxu1 %vm7599_vm0, %v7598_v52 }
 0xb00   :  { %v3967_v24 = vpop.f32.mrf.mxu1  ;;  %v6452_v31 = vpop.f32.mrf.mxu0 }
 0xb01   :  { %v3968_v33 = vadd.f32 %v3967_v24, %v3665_v55  ;;  %v4075_v24 = vrot.slane %v622_v35, %v8495_v42 }
 0xb02   :  { %v3969_v12 = vpop.f32.mrf.mxu1  ;;  %v6453_v36 = vpop.f32.mrf.mxu0 }
 0xb03   :  { %v3970_v37 = vadd.f32 %v3969_v12, %v3669_v23  ;;  %v6454_v46 = vadd.f32 %v6453_v36, %v6452_v31  ;;  %v4017_v50 = vadd.f32 %v3968_v33, %v8868_v48  ;;  %v4105_v33 = vrot.slane %v623_v49, %v8486_v30 }
 0xb04   :  { %v3971_v29 = vpop.f32.mrf.mxu1  ;;  %v6455_v57 = vpop.f32.mrf.mxu0  ;;  %v4097_v36 = vrot.slane %v623_v49, %v8495_v42 }
 0xb05   :  { %v4018_v17 = vadd.f32 %v3970_v37, %v8860_v61  ;;  %v4011_v26 = vadd.f32 %v6454_v46, %v3673_v32  ;;  %v3972_v25 = vadd.f32 %v3971_v29, %v3665_v55  ;;  %v4079_v55 = vrot.slane %v622_v35, %v8476_v13 }
 0xb06   :  { %v3973_v51 = vpop.f32.mrf.mxu1  ;;  %v6456_v53 = vpop.f32.mrf.mxu0 }
 0xb07   :  { %v3974_v54 = vadd.f32 %v3973_v51, %v3669_v23  ;;  %v6457_v5 = vadd.f32 %v6456_v53, %v6455_v57  ;;  %v4019_v56 = vadd.f32 %v4011_v26, %v8864_v2  ;;  %v4023_v44 = vadd.f32 %v4018_v17, %v4017_v50 }
 0xb08   :  { %v4020_v58 = vadd.f32 %v3972_v25, %v8870_v34  ;;  %v4083_v23 = vrot.slane %v622_v35, %v8486_v30  ;;  %v7255_v35 = vld [vmem:[#allocation9 + $0xa8] ss:$12 sps:$4 sm:$0xff]  }
 0xb09   :  { %v4021_v59 = vadd.f32 %v3974_v54, %v8862_v62  ;;  %v4014_v45 = vadd.f32 %v6457_v5, %v3673_v32  ;;  %v4024_v8 = vadd.f32 %v4023_v44, %v4019_v56  ;;  %v4101_v32 = vrot.slane %v623_v49, %v8476_v13  ;;  %v7279_v49 = vld [vmem:[#allocation9 + $0x228] ss:$12 sps:$4 sm:$0xff]  }
 0xb0b   :  { %v4022_v60 = vadd.f32 %v4014_v45, %v8866_v16  ;;  %v4027_v61 = vadd.f32 %v4021_v59, %v4020_v58  ;;  %4025 = vadd.xlane.f32.xlu1 %v4024_v8 }
 0xb0d   :  { %v4028_v40 = vadd.f32 %v4027_v61, %v4022_v60 }
 0xb0f   :  { %4029 = vadd.xlane.f32.xlu0 %v4028_v40 }
 0xb94   :  { %v4026_v48 = vpop.xlane.xlu1 %4025 }
 0xb95   :  { %v4031_v10 = vmul.f32 0.0033333334, %v4026_v48 }
 0xb97   :  { %v4033_v27 = vsub.f32 %v4017_v50, %v4031_v10  ;;  %v4034_v47 = vsub.f32 %v4018_v17, %v4031_v10  ;;  %v4035_v41 = vsub.f32 %v4019_v56, %v4031_v10 }
 0xb98   :  { %v4030_v28 = vpop.xlane.xlu0 %4029 }
 0xb99   :  { %v4032_v2 = vmul.f32 0.0033333334, %v4030_v28  ;;  %v4041_v34 = vsel %vm166_vm11, %v4035_v41, 0.0  ;;  %v4045_v3 = vmul.f32 %v4033_v27, %v4033_v27  ;;  %v4046_v62 = vmul.f32 %v4034_v47, %v4034_v47 }
 0xb9a   :  { %v4047_v16 = vmul.f32 %v4041_v34, %v4041_v34 }
 0xb9b   :  { %v4036_v19 = vsub.f32 %v4020_v58, %v4032_v2  ;;  %v4037_v9 = vsub.f32 %v4021_v59, %v4032_v2  ;;  %v4038_v20 = vsub.f32 %v4022_v60, %v4032_v2  ;;  %v4051_v14 = vadd.f32 %v4046_v62, %v4045_v3 }
 0xb9d   :  { %v4044_v21 = vsel %vm166_vm11, %v4038_v20, 0.0  ;;  %v4048_v63 = vmul.f32 %v4036_v19, %v4036_v19  ;;  %v4049_v38 = vmul.f32 %v4037_v9, %v4037_v9  ;;  %v4052_v22 = vadd.f32 %v4051_v14, %v4047_v16 }
 0xb9e   :  { %v4050_v39 = vmul.f32 %v4044_v21, %v4044_v21 }
 0xb9f   :  { %v4055_v0 = vadd.f32 %v4049_v38, %v4048_v63  ;;  %4053 = vadd.xlane.f32.xlu1 %v4052_v22 }
 0xba1   :  { %v4056_v11 = vadd.f32 %v4055_v0, %v4050_v39 }
 0xba3   :  { %4057 = vadd.xlane.f32.xlu0 %v4056_v11 }
 0xc28   :  { %v4054_v43 = vpop.xlane.xlu1 %4053 }
 0xc29   :  { %v4059_v4 = vmul.f32 0.0033333334, %v4054_v43 }
 0xc2b   :  { %v4061_v6 = vadd.f32 1e-05, %v4059_v4 }
 0xc2c   :  { %v4058_v7 = vpop.xlane.xlu0 %4057 }
 0xc2d   :  { %v4060_v15 = vmul.f32 0.0033333334, %v4058_v7  ;;  %7475 = vrsqrt.f32 %v4061_v6 }
 0xc2f   :  { %v4062_v18 = vadd.f32 1e-05, %v4060_v15  ;;  %v7257_v15 = vld [vmem:[#allocation9 + $0xac] ss:$12 sps:$4 sm:$0xff]  }
 0xc31   :  { %7477 = vrsqrt.f32 %v4062_v18  ;;  %v7281_v18 = vld [vmem:[#allocation9 + $0x22c] ss:$12 sps:$4 sm:$0xff]  }
 0xc3a   :  { %v7476_v31 = vpop.eup %7475 }
 0xc3b   :  { %v4066_v12 = vmul.f32 %v7476_v31, %v4034_v47  ;;  %v4067_v37 = vmul.f32 %v7476_v31, %v4035_v41  ;;  %v4065_v46 = vmul.f32 %v7476_v31, %v4033_v27  ;;  %v7258_v31 = vld [vmem:[#allocation9 + $0x90] ss:$12 sps:$4 sm:$0xff]  }
 0xc3d   :  { %v4088_v57 = vmul.f32 %v4079_v55, %v4066_v12  ;;  %v4089_v17 = vmul.f32 %v4083_v23, %v4067_v37  ;;  %v4087_v26 = vmul.f32 %v4075_v24, %v4065_v46  ;;  %v7293_v12 = vld [vmem:[#allocation9 + $0x1fc] ss:$12 sps:$4 sm:$0xff]   ;;  %v7291_v37 = vld [vmem:[#allocation9 + $0x1f8] ss:$12 sps:$4 sm:$0xff]  }
 0xc3e   :  { %v7478_v29 = vpop.eup %7477  ;;  %v7266_v46 = vld [vmem:[#allocation9 + $0x64] ss:$12 sps:$4 sm:$0xff]  }
 0xc3f   :  { %v4069_v25 = vmul.f32 %v7478_v29, %v4037_v9  ;;  %v4070_v50 = vmul.f32 %v7478_v29, %v4038_v20  ;;  %v4068_v51 = vmul.f32 %v7478_v29, %v4036_v19  ;;  %v8914_v53 = vadd.f32 %v4101_v32, %v4088_v57  ;;  %v7299_v29 = vld [vmem:[#allocation9 + $0x1e4] ss:$12 sps:$4 sm:$0xff]   ;;  %v7264_v57 = vld [vmem:[#allocation9 + $0x60] ss:$12 sps:$4 sm:$0xff]  }
 0xc40   :  { %v8916_v54 = vadd.f32 %v4105_v33, %v4089_v17  ;;  %v8918_v5 = vadd.f32 %v4097_v36, %v4087_v26  ;;  %v7297_v17 = vld [vmem:[#allocation9 + $0x1e0] ss:$12 sps:$4 sm:$0xff]  }
 0xc41   :  { %v4091_v56 = vmul.f32 %v4079_v55, %v4069_v25  ;;  %v4092_v44 = vmul.f32 %v4083_v23, %v4070_v50  ;;  %v4090_v58 = vmul.f32 %v4075_v24, %v4068_v51  ;;  %v4116_v59 = vpack.c.bf16 %v8914_v53, %v8914_v53  ;;  %v7260_v55 = vld [vmem:[#allocation9 + $0x94] ss:$12 sps:$4 sm:$0xff]   ;;  %v7269_v26 = vld [vmem:[#allocation9 + $0x4c] ss:$12 sps:$4 sm:$0xff]   ;;  %v7270_v51 = vld [vmem:[#allocation9 + $0x30] ss:$12 sps:$4 sm:$0xff]  }
 0xc42   :  { %v4117_v45 = vpack.c.bf16 %v8916_v54, %v8916_v54  ;;  %v4115_v8 = vpack.c.bf16 %v8918_v5, %v8918_v5  ;;  %v7287_v23 = vld [vmem:[#allocation9 + $0x214] ss:$12 sps:$4 sm:$0xff]  }
 0xc43   :  { %v8926_v60 = vadd.f32 %v4101_v32, %v4091_v56  ;;  %v8928_v61 = vadd.f32 %v4105_v33, %v4092_v44  ;;  %v8930_v40 = vadd.f32 %v4097_v36, %v4090_v58  ;;  %4153 = vmatprep.mubr.bf16.mxu0 %v4116_v59  ;;  %v7285_v32 = vld [vmem:[#allocation9 + $0x210] ss:$12 sps:$4 sm:$0xff]   ;;  %v7261_v36 = vld [vmem:[#allocation9 + $0x78] ss:$12 sps:$4 sm:$0xff]   ;;  %v7267_v25 = vld [vmem:[#allocation9 + $0x48] ss:$12 sps:$4 sm:$0xff]  }
 0xc44   :  { %v4330_v48 = vsel %vm4328_vm12, %v4115_v8, 0  ;;  %v4336_v10 = vsel %vm4328_vm12, %v4117_v45, 0  ;;  %v7263_v33 = vld [vmem:[#allocation9 + $0x7c] ss:$12 sps:$4 sm:$0xff]   ;;  %v7272_v50 = vld [vmem:[#allocation9 + $0x34] ss:$12 sps:$4 sm:$0xff]  }
 0xc45   :  { %v4119_v27 = vpack.c.bf16 %v8926_v60, %v8926_v60  ;;  %v4120_v47 = vpack.c.bf16 %v8928_v61, %v8928_v61  ;;  %v4118_v41 = vpack.c.bf16 %v8930_v40, %v8930_v40  ;;  %v7275_v56 = vld [vmem:[#allocation9 + $0x1c] ss:$12 sps:$4 sm:$0xff]   ;;  %v7273_v44 = vld [vmem:[#allocation9 + $0x18] ss:$12 sps:$4 sm:$0xff]  }
 0xc46   :  { %v7278_v58 = vld [vmem:[#allocation9 + $0x4] ss:$12 sps:$4 sm:$0xff]  }
 0xc47   :  { %4135 = vmatprep.subr.bf16.mxu0 %v4119_v27  ;;  %6643 = vmatpush3.bf16.xpose.msra.mxu1 %v4120_v47  ;;  %v4225_v28 = vsel %vm4217_vm13, %v4120_v47, 0  ;;  %v4219_v2 = vsel %vm4217_vm13, %v4118_v41, 0  ;;  %v7294_v47 = vld [vmem:[#allocation9 + $0x138] ss:$12 sps:$4 sm:$0xff]  }
 0xc48   :  { %4136 = vmatpush1.bf16.xpose.msra.mxu0 %v4118_v41  ;;  %6648 = vmatprep.subr.bf16.mxu1 %v7598_v52  ;;  %v7302_v41 = vld [vmem:[#allocation9 + $0x124] ss:$12 sps:$4 sm:$0xff]  }
 0xc49   :  { %6216 = vmatprep.subr.msk.bf16.mxu0 %vm4217_vm13, %v4119_v27  ;;  %v7296_v27 = vld [vmem:[#allocation9 + $0x13c] ss:$12 sps:$4 sm:$0xff]  }
 0xc4e   :  { %6645 = vmatmul.mubr.bf16.vlgmr.msra.gmra.mxu1 %v4117_v45  ;;  %v7284_v45 = vld [vmem:[#allocation9 + $0x16c] ss:$12 sps:$4 sm:$0xff]  }
 0xc4f   :  { %4154 = vmatmul.mubr.bf16.vlgmr.msra.gmra.mxu0 %v4115_v8  ;;  %6649 = vmatpush3.bf16.msra.mxu1 %v4225_v28  ;;  %v7282_v8 = vld [vmem:[#allocation9 + $0x168] ss:$12 sps:$4 sm:$0xff]   ;;  %v7300_v28 = vld [vmem:[#allocation9 + $0x120] ss:$12 sps:$4 sm:$0xff]  }
 0xc50   :  { %4242 = vmatpush1.bf16.msra.mxu0 %v4219_v2  ;;  %4259 = vmatprep.mubr.bf16.mxu0 %v7597_v1  ;;  %v7305_v2 = vld [vmem:[#allocation9 + $0x1cc] ss:$12 sps:$4 sm:$0xff]  }
 0xc51   :  { %6219 = vmatprep.subr.msk.bf16.mxu0 %vm4328_vm12, %v4116_v59  ;;  %6650 = vmatprep.mubr.msk.bf16.mxu1 %vm7599_vm0, %v7598_v52  ;;  %v7276_v59 = vld [vmem:[#allocation9] ss:$12 sps:$4 sm:$0xff]  }
 0xc52   :  { %6654 = vmatprep.subr.bf16.mxu1 %v7598_v52 }
 0xd0e   :  { %v4195_v34 = vpop.f32.mrf.mxu1 }
 0xd0f   :  { %v4155_v3 = vpop.f32.mrf.mxu0 }
 0xd10   :  { %v4196_v62 = vadd.f32 %v4195_v34, %v4155_v3  ;;  %v6646_v19 = vpop.f32.mrf.mxu1  ;;  %v7303_v34 = vld [vmem:[#allocation9 + $0x1c8] ss:$12 sps:$4 sm:$0xff]   ;;  %v7308_v3 = vld [vmem:[#allocation9 + $0x10c] ss:$12 sps:$4 sm:$0xff]  }
 0xd11   :  { %v4157_v9 = vpop.f32.mrf.mxu0  ;;  %v7311_v19 = vld [vmem:[#allocation9 + $0x1b4] ss:$12 sps:$4 sm:$0xff]  }
 0xd12   :  { %v4198_v20 = vpop.f32.mrf.mxu1  ;;  %v4202_v16 = vsel %vm4201_vm14, %v4196_v62, -inf  ;;  %v7309_v9 = vld [vmem:[#allocation9 + $0x1b0] ss:$12 sps:$4 sm:$0xff]  }
 0xd13   :  { %4203 = vmax.xlane.f32.xlu0 %v4202_v16  ;;  %v4158_v14 = vpop.f32.mrf.mxu0  ;;  %v7314_v20 = vld [vmem:[#allocation9 + $0xf4] ss:$12 sps:$4 sm:$0xff]   ;;  %v7312_v16 = vld [vmem:[#allocation9 + $0xf0] ss:$12 sps:$4 sm:$0xff]  }
 0xd14   :  { %v6647_v21 = vpop.f32.mrf.mxu1  ;;  %v7317_v14 = vld [vmem:[#allocation9 + $0x19c] ss:$12 sps:$4 sm:$0xff]  }
 0xd15   :  { %v4159_v63 = vpop.f32.mrf.mxu0  ;;  %v7315_v21 = vld [vmem:[#allocation9 + $0x198] ss:$12 sps:$4 sm:$0xff]  }
 0xd16   :  { %v7320_v63 = vld [vmem:[#allocation9 + $0xdc] ss:$12 sps:$4 sm:$0xff]  }
 0xd9c   :  { %v4204_v38 = vpop.xlane.xlu0 %4203 }
 0xd9d   :  { %v4205_v22 = vsub.f32 %v4196_v62, %v4204_v38  ;;  %v7306_v62 = vld [vmem:[#allocation9 + $0x108] ss:$12 sps:$4 sm:$0xff]   ;;  %v7318_v38 = vld [vmem:[#allocation9 + $0xd8] ss:$12 sps:$4 sm:$0xff]  }
 0xd9f   :  { %v4206_v39 = vmul.f32 1.442695, %v4205_v22  ;;  %v7323_v22 = vld [vmem:[#allocation9 + $0x184] ss:$12 sps:$4 sm:$0xff]  }
 0xda1   :  { %7479 = vpow2.f32 %v4206_v39  ;;  %v7321_v39 = vld [vmem:[#allocation9 + $0x180] ss:$12 sps:$4 sm:$0xff]  }
 0xdae   :  { %v7480_v0 = vpop.eup %7479 }
 0xdaf   :  { %v4208_v11 = vsel %vm4201_vm14, %v7480_v0, 0.0 }
 0xdb0   :  { %4209 = vadd.xlane.f32.xlu1 %v4208_v11  ;;  %v7324_v11 = vld [vmem:[#allocation9 + $0xc0] ss:$12 sps:$4 sm:$0xff]  }
 0xe39   :  { %v4210_v43 = vpop.xlane.xlu1 %4209 }
 0xe3a   :  { %7481 = vrcp.f32 %v4210_v43  ;;  %v7327_v43 = vld [vmem:[#allocation9 + $0x170] ss:$12 sps:$4 sm:$0xff]  }
 0xe47   :  { %v7482_v4 = vpop.eup %7481 }
 0xe48   :  { %v4212_v6 = vmul.f32 %v7482_v4, %v7480_v0  ;;  %v7326_v0 = vld [vmem:[#allocation9 + $0xc4] ss:$12 sps:$4 sm:$0xff]  }
 0xe4a   :  { %v4213_v7 = vpack.c.bf16 %v4212_v6, %v4212_v6 }
 0xe4c   :  { %4308 = vxpose.xlu0.c.b16.start.end [1/1] (short) (narrow) %v4213_v7, 16  ;;  %6217 = vmatmul.mubr.msk.bf16.vlgmr.msra.gmra.mxu0 %vm4201_vm14, %v4213_v7 }
 0xe4d   :  { %6651 = vmatmul.mubr.msk.bf16.vlgmr.msra.gmra.mxu1 %vm4201_vm14, %v4213_v7  ;;  %4353 = vmatpush1.bf16.msra.mxu0 %v4330_v48  ;;  %v7290_v48 = vld [vmem:[#allocation9 + $0x154] ss:$12 sps:$4 sm:$0xff]  }
 0xe4e   :  { %6655 = vmatpush3.bf16.msra.mxu1 %v4336_v10  ;;  %4370 = vmatprep.mubr.bf16.mxu0 %v7597_v1  ;;  %v7288_v10 = vld [vmem:[#allocation9 + $0x150] ss:$12 sps:$4 sm:$0xff]  }
 0xe4f   :  { %6656 = vmatprep.mubr.msk.bf16.mxu1 %vm7599_vm0, %v7598_v52  ;;  %5047 = vmatprep.subr.bf16.mxu0 %v7257_v15 }
 0xe50   :  { %5088 = vmatprep.subr.bf16.mxu1 %v7281_v18 }
 0xeae   :  { %v4316_v24 = vpop.trf.xlu0 }
 0xeaf   :  { %6220 = vmatmul.mubr.msk.bf16.vlgmr.msra.gmra.mxu0 %vm4324_vm15, %v4316_v24  ;;  %6657 = vmatmul.mubr.msk.bf16.vlgmr.msra.gmra.mxu1 %vm4324_vm15, %v4316_v24 }
 0xeb0   :  { %5048 = vmatpush1.bf16.msra.mxu0 %v7255_v35  ;;  %5089 = vmatpush1.bf16.msra.mxu1 %v7279_v49 }
 0xeb1   :  { %5049 = vmatprep.subr.bf16.mxu0 %v7260_v55  ;;  %5090 = vmatprep.subr.bf16.mxu1 %v7287_v23 }
 0xeb2   :  { %5120 = vmatprep.mubr.bf16.mxu1 %v7597_v1 }
 0xeb4   :  { %5050 = vmatpush1.bf16.msra.mxu0 %v7258_v31  ;;  %5091 = vmatpush1.bf16.msra.mxu1 %v7285_v32 }
 0xeb5   :  { %5051 = vmatprep.subr.bf16.mxu0 %v7263_v33  ;;  %5092 = vmatprep.subr.bf16.mxu1 %v7293_v12 }
 0xeb8   :  { %5052 = vmatpush1.bf16.msra.mxu0 %v7261_v36  ;;  %5093 = vmatpush1.bf16.msra.mxu1 %v7291_v37 }
 0xeb9   :  { %5053 = vmatprep.subr.bf16.mxu0 %v7266_v46  ;;  %5094 = vmatprep.subr.bf16.mxu1 %v7299_v29 }
 0xebc   :  { %5054 = vmatpush1.bf16.msra.mxu0 %v7264_v57  ;;  %5095 = vmatpush1.bf16.msra.mxu1 %v7297_v17 }
 0xebd   :  { %5055 = vmatprep.subr.bf16.mxu0 %v7269_v26  ;;  %5096 = vmatprep.subr.bf16.mxu1 %v7305_v2  ;;  %v7328_v2 = vld [vmem:[#allocation9 + $0xb0] ss:$12 sps:$4 sm:$0xff]  }
 0xec0   :  { %5056 = vmatpush1.bf16.msra.mxu0 %v7267_v25  ;;  %5097 = vmatpush1.bf16.msra.mxu1 %v7303_v34 }
 0xec1   :  { %5057 = vmatprep.subr.bf16.mxu0 %v7272_v50  ;;  %5098 = vmatprep.subr.bf16.mxu1 %v7311_v19 }
 0xec4   :  { %5058 = vmatpush1.bf16.msra.mxu0 %v7270_v51  ;;  %5099 = vmatpush1.bf16.msra.mxu1 %v7309_v9  ;;  %v7330_v9 = vld [vmem:[#allocation9 + $0x230] ss:$12 sps:$4 sm:$0xff]  }
 0xec5   :  { %5059 = vmatprep.subr.bf16.mxu0 %v7275_v56  ;;  %5100 = vmatprep.subr.bf16.mxu1 %v7317_v14  ;;  %v7332_v14 = vld [vmem:[#allocation9 + $0x140] ss:$12 sps:$4 sm:$0xff]  }
 0xec8   :  { %5060 = vmatpush1.bf16.msra.mxu0 %v7273_v44  ;;  %5101 = vmatpush1.bf16.msra.mxu1 %v7315_v21 }
 0xec9   :  { %5061 = vmatprep.subr.bf16.mxu0 %v7278_v58  ;;  %5102 = vmatprep.subr.bf16.mxu1 %v7323_v22  ;;  %v7335_v22 = vld [vmem:[#allocation9 + $0x128] ss:$12 sps:$4 sm:$0xff]  }
 0xecc   :  { %5062 = vmatpush1.bf16.msra.mxu0 %v7276_v59  ;;  %5103 = vmatpush1.bf16.msra.mxu1 %v7321_v39 }
 0xecd   :  { %5063 = vmatprep.subr.bf16.mxu0 %v7284_v45  ;;  %6464 = vmatprep.subr.bf16.mxu1 %v7327_v43 }
 0xed0   :  { %5064 = vmatpush2.bf16.msra.mxu0 %v7282_v8 }
 0xed1   :  { %5065 = vmatprep.subr.bf16.mxu0 %v7290_v48 }
 0xed4   :  { %5066 = vmatpush2.bf16.msra.mxu0 %v7288_v10 }
 0xed5   :  { %5067 = vmatprep.subr.bf16.mxu0 %v7296_v27 }
 0xed8   :  { %5068 = vmatpush2.bf16.msra.mxu0 %v7294_v47 }
 0xed9   :  { %5069 = vmatprep.subr.bf16.mxu0 %v7302_v41 }
 0xedc   :  { %5070 = vmatpush2.bf16.msra.mxu0 %v7300_v28 }
 0xedd   :  { %5071 = vmatprep.subr.bf16.mxu0 %v7308_v3 }
 0xee0   :  { %5072 = vmatpush2.bf16.msra.mxu0 %v7306_v62  ;;  %v7329_v62 = vld [vmem:[#allocation9 + $0x158] ss:$12 sps:$4 sm:$0xff]  }
 0xee1   :  { %5073 = vmatprep.subr.bf16.mxu0 %v7314_v20 }
 0xee4   :  { %5074 = vmatpush2.bf16.msra.mxu0 %v7312_v16  ;;  %v7331_v16 = vld [vmem:[#allocation9 + $0x98] ss:$12 sps:$4 sm:$0xff]  }
 0xee5   :  { %5075 = vmatprep.subr.bf16.mxu0 %v7320_v63  ;;  %v7333_v63 = vld [vmem:[#allocation9 + $0x218] ss:$12 sps:$4 sm:$0xff]  }
 0xee8   :  { %5076 = vmatpush2.bf16.msra.mxu0 %v7318_v38  ;;  %v7334_v38 = vld [vmem:[#allocation9 + $0x80] ss:$12 sps:$4 sm:$0xff]  }
 0xee9   :  { %5077 = vmatprep.subr.bf16.mxu0 %v7326_v0  ;;  %v7336_v0 = vld [vmem:[#allocation9 + $0x200] ss:$12 sps:$4 sm:$0xff]  }
 0xeec   :  { %5078 = vmatpush2.bf16.msra.mxu0 %v7324_v11  ;;  %v7338_v11 = vld [vmem:[#allocation9 + $0x110] ss:$12 sps:$4 sm:$0xff]  }
 0xeed   :  { %6660 = vmatprep.subr.bf16.mxu0 %v7598_v52 }
 0xf0c   :  { %v8955_v4 = vpop.f32.mrf.mxu0 }
 0xf0d   :  { %v8957_v6 = vpop.f32.mrf.mxu1 }
 0xf0e   :  { %v4263_v7 = vpop.f32.mrf.mxu0 }
 0xf0f   :  { %v6652_v15 = vpop.f32.mrf.mxu1  ;;  %v4420_v21 = vmax.f32 %v8914_v53, %v4263_v7  ;;  %v7337_v53 = vld [vmem:[#allocation9 + $0x68] ss:$12 sps:$4 sm:$0xff]  }
 0xf10   :  { %v4265_v18 = vpop.f32.mrf.mxu0  ;;  %v7339_v7 = vld [vmem:[#allocation9 + $0x1e8] ss:$12 sps:$4 sm:$0xff]   ;;  %v7340_v15 = vld [vmem:[#allocation9 + $0x50] ss:$12 sps:$4 sm:$0xff]  }
 0xf11   :  { %v4305_v35 = vpop.f32.mrf.mxu1  ;;  %v4428_v39 = vrot.slane %v4420_v21, 4  ;;  %v7341_v18 = vld [vmem:[#allocation9 + $0xf8] ss:$12 sps:$4 sm:$0xff]  }
 0xf12   :  { %v4266_v49 = vpop.f32.mrf.mxu0 }
 0xf13   :  { %v6653_v55 = vpop.f32.mrf.mxu1  ;;  %v4429_v43 = vadd.f32 %v4428_v39, %v4420_v21  ;;  %v7342_v49 = vld [vmem:[#allocation9 + $0x1d0] ss:$12 sps:$4 sm:$0xff]  }
 0xf14   :  { %v7343_v55 = vld [vmem:[#allocation9 + $0x38] ss:$12 sps:$4 sm:$0xff]  }
 0xf15   :  { %v4430_v35 = vrot.slane %v4429_v43, 2  ;;  %v7395_v21 = vld [vmem:[#allocation8 + $0x4] ss:$12 sps:$4 sm:$0xff]  }
 0xf16   :  { %v7398_v39 = vld [vmem:[#allocation8 + $0x184] ss:$12 sps:$4 sm:$0xff]  }
 0xf6f   :  { %v4372_v23 = vpop.f32.mrf.mxu0  ;;  %v4413_v24 = vpop.f32.mrf.mxu1 }
 0xf70   :  { %v4440_v31 = vmax.f32 %v8930_v40, %v4372_v23  ;;  %v4442_v32 = vmax.f32 %v8928_v61, %v4413_v24  ;;  %v7344_v23 = vld [vmem:[#allocation9 + $0xe0] ss:$12 sps:$4 sm:$0xff]   ;;  %v4431_v24 = vadd.f32 %v4430_v35, %v4429_v43  ;;  %v7399_v43 = vld [vmem:[#allocation8 + $0x168] ss:$12 sps:$4 sm:$0xff]  }
 0xf71   :  { %v4374_v33 = vpop.f32.mrf.mxu0  ;;  %v6658_v12 = vpop.f32.mrf.mxu1 }
 0xf72   :  { %v4444_v36 = vsel %vm4443_vm1, %v4440_v31, 0.0  ;;  %v4458_v37 = vsel %vm4443_vm1, %v4442_v32, 0.0  ;;  %v4441_v46 = vmax.f32 %v8926_v60, %v4374_v33  ;;  %v7345_v31 = vld [vmem:[#allocation9 + $0x1b8] ss:$12 sps:$4 sm:$0xff]   ;;  %v7346_v32 = vld [vmem:[#allocation9 + $0x20] ss:$12 sps:$4 sm:$0xff]  }
 0xf73   :  { %v4445_v29 = vrot.slane %v4444_v36, 4  ;;  %v4459_v57 = vrot.slane %v4458_v37, 4  ;;  %v4376_v17 = vpop.f32.mrf.mxu0  ;;  %v4416_v26 = vpop.f32.mrf.mxu1  ;;  %v7347_v33 = vld [vmem:[#allocation9 + $0xc8] ss:$12 sps:$4 sm:$0xff]   ;;  %v4432_v12 = vrot.slane %v4431_v24, 1 }
 0xf74   :  { %v4451_v25 = vsel %vm4443_vm1, %v4441_v46, 0.0  ;;  %v7353_v46 = vld [vmem:[#allocation8 + $0xac] ss:$12 sps:$4 sm:$0xff]   ;;  %v7351_v17 = vld [vmem:[#allocation8 + $0xa8] ss:$12 sps:$4 sm:$0xff]  }
 0xf75   :  { %v4446_v50 = vadd.f32 %v4445_v29, %v4444_v36  ;;  %v4460_v51 = vadd.f32 %v4459_v57, %v4458_v37  ;;  %v4452_v56 = vrot.slane %v4451_v25, 4  ;;  %v4377_v44 = vpop.f32.mrf.mxu0  ;;  %v6659_v58 = vpop.f32.mrf.mxu1  ;;  %v7348_v36 = vld [vmem:[#allocation9 + $0x1a0] ss:$12 sps:$4 sm:$0xff]   ;;  %v7349_v37 = vld [vmem:[#allocation9 + $0x8] ss:$12 sps:$4 sm:$0xff]   ;;  %v4433_v29 = vadd.f32 %v4432_v12, %v4431_v24 }
 0xf76   :  { %v7350_v57 = vld [vmem:[#allocation9 + $0x188] ss:$12 sps:$4 sm:$0xff]   ;;  %v7356_v26 = vld [vmem:[#allocation8 + $0x22c] ss:$12 sps:$4 sm:$0xff]  }
 0xf77   :  { %v4447_v59 = vrot.slane %v4446_v50, 2  ;;  %v4461_v40 = vrot.slane %v4460_v51, 2  ;;  %v4453_v45 = vadd.f32 %v4452_v56, %v4451_v25  ;;  %v7359_v25 = vld [vmem:[#allocation8 + $0x94] ss:$12 sps:$4 sm:$0xff]   ;;  %v7357_v56 = vld [vmem:[#allocation8 + $0x90] ss:$12 sps:$4 sm:$0xff]  }
 0xf78   :  { %v7362_v44 = vld [vmem:[#allocation8 + $0x214] ss:$12 sps:$4 sm:$0xff]   ;;  %v7365_v58 = vld [vmem:[#allocation8 + $0x7c] ss:$12 sps:$4 sm:$0xff]  }
 0xf79   :  { %v4448_v61 = vadd.f32 %v4447_v59, %v4446_v50  ;;  %v4462_v8 = vadd.f32 %v4461_v40, %v4460_v51  ;;  %v4454_v48 = vrot.slane %v4453_v45, 2  ;;  %v8978_v50 = vpack.c.bf16 %v4433_v29, %v4433_v29  ;;  %v7354_v51 = vld [vmem:[#allocation8 + $0x228] ss:$12 sps:$4 sm:$0xff]   ;;  %v7360_v59 = vld [vmem:[#allocation8 + $0x210] ss:$12 sps:$4 sm:$0xff]  }
 0xf7a   :  { %v4421_v40 = vmax.f32 %v8916_v54, %v8957_v6  ;;  %v7375_v54 = vld [vmem:[#allocation8 + $0x48] ss:$12 sps:$4 sm:$0xff]   ;;  %v7380_v6 = vld [vmem:[#allocation8 + $0x1cc] ss:$12 sps:$4 sm:$0xff]  }
 0xf7b   :  { %v4449_v10 = vrot.slane %v4448_v61, 1  ;;  %v4463_v27 = vrot.slane %v4462_v8, 1  ;;  %v4455_v47 = vadd.f32 %v4454_v48, %v4453_v45  ;;  %v7363_v45 = vld [vmem:[#allocation8 + $0x78] ss:$12 sps:$4 sm:$0xff]   ;;  %v7410_v24 = vld [vmem:[#allocation8 + $0x13c] ss:$12 sps:$4 sm:$0xff]  }
 0xf7c   :  { %v7366_v48 = vld [vmem:[#allocation8 + $0x1f8] ss:$12 sps:$4 sm:$0xff]  }
 0xf7d   :  { %v4464_v60 = vadd.f32 %v4463_v27, %v4462_v8  ;;  %v4456_v41 = vrot.slane %v4455_v47, 1  ;;  %v4450_v28 = vadd.f32 %v4449_v10, %v4448_v61  ;;  %v7368_v61 = vld [vmem:[#allocation8 + $0x1fc] ss:$12 sps:$4 sm:$0xff]   ;;  %v7371_v8 = vld [vmem:[#allocation8 + $0x64] ss:$12 sps:$4 sm:$0xff]   ;;  %v4434_v10 = vrot.slane %v4421_v40, 4 }
 0xf7e   :  { %v7369_v27 = vld [vmem:[#allocation8 + $0x60] ss:$12 sps:$4 sm:$0xff]  }
 0xf7f   :  { %v8962_v34 = vpack.c.bf16 %v4464_v60, %v4464_v60  ;;  %v4457_v3 = vadd.f32 %v4456_v41, %v4455_v47  ;;  %v8965_v20 = vpack.c.bf16 %v4450_v28, %v4450_v28  ;;  %v7374_v47 = vld [vmem:[#allocation8 + $0x1e4] ss:$12 sps:$4 sm:$0xff]   ;;  %v7377_v60 = vld [vmem:[#allocation8 + $0x4c] ss:$12 sps:$4 sm:$0xff]   ;;  %v4435_v41 = vadd.f32 %v4434_v10, %v4421_v40  ;;  %v7383_v28 = vld [vmem:[#allocation8 + $0x34] ss:$12 sps:$4 sm:$0xff]  }
 0xf80   :  { %v7420_v29 = vld [vmem:[#allocation8 + $0x10c] ss:$12 sps:$4 sm:$0xff]  }
 0xf81   :  { %5121 = vmatmul.mubr.bf16.vlgmr.msra.gmra.mxu1 %v8962_v34  ;;  %v4565_v19 = vpack.c.bf16 %v4457_v3, %v4457_v3  ;;  %v7381_v3 = vld [vmem:[#allocation8 + $0x30] ss:$12 sps:$4 sm:$0xff]   ;;  %v7431_v40 = vld [vmem:[#allocation8 + $0x38] ss:$12 sps:$4 sm:$0xff]   ;;  %v7436_v10 = vld [vmem:[#allocation8 + $0x20] ss:$12 sps:$4 sm:$0xff]  }
 0xf82   :  { %6465 = vmatpush3.bf16.msra.mxu1 %v7328_v2  ;;  %v7378_v2 = vld [vmem:[#allocation8 + $0x1c8] ss:$12 sps:$4 sm:$0xff]  }
 0xf83   :  { %5079 = vmatprep.mubr.bf16.mxu0 %v4565_v19  ;;  %5161 = vmatprep.mubr.bf16.mxu1 %v4565_v19  ;;  %v7389_v19 = vld [vmem:[#allocation8 + $0x1c] ss:$12 sps:$4 sm:$0xff]  }
 0xf84   :  { %5080 = vmatmul.mubr.bf16.vlgmr.msra.gmra.mxu0 %v8965_v20  ;;  %6466 = vmatprep.subr.bf16.mxu1 %v7329_v62  ;;  %v7386_v62 = vld [vmem:[#allocation8 + $0x1b4] ss:$12 sps:$4 sm:$0xff]  }
 0xf85   :  { %6661 = vmatpush3.bf16.msra.mxu0 %v7330_v9  ;;  %6676 = vmatprep.mubr.msk.bf16.mxu0 %vm7599_vm0, %v7598_v52  ;;  %v7384_v9 = vld [vmem:[#allocation8 + $0x1b0] ss:$12 sps:$4 sm:$0xff]  }
 0xf86   :  { %6467 = vmatpush3.bf16.msra.mxu1 %v7331_v16  ;;  %6662 = vmatprep.subr.bf16.mxu0 %v7598_v52  ;;  %v7387_v16 = vld [vmem:[#allocation8 + $0x18] ss:$12 sps:$4 sm:$0xff]  }
 0xf87   :  { %6468 = vmatprep.subr.bf16.mxu1 %v7332_v14  ;;  %v7392_v14 = vld [vmem:[#allocation8 + $0x19c] ss:$12 sps:$4 sm:$0xff]  }
 0xf89   :  { %6663 = vmatpush3.bf16.msra.mxu0 %v7333_v63  ;;  %v7390_v63 = vld [vmem:[#allocation8 + $0x198] ss:$12 sps:$4 sm:$0xff]  }
 0xf8a   :  { %6469 = vmatpush3.bf16.msra.mxu1 %v7334_v38  ;;  %6664 = vmatprep.subr.bf16.mxu0 %v7598_v52 }
 0xf8b   :  { %6470 = vmatprep.subr.bf16.mxu1 %v7335_v22  ;;  %v7393_v22 = vld [vmem:[#allocation8] ss:$12 sps:$4 sm:$0xff]  }
 0xf8d   :  { %6665 = vmatpush3.bf16.msra.mxu0 %v7336_v0  ;;  %v7401_v0 = vld [vmem:[#allocation8 + $0x16c] ss:$12 sps:$4 sm:$0xff]  }
 0xf8e   :  { %6471 = vmatpush3.bf16.msra.mxu1 %v7337_v53  ;;  %6666 = vmatprep.subr.bf16.mxu0 %v7598_v52  ;;  %v7396_v53 = vld [vmem:[#allocation8 + $0x180] ss:$12 sps:$4 sm:$0xff]  }
 0xf8f   :  { %6472 = vmatprep.subr.bf16.mxu1 %v7338_v11 }
 0xf91   :  { %6667 = vmatpush3.bf16.msra.mxu0 %v7339_v7  ;;  %v7402_v7 = vld [vmem:[#allocation8 + $0x170] ss:$12 sps:$4 sm:$0xff]  }
 0xf92   :  { %6473 = vmatpush3.bf16.msra.mxu1 %v7340_v15  ;;  %6668 = vmatprep.subr.bf16.mxu0 %v7598_v52  ;;  %v7405_v15 = vld [vmem:[#allocation8 + $0x154] ss:$12 sps:$4 sm:$0xff]  }
 0xf93   :  { %6474 = vmatprep.subr.bf16.mxu1 %v7341_v18  ;;  %v7406_v18 = vld [vmem:[#allocation8 + $0xb0] ss:$12 sps:$4 sm:$0xff]  }
 0xf95   :  { %6669 = vmatpush3.bf16.msra.mxu0 %v7342_v49  ;;  %v7403_v49 = vld [vmem:[#allocation8 + $0x150] ss:$12 sps:$4 sm:$0xff]  }
 0xf96   :  { %6475 = vmatpush3.bf16.msra.mxu1 %v7343_v55  ;;  %6670 = vmatprep.subr.bf16.mxu0 %v7598_v52  ;;  %v7407_v55 = vld [vmem:[#allocation8 + $0x158] ss:$12 sps:$4 sm:$0xff]  }
 0xf97   :  { %6476 = vmatprep.subr.bf16.mxu1 %v7344_v23  ;;  %v4419_v23 = vmax.f32 %v8918_v5, %v8955_v4  ;;  %v7413_v5 = vld [vmem:[#allocation8 + $0x120] ss:$12 sps:$4 sm:$0xff]   ;;  %v7417_v4 = vld [vmem:[#allocation8 + $0x128] ss:$12 sps:$4 sm:$0xff]  }
 0xf99   :  { %6671 = vmatpush3.bf16.msra.mxu0 %v7345_v31  ;;  %v7411_v31 = vld [vmem:[#allocation8 + $0x98] ss:$12 sps:$4 sm:$0xff]   ;;  %v4422_v12 = vrot.slane %v4419_v23, 4 }
 0xf9a   :  { %6477 = vmatpush3.bf16.msra.mxu1 %v7346_v32  ;;  %6672 = vmatprep.subr.bf16.mxu0 %v7598_v52  ;;  %v7408_v32 = vld [vmem:[#allocation8 + $0x138] ss:$12 sps:$4 sm:$0xff]  }
 0xf9b   :  { %6478 = vmatprep.subr.bf16.mxu1 %v7347_v33  ;;  %v7412_v33 = vld [vmem:[#allocation8 + $0x140] ss:$12 sps:$4 sm:$0xff]  }
 0xf9d   :  { %6673 = vmatpush3.bf16.msra.mxu0 %v7348_v36  ;;  %v7415_v36 = vld [vmem:[#allocation8 + $0x124] ss:$12 sps:$4 sm:$0xff]  }
 0xf9e   :  { %6479 = vmatpush3.bf16.msra.mxu1 %v7349_v37  ;;  %6674 = vmatprep.subr.bf16.mxu0 %v7598_v52  ;;  %v7416_v37 = vld [vmem:[#allocation8 + $0x80] ss:$12 sps:$4 sm:$0xff]  }
 0xf9f   :  { %5593 = vmatprep.subr.bf16.mxu1 %v7353_v46  ;;  %v4423_v46 = vadd.f32 %v4422_v12, %v4419_v23 }
 0xfa1   :  { %5162 = vmatmul.mubr.bf16.vlgmr.msra.gmra.mxu1 %v8965_v20  ;;  %6675 = vmatpush3.bf16.msra.mxu0 %v7350_v57  ;;  %v7421_v57 = vld [vmem:[#allocation8 + $0x68] ss:$12 sps:$4 sm:$0xff]  }
 0xfa2   :  { %5594 = vmatpush1.bf16.msra.mxu1 %v7351_v17  ;;  %5625 = vmatprep.mubr.bf16.mxu1 %v8978_v50  ;;  %v7418_v17 = vld [vmem:[#allocation8 + $0x108] ss:$12 sps:$4 sm:$0xff]  }
 0xfa3   :  { %5634 = vmatprep.subr.bf16.mxu0 %v7356_v26  ;;  %5595 = vmatprep.subr.bf16.mxu1 %v7359_v25  ;;  %v7422_v26 = vld [vmem:[#allocation8 + $0x110] ss:$12 sps:$4 sm:$0xff]   ;;  %v4424_v25 = vrot.slane %v4423_v46, 2 }
 0xfa4   :  { %6677 = vmatmul.mubr.bf16.vlgmr.msra.gmra.mxu0 %v8962_v34  ;;  %v4436_v34 = vrot.slane %v4435_v41, 2 }
 0xfa5   :  { %5635 = vmatpush1.bf16.msra.mxu0 %v7354_v51  ;;  %5666 = vmatprep.mubr.bf16.mxu0 %v7597_v1  ;;  %v7372_v1 = vld [vmem:[#allocation8 + $0x1e0] ss:$12 sps:$4 sm:$0xff]   ;;  %v7426_v51 = vld [vmem:[#allocation8 + $0x50] ss:$12 sps:$4 sm:$0xff]  }
 0xfa6   :  { %5596 = vmatpush1.bf16.msra.mxu1 %v7357_v56  ;;  %5636 = vmatprep.subr.bf16.mxu0 %v7362_v44  ;;  %v4437_v20 = vadd.f32 %v4436_v34, %v4435_v41  ;;  %v7423_v56 = vld [vmem:[#allocation8 + $0xf0] ss:$12 sps:$4 sm:$0xff]   ;;  %v7427_v44 = vld [vmem:[#allocation8 + $0xf8] ss:$12 sps:$4 sm:$0xff]  }
 0xfa7   :  { %5597 = vmatprep.subr.bf16.mxu1 %v7365_v58  ;;  %v4425_v58 = vadd.f32 %v4424_v25, %v4423_v46  ;;  %v7439_v41 = vld [vmem:[#allocation8 + $0x230] ss:$12 sps:$4 sm:$0xff]  }
 0xfa8   :  { %v4438_v38 = vrot.slane %v4437_v20, 1  ;;  %v7443_v34 = vld [vmem:[#allocation8 + $0x1d0] ss:$12 sps:$4 sm:$0xff]  }
 0xfa9   :  { %5637 = vmatpush1.bf16.msra.mxu0 %v7360_v59  ;;  %v7430_v59 = vld [vmem:[#allocation8 + $0xdc] ss:$12 sps:$4 sm:$0xff]  }
 0xfaa   :  { %5598 = vmatpush1.bf16.msra.mxu1 %v7363_v45  ;;  %5638 = vmatprep.subr.bf16.mxu0 %v7368_v61  ;;  %v4439_v11 = vadd.f32 %v4438_v38, %v4437_v20  ;;  %v7428_v45 = vld [vmem:[#allocation8 + $0xd8] ss:$12 sps:$4 sm:$0xff]   ;;  %v7432_v61 = vld [vmem:[#allocation8 + $0xe0] ss:$12 sps:$4 sm:$0xff]  }
 0xfab   :  { %5599 = vmatprep.subr.bf16.mxu1 %v7371_v8  ;;  %v4426_v8 = vrot.slane %v4425_v58, 1 }
 0xfac   :  { %v8986_v35 = vpack.c.bf16 %v4439_v11, %v4439_v11 }
 0xfad   :  { %5639 = vmatpush1.bf16.msra.mxu0 %v7366_v48  ;;  %v7435_v48 = vld [vmem:[#allocation8 + $0xc4] ss:$12 sps:$4 sm:$0xff]  }
 0xfae   :  { %5600 = vmatpush1.bf16.msra.mxu1 %v7369_v27  ;;  %5640 = vmatprep.subr.bf16.mxu0 %v7374_v47  ;;  %v7433_v27 = vld [vmem:[#allocation8 + $0xc0] ss:$12 sps:$4 sm:$0xff]   ;;  %v7437_v47 = vld [vmem:[#allocation8 + $0xc8] ss:$12 sps:$4 sm:$0xff]  }
 0xfaf   :  { %5601 = vmatprep.subr.bf16.mxu1 %v7377_v60  ;;  %v4427_v60 = vadd.f32 %v4426_v8, %v4425_v58 }
 0xfb1   :  { %5641 = vmatpush1.bf16.msra.mxu0 %v7372_v1  ;;  %v7438_v1 = vld [vmem:[#allocation8 + $0x8] ss:$12 sps:$4 sm:$0xff]  }
 0xfb2   :  { %5602 = vmatpush1.bf16.msra.mxu1 %v7375_v54  ;;  %5642 = vmatprep.subr.bf16.mxu0 %v7380_v6  ;;  %v4465_v54 = vpack.c.bf16 %v4427_v60, %v4427_v60  ;;  %v7440_v6 = vld [vmem:[#allocation8 + $0x218] ss:$12 sps:$4 sm:$0xff]  }
 0xfb3   :  { %5603 = vmatprep.subr.bf16.mxu1 %v7383_v28  ;;  %v7441_v28 = vld [vmem:[#allocation8 + $0x200] ss:$12 sps:$4 sm:$0xff]  }
 0xfb5   :  { %5643 = vmatpush1.bf16.msra.mxu0 %v7378_v2  ;;  %v7442_v2 = vld [vmem:[#allocation8 + $0x1e8] ss:$12 sps:$4 sm:$0xff]  }
 0xfb6   :  { %5604 = vmatpush1.bf16.msra.mxu1 %v7381_v3  ;;  %5644 = vmatprep.subr.bf16.mxu0 %v7386_v62  ;;  %v7444_v3 = vld [vmem:[#allocation8 + $0x1b8] ss:$12 sps:$4 sm:$0xff]   ;;  %v7445_v62 = vld [vmem:[#allocation8 + $0x1a0] ss:$12 sps:$4 sm:$0xff]  }
 0xfb7   :  { %5605 = vmatprep.subr.bf16.mxu1 %v7389_v19  ;;  %v7446_v19 = vld [vmem:[#allocation8 + $0x188] ss:$12 sps:$4 sm:$0xff]  }
 0xfb9   :  { %5645 = vmatpush1.bf16.msra.mxu0 %v7384_v9 }
 0xfba   :  { %5606 = vmatpush1.bf16.msra.mxu1 %v7387_v16  ;;  %5646 = vmatprep.subr.bf16.mxu0 %v7392_v14 }
 0xfbb   :  { %5607 = vmatprep.subr.bf16.mxu1 %v7395_v21 }
 0xfbd   :  { %5647 = vmatpush1.bf16.msra.mxu0 %v7390_v63 }
 0xfbe   :  { %5608 = vmatpush1.bf16.msra.mxu1 %v7393_v22  ;;  %5648 = vmatprep.subr.bf16.mxu0 %v7398_v39 }
 0xfbf   :  { %5609 = vmatprep.subr.bf16.mxu1 %v7401_v0 }
 0xfc1   :  { %5649 = vmatpush1.bf16.msra.mxu0 %v7396_v53 }
 0xfc2   :  { %5610 = vmatpush2.bf16.msra.mxu1 %v7399_v43  ;;  %6495 = vmatprep.subr.bf16.mxu0 %v7402_v7 }
 0xfc3   :  { %5611 = vmatprep.subr.bf16.mxu1 %v7405_v15 }
 0xfc4   :  { %5667 = vmatmul.mubr.bf16.vlgmr.msra.gmra.mxu0 %v8986_v35 }
 0xfc5   :  { %6496 = vmatpush3.bf16.msra.mxu0 %v7406_v18  ;;  %5707 = vmatprep.mubr.bf16.mxu0 %v8978_v50  ;;  %v7425_v50 = vld [vmem:[#allocation8 + $0xf4] ss:$12 sps:$4 sm:$0xff]  }
 0xfc6   :  { %5612 = vmatpush2.bf16.msra.mxu1 %v7403_v49  ;;  %6497 = vmatprep.subr.bf16.mxu0 %v7407_v55 }
 0xfc7   :  { %5613 = vmatprep.subr.bf16.mxu1 %v7410_v24 }
 0xfc9   :  { %6498 = vmatpush3.bf16.msra.mxu0 %v7411_v31 }
 0xfca   :  { %5614 = vmatpush2.bf16.msra.mxu1 %v7408_v32  ;;  %6499 = vmatprep.subr.bf16.mxu0 %v7412_v33  ;;  %v5755_v33 = vld [vmem:[%s9037_s16] sm:$0x7]  ;;  %s7601_s16 = smov [#allocation11]  }
 0xfcb   :  { %5615 = vmatprep.subr.bf16.mxu1 %v7415_v36 }
 0xfcd   :  { %6500 = vmatpush3.bf16.msra.mxu0 %v7416_v37  ;;  %v5760_v37 = vrot.slane %v5755_v33, %v8495_v42 }
 0xfce   :  { %5616 = vmatpush2.bf16.msra.mxu1 %v7413_v5  ;;  %6501 = vmatprep.subr.bf16.mxu0 %v7417_v4  ;;  %v5778_v4 = vld [vmem:[%s9038_s17] sm:$0x7]  ;;  %s5816_s17 = sshll.u32 %s7601_s16, 4  ;;  %s5817_s17 = int_to_ptr.vmem [resolvable:$true] %s5816_s17 }
 0xfcf   :  { %5617 = vmatprep.subr.bf16.mxu1 %v7420_v29  ;;  %s7563_s5 = scalar_lea.vmem %s5817_s17, 16  ;;  %s7567_s4 = scalar_lea.vmem %s5817_s17, 32 }
 0xfd0   :  { %p7564_p6 = scmp.ne.s32.totalorder %s5817_s17, %s7563_s5  ;;  %p7568_p7 = scmp.lt.s32.totalorder %s5817_s17, %s5817_s17 }
 0xfd1   :  { %6502 = vmatpush3.bf16.msra.mxu0 %v7421_v57  ;;  %v5764_v57 = vrot.slane %v5755_v33, %v8476_v13  ;;  %p7569_p8 = scmp.lt.s32.totalorder %s7567_s4, %s7563_s5 }
 0xfd2   :  { %5618 = vmatpush2.bf16.msra.mxu1 %v7418_v17  ;;  %6503 = vmatprep.subr.bf16.mxu0 %v7422_v26 }
 0xfd3   :  { %5619 = vmatprep.subr.bf16.mxu1 %v7425_v50  ;;  %p7570_p9 = por %p7569_p8, %p7568_p7 }
 0xfd5   :  { %6504 = vmatpush3.bf16.msra.mxu0 %v7426_v51  ;;  %p7571_p10 = pnand %p7570_p9, %p7564_p6 }
 0xfd6   :  { %5620 = vmatpush2.bf16.msra.mxu1 %v7423_v56  ;;  %6505 = vmatprep.subr.bf16.mxu0 %v7427_v44  ;;  %v5783_v56 = vrot.slane %v5778_v4, %v8495_v42  ;;  %v5768_v42 = vrot.slane %v5755_v33, %v8486_v30 }
 0xfd7   :  { %5621 = vmatprep.subr.bf16.mxu1 %v7430_v59 }
 0xfd9   :  { %6506 = vmatpush3.bf16.msra.mxu0 %v7431_v40 }
 0xfda   :  { %5622 = vmatpush2.bf16.msra.mxu1 %v7428_v45  ;;  %6507 = vmatprep.subr.bf16.mxu0 %v7432_v61  ;;  %v5787_v45 = vrot.slane %v5778_v4, %v8476_v13  ;;  %v5791_v13 = vrot.slane %v5778_v4, %v8486_v30 }
 0xfdb   :  { %5623 = vmatprep.subr.bf16.mxu1 %v7435_v48 }
 0xfdd   :  { %6508 = vmatpush3.bf16.msra.mxu0 %v7436_v10 }
 0xfde   :  { %5624 = vmatpush2.bf16.msra.mxu1 %v7433_v27  ;;  %6509 = vmatprep.subr.bf16.mxu0 %v7437_v47 }
 0xfdf   :  { %6680 = vmatprep.subr.bf16.mxu1 %v7598_v52 }
 0xfe1   :  { %5626 = vmatmul.mubr.bf16.vlgmr.msra.gmra.mxu1 %v4465_v54  ;;  %6510 = vmatpush3.bf16.msra.mxu0 %v7438_v1 }
 0xfe2   :  { %6681 = vmatpush3.bf16.msra.mxu1 %v7439_v41  ;;  %6696 = vmatprep.mubr.msk.bf16.mxu1 %vm7599_vm0, %v7598_v52  ;;  %vm5798_vm0 = vcmask 1040384  }
 0xfe3   :  { %6682 = vmatprep.subr.bf16.mxu1 %v7598_v52 }
 0xfe4   :  { %5708 = vmatmul.mubr.bf16.vlgmr.msra.gmra.mxu0 %v4465_v54 }
 0xfe6   :  { %6683 = vmatpush3.bf16.msra.mxu1 %v7440_v6 }
 0xfe7   :  { %6684 = vmatprep.subr.bf16.mxu1 %v7598_v52 }
 0xfea   :  { %6685 = vmatpush3.bf16.msra.mxu1 %v7441_v28 }
 0xfeb   :  { %6686 = vmatprep.subr.bf16.mxu1 %v7598_v52 }
 0xfee   :  { %6687 = vmatpush3.bf16.msra.mxu1 %v7442_v2 }
 0xfef   :  { %6688 = vmatprep.subr.bf16.mxu1 %v7598_v52 }
 0xff2   :  { %6689 = vmatpush3.bf16.msra.mxu1 %v7443_v34 }
 0xff3   :  { %6690 = vmatprep.subr.bf16.mxu1 %v7598_v52 }
 0xff6   :  { %6691 = vmatpush3.bf16.msra.mxu1 %v7444_v3 }
 0xff7   :  { %6692 = vmatprep.subr.bf16.mxu1 %v7598_v52 }
 0xffa   :  { %6693 = vmatpush3.bf16.msra.mxu1 %v7445_v62 }
 0xffb   :  { %6694 = vmatprep.subr.bf16.mxu1 %v7598_v52 }
 0xffe   :  { %6695 = vmatpush3.bf16.msra.mxu1 %v7446_v19 }
0x1001   :  { %6697 = vmatmul.mubr.bf16.vlgmr.msra.gmra.mxu1 %v8986_v35 }
0x1041   :  { %v5122_v9 = vpop.f32.mrf.mxu1 }
0x1043   :  { %v5124_v20 = vpop.f32.mrf.mxu1 }
0x1044   :  { %v5081_v16 = vpop.f32.mrf.mxu0 }
0x1045   :  { %v5123_v14 = vadd.f32 %v5122_v9, %v5081_v16  ;;  %v5126_v21 = vpop.f32.mrf.mxu1  ;;  %v5806_v16 = vld [vmem:[#allocation2] sm:$0x1] }
0x1046   :  { %v5083_v63 = vpop.f32.mrf.mxu0 }
0x1047   :  { %v5125_v38 = vadd.f32 %v5124_v20, %v5083_v63  ;;  %v5127_v22 = vpop.f32.mrf.mxu1 }
0x1048   :  { %v5085_v39 = vpop.f32.mrf.mxu0 }
0x104a   :  { %v5086_v0 = vpop.f32.mrf.mxu0 }
0x1061   :  { %v6480_v53 = vpop.f32.mrf.mxu1 }
0x1063   :  { %v6481_v11 = vpop.f32.mrf.mxu1 }
0x1064   :  { %v6482_v43 = vadd.f32 %v6481_v11, %v6480_v53  ;;  %v5203_v7 = vpop.f32.mrf.mxu0 }
0x1065   :  { %v6483_v15 = vpop.f32.mrf.mxu1 }
0x1066   :  { %v5204_v18 = vadd.f32 %v6482_v43, %v5203_v7  ;;  %v6678_v52 = vpop.f32.mrf.mxu0 }
0x1067   :  { %v6484_v49 = vpop.f32.mrf.mxu1 }
0x1068   :  { %v5206_v55 = vpop.f32.mrf.mxu0 }
0x106a   :  { %v6679_v35 = vpop.f32.mrf.mxu0 }
0x1084   :  { %v5668_v23 = vpop.f32.mrf.mxu0 }
0x1086   :  { %v5670_v24 = vpop.f32.mrf.mxu0 }
0x1088   :  { %v5672_v31 = vpop.f32.mrf.mxu0 }
0x108a   :  { %v5673_v32 = vpop.f32.mrf.mxu0 }
0x10a1   :  { %v5627_v12 = vpop.f32.mrf.mxu1 }
0x10a2   :  { %v5628_v36 = vadd.f32 %v5627_v12, %v5123_v14 }
0x10a3   :  { %v5629_v5 = vpop.f32.mrf.mxu1 }
0x10a4   :  { %v5669_v46 = vadd.f32 %v5668_v23, %v5628_v36  ;;  %v5630_v29 = vadd.f32 %v5629_v5, %v5125_v38  ;;  %v6511_v17 = vpop.f32.mrf.mxu0 }
0x10a5   :  { %v5631_v26 = vpop.f32.mrf.mxu1 }
0x10a6   :  { %v5772_v25 = vadd.f32 %v5760_v37, %v5669_v46  ;;  %v5671_v50 = vadd.f32 %v5670_v24, %v5630_v29  ;;  %v6512_v51 = vpop.f32.mrf.mxu0 }
0x10a7   :  { %v5632_v44 = vpop.f32.mrf.mxu1  ;;  %v6513_v1 = vadd.f32 %v6512_v51, %v6511_v17 }
0x10a8   :  { %v5775_v58 = vmax.f32 %v5772_v25, 0.0  ;;  %v5773_v59 = vadd.f32 %v5764_v57, %v5671_v50  ;;  %v6514_v40 = vpop.f32.mrf.mxu0 }
0x10a9   :  { %v5710_v41 = vadd.f32 %v6513_v1, %v5204_v18 }
0x10aa   :  { %v5776_v61 = vmax.f32 %v5773_v59, 0.0  ;;  %v6515_v8 = vpop.f32.mrf.mxu0  ;;  %v5795_v48 = vmul.f32 %v5783_v56, %v5775_v58 }
0x10ac   :  { %v5796_v10 = vmul.f32 %v5787_v45, %v5776_v61  ;;  %v5799_v27 = vsel %vm5798_vm0, %v5795_v48, 0.0 }
0x10ae   :  { %v5800_v47 = vsel %vm5798_vm0, %v5796_v10, 0.0 }
0x10af   :  { %v5801_v60 = vadd.f32 %v5800_v47, %v5799_v27 }
0x10c1   :  { %v5749_v54 = vpop.f32.mrf.mxu1 }
0x10c2   :  { %v5750_v6 = vadd.f32 %v5749_v54, %v5710_v41 }
0x10c3   :  { %v6698_v28 = vpop.f32.mrf.mxu1 }
0x10c4   :  { %v5774_v2 = vadd.f32 %v5768_v42, %v5750_v6 }
0x10c5   :  { %v5752_v34 = vpop.f32.mrf.mxu1 }
0x10c6   :  { %v5777_v3 = vmax.f32 %v5774_v2, 0.0 }
0x10c7   :  { %v6699_v62 = vpop.f32.mrf.mxu1 }
0x10c8   :  { %v5797_v19 = vmul.f32 %v5791_v13, %v5777_v3 }
0x10ca   :  { %v5802_v9 = vsel %vm5798_vm0, %v5797_v19, 0.0 }
0x10cb   :  { %v5803_v20 = vadd.f32 %v5802_v9, %v5801_v60 }
0x10cd   :  { %5804 = vadd.xlane.f32.xlu1 %v5803_v20 }
0x1156   :  { %v5805_v14 = vpop.xlane.xlu1 %5804 }
0x1157   :  { %v5807_v21 = vadd.f32 %v5806_v16, %v5805_v14 }
0x1159   :  { %5809 = vst.msk [vmem:[#allocation11] sm:$0x1] %vm5808_vm2, %v5807_v21 }
0x115a   :  { %7574 = shalt.err (!%p7571_p10)
}
0x115b   :  { %5819 = dma.vmem_to_hbm [thread:$0]  %s5817_s17, 16, %s9040_s19, [#allocation5]  }
0x115c   :  { %7589 = dma.done.wait [#allocation5], 16  }
0x115d   :  { %7590 = vsyncadd [#allocation5], 4294967280 }
0x115e   :  { %5823 = vsyncpa [#allocation4], 1 }
0x115f   :  { %5824 = vsyncpa [#allocation7], 1 }
0x1160   :  { %5825 = vsyncpa [#allocation10], 1 }
0x1161   :  { %5826 = vsyncpa [#allocation5], 1 }

</bundles_post_ra>
